<compile_context>
chip_gen: v6e
topology: v6e:2x2x1
jax: 0.10.0
libtpu: 0.0.40
codegen_flags: <defaults>
</compile_context>

<pallas_src>
import functools

import jax
import jax.numpy as jnp
from jax.experimental import pallas as pl
from jax.experimental.pallas import tpu as pltpu


_C = 64                        # base channels
_G = 32                        # growth channels
_CD = _C + 4 * _G              # 192 = dense-feature width inside an RDB
_CD3 = 3 * _CD                 # 576 = packed (3 dw taps) cout width
_RDB_CIN = (64, 96, 128, 160, 192)
_RDB_COUT = (32, 32, 32, 32, 64)
_RDB_BCOL = (0, 32, 64, 96, 128)            # bias column offset per conv
_RDB_WCOL3 = tuple(3 * c for c in _RDB_BCOL)  # packed-weight column offset


@functools.lru_cache(maxsize=None)
def _vmem_limit_bytes():
    """~3/4 of physical VMEM: ~96 MiB on v5e/v6e (128 MiB), ~48 MiB on v7x (64 MiB)."""
    try:
        cap = int(pltpu.get_tpu_info().vmem_capacity_bytes)
    except Exception:
        cap = 128 * 1024 * 1024
    return max(32 * 1024 * 1024, (cap * 3) // 4)


def _zero_halo_ring(buf, H, W):
    """Zero only the 1-px halo ring of a (H+2, W+2, C) scratch buffer."""
    Hp, Wp, C = H + 2, W + 2, buf.shape[2]
    zrow = jnp.zeros((1, Wp, C), buf.dtype)
    buf[0:1, :, :] = zrow
    buf[H + 1:H + 2, :, :] = zrow
    zcol = jnp.zeros((Hp, 1, C), buf.dtype)
    buf[:, 0:1, :] = zcol
    buf[:, W + 1:W + 2, :] = zcol


def _conv3x3(feat, w_dh_slices, H, W, cout):
    """3x3 'same' conv on a zero-halo (H+2, W+2, >=cin) bf16 scratch.

    w_dh_slices: list of 3 (cin, 3*cout) bf16 weight slabs, one per row shift
    dh, with the 3 dw taps concatenated along the output dim. Returns the f32
    (H, W, cout) pre-bias result.
    """
    Wp = W + 2
    acc = None
    for dh in range(3):
        # Leading-dim (row) slice only: no sublane/lane shift on the matmul input.
        rows = w_dh_slices[dh][0][dh:dh + H, :, 0:w_dh_slices[dh][2]]
        rows = rows.reshape(H * Wp, w_dh_slices[dh][2])
        part = jnp.dot(rows, w_dh_slices[dh][1],
                       preferred_element_type=jnp.float32)
        acc = part if acc is None else acc + part
    accv = acc.reshape(H, Wp, 3 * cout)
    # Combine the three dw-shifted windows of the packed result.
    return (accv[:, 0:W, 0:cout]
            + accv[:, 1:W + 1, cout:2 * cout]
            + accv[:, 2:W + 2, 2 * cout:3 * cout])


# ----------------------------------------------------------------------------
# Kernel 1: fused chain of 3x3 "same" convs (optional LeakyReLU per layer,
# optional fused residual adds on the final layer).
# Used for conv1 / conv1_d / conv2(+out1) / conv2_d(+out1_d,+out) / up1 and the
# tail (up2 -> conv3 -> conv4).
# ----------------------------------------------------------------------------
def _chain_kernel(*refs, H, W, layers, n_res):
    # refs = x_ref, res_ref*n_res, w_ref, b_ref, o_ref, scratch...
    # x_ref : (1, H, W, cin0)                   bf16 input tile
    # res   : (1, H, W, cout_last)              bf16 residuals added to output
    # w_ref : (L, 3, cin_max, 3*cout_max)       bf16 packed weights [dw0|dw1|dw2]
    # b_ref : (L, 1, cout_max)                  f32 packed biases
    # o_ref : (1, H, W, cout_last)
    # scratch: 1 or 2 zero-halo (H+2, W+2, cmax) bf16 buffers
    L = len(layers)
    x_ref = refs[0]
    res_refs = refs[1:1 + n_res]
    w_ref, b_ref, o_ref = refs[1 + n_res], refs[2 + n_res], refs[3 + n_res]
    scratch = refs[4 + n_res:]

    for buf in scratch:
        _zero_halo_ring(buf, H, W)

    cin0 = layers[0][0]
    scratch[0][1:H + 1, 1:W + 1, 0:cin0] = x_ref[0]

    src = 0
    for li, (cin, cout, leaky) in enumerate(layers):
        fin = scratch[src]
        w_dh = [(fin, w_ref[li, dh, 0:cin, 0:3 * cout], cin) for dh in range(3)]
        out = _conv3x3(fin, w_dh, H, W, cout)
        out = out + b_ref[li, 0:1, 0:cout]
        if leaky:
            out = jnp.where(out >= 0, out, 0.2 * out)
        if li == L - 1:
            for rr in res_refs:                       # fused skip additions
                out = out + rr[0].astype(jnp.float32)
            o_ref[...] = out.reshape(1, H, W, cout).astype(o_ref.dtype)
        else:
            dst = 1 - src
            scratch[dst][1:H + 1, 1:W + 1, 0:cout] = out.astype(scratch[dst].dtype)
            src = dst


@functools.lru_cache(maxsize=None)
def _make_chain_call(N, H, W, layers, n_res):
    L = len(layers)
    cin0 = layers[0][0]
    cout_last = layers[-1][1]
    cin_max = max(l[0] for l in layers)
    cout_max = max(l[1] for l in layers)
    # Scratch holds every layer's input; require channel-contiguous chaining so
    # cin_max always covers every intermediate width (review correctness note).
    for a, b in zip(layers[:-1], layers[1:]):
        assert a[1] == b[0], "chain layers must chain cout -> cin"
    cmax = cin_max
    n_scratch = 1 if L == 1 else 2
    kernel = functools.partial(_chain_kernel, H=H, W=W, layers=layers, n_res=n_res)
    res_specs = [pl.BlockSpec((1, H, W, cout_last), lambda n: (n, 0, 0, 0))
                 for _ in range(n_res)]
    return jax.jit(pl.pallas_call(
        kernel,
        out_shape=jax.ShapeDtypeStruct((N, H, W, cout_last), jnp.bfloat16),
        grid_spec=pltpu.PrefetchScalarGridSpec(
            num_scalar_prefetch=0,
            grid=(N,),
            in_specs=(
                [pl.BlockSpec((1, H, W, cin0), lambda n: (n, 0, 0, 0))]
                + res_specs
                + [pl.BlockSpec((L, 3, cin_max, 3 * cout_max),
                                lambda n: (0, 0, 0, 0)),
                   pl.BlockSpec((L, 1, cout_max), lambda n: (0, 0, 0))]),
            out_specs=pl.BlockSpec((1, H, W, cout_last), lambda n: (n, 0, 0, 0)),
            scratch_shapes=[pltpu.VMEM((H + 2, W + 2, cmax), jnp.bfloat16)
                            for _ in range(n_scratch)],
        ),
        compiler_params=pltpu.CompilerParams(
            dimension_semantics=("parallel",),
            vmem_limit_bytes=_vmem_limit_bytes()),
    ))


def conv_chain(x, packed, layers, residuals=()):
    wp, bp = packed
    N, H, W, _ = x.shape
    return _make_chain_call(N, H, W, layers, len(residuals))(x, *residuals, wp, bp)


# ----------------------------------------------------------------------------
# Kernel 2: one full ResidualInResidualDenseBlock (3 RDBs, 15 convs) per call.
# x, c1..c4 and both residual paths live in one zero-halo VMEM scratch; no
# intermediate ever touches HBM.
# ----------------------------------------------------------------------------
def _rrdb_kernel(x_ref, w_ref, b_ref, o_ref, feat, *, H, W):
    # x_ref : (1, H, W, 64)       bf16
    # w_ref : (3, 3, 192, 576)    bf16 packed (RDB, dh, cin, [conv|dw] cout)
    # b_ref : (3, 1, 192)         f32 packed biases
    # o_ref : (1, H, W, 64)       bf16
    # feat  : (H+2, W+2, 192)     bf16 scratch: zero halo + [x | c1 | c2 | c3 | c4]
    _zero_halo_ring(feat, H, W)
    feat[1:H + 1, 1:W + 1, 0:_C] = x_ref[0]

    def conv(r, k):
        cin, cout, co3 = _RDB_CIN[k], _RDB_COUT[k], _RDB_WCOL3[k]
        w_dh = [(feat, w_ref[r, dh, 0:cin, co3:co3 + 3 * cout], cin)
                for dh in range(3)]
        out = _conv3x3(feat, w_dh, H, W, cout)
        return out + b_ref[r, 0:1, _RDB_BCOL[k]:_RDB_BCOL[k] + cout]

    for r in range(3):                               # unrolled (review item)
        # conv1..conv4: LeakyReLU(0.2); outputs appended to the dense features.
        for k in range(4):
            a = conv(r, k)
            a = jnp.where(a >= 0, a, 0.2 * a)
            feat[1:H + 1, 1:W + 1, _C + _G * k:_C + _G * (k + 1)] = (
                a.astype(feat.dtype))
        # conv5 (linear) + local residual: x <- 0.2 * conv5 + x
        c5 = conv(r, 4)
        x_old = feat[1:H + 1, 1:W + 1, 0:_C].astype(jnp.float32)
        feat[1:H + 1, 1:W + 1, 0:_C] = (c5 * 0.2 + x_old).astype(feat.dtype)

    out = (feat[1:H + 1, 1:W + 1, 0:_C].astype(jnp.float32) * 0.2
           + x_ref[0].astype(jnp.float32))
    o_ref[...] = out.reshape(1, H, W, _C).astype(o_ref.dtype)


@functools.lru_cache(maxsize=None)
def _make_rrdb_call(N, H, W):
    kernel = functools.partial(_rrdb_kernel, H=H, W=W)
    return jax.jit(pl.pallas_call(
        kernel,
        out_shape=jax.ShapeDtypeStruct((N, H, W, _C), jnp.bfloat16),
        grid_spec=pltpu.PrefetchScalarGridSpec(
            num_scalar_prefetch=0,
            grid=(N,),
            in_specs=[
                pl.BlockSpec((1, H, W, _C), lambda n: (n, 0, 0, 0)),
                pl.BlockSpec((3, 3, _CD, _CD3), lambda n: (0, 0, 0, 0)),
                pl.BlockSpec((3, 1, _CD), lambda n: (0, 0, 0)),
            ],
            out_specs=pl.BlockSpec((1, H, W, _C), lambda n: (n, 0, 0, 0)),
            scratch_shapes=[pltpu.VMEM((H + 2, W + 2, _CD), jnp.bfloat16)],
        ),
        compiler_params=pltpu.CompilerParams(
            dimension_semantics=("parallel",),
            vmem_limit_bytes=_vmem_limit_bytes()),
    ))


def rrdb_block(x, packed):
    wp, bp = packed
    N, H, W, _ = x.shape
    return _make_rrdb_call(N, H, W)(x, wp, bp)


# ----------------------------------------------------------------------------
# Parameter construction (deterministic, mirrors the PyTorch __init__ shapes)
# ----------------------------------------------------------------------------
def _conv_init(key, cin, cout, rdb_style):
    kw, kb = jax.random.split(key)
    fan_in = cin * 9
    if rdb_style:
        # kaiming_normal_ then *0.1, zero bias (ResidualDenseBlock.__init__)
        std = 0.1 * (2.0 / fan_in) ** 0.5
        w = std * jax.random.normal(kw, (3, 3, cin, cout), jnp.float32)
        b = jnp.zeros((cout,), jnp.float32)
    else:
        bound = (1.0 / fan_in) ** 0.5
        w = jax.random.uniform(kw, (3, 3, cin, cout), jnp.float32, -bound, bound)
        b = jax.random.uniform(kb, (cout,), jnp.float32, -bound, bound)
    return w, b


def _pack_chain(convs):
    # Packed layout: (L, dh, cin_max, [dw0 | dw1 | dw2] * cout) for the
    # row-slab matmul formulation.
    L = len(convs)
    cin_max = max(w.shape[2] for w, _ in convs)
    cout_max = max(w.shape[3] for w, _ in convs)
    wp = jnp.zeros((L, 3, cin_max, 3 * cout_max), jnp.float32)
    bp = jnp.zeros((L, 1, cout_max), jnp.float32)
    for i, (w, b) in enumerate(convs):
        cin, cout = w.shape[2], w.shape[3]
        for dh in range(3):
            for dw in range(3):
                wp = wp.at[i, dh, :cin, dw * cout:(dw + 1) * cout].set(w[dh, dw])
        bp = bp.at[i, 0, :cout].set(b)
    return wp.astype(jnp.bfloat16), bp


def _pack_rrdb(key):
    wp = jnp.zeros((3, 3, _CD, _CD3), jnp.float32)
    bp = jnp.zeros((3, 1, _CD), jnp.float32)
    rkeys = jax.random.split(key, 3)
    for r in range(3):
        ckeys = jax.random.split(rkeys[r], 5)
        for k in range(5):
            cin, cout, co3 = _RDB_CIN[k], _RDB_COUT[k], _RDB_WCOL3[k]
            w, b = _conv_init(ckeys[k], cin, cout, rdb_style=True)
            for dh in range(3):
                for dw in range(3):
                    wp = wp.at[r, dh, :cin,
                               co3 + dw * cout:co3 + (dw + 1) * cout].set(w[dh, dw])
            bp = bp.at[r, 0, _RDB_BCOL[k]:_RDB_BCOL[k] + cout].set(b)
    return wp.astype(jnp.bfloat16), bp


def make_generator_params(key, num_rrdb_blocks=16):
    n_d = num_rrdb_blocks // 3
    it = iter(jax.random.split(key, 8 + num_rrdb_blocks + n_d))
    P = {}
    P["conv1"] = _pack_chain([_conv_init(next(it), 3, _C, False)])
    P["trunk"] = [_pack_rrdb(next(it)) for _ in range(num_rrdb_blocks)]
    P["conv2"] = _pack_chain([_conv_init(next(it), _C, _C, False)])
    P["conv1_d"] = _pack_chain([_conv_init(next(it), 1, _C, False)])
    P["trunk_d"] = [_pack_rrdb(next(it)) for _ in range(n_d)]
    P["conv2_d"] = _pack_chain([_conv_init(next(it), _C, _C, False)])
    P["up1"] = _pack_chain([_conv_init(next(it), _C, _C, False)])
    P["tail"] = _pack_chain([_conv_init(next(it), _C, _C, False),   # up2
                             _conv_init(next(it), _C, _C, False),   # conv3
                             _conv_init(next(it), _C, 3, False)])   # conv4
    return P


# Static layer specs (cin, cout, leaky) for each fused chain.
SPEC_CONV_RGB = ((3, _C, False),)
SPEC_CONV_D = ((1, _C, False),)
SPEC_CONV_64 = ((_C, _C, False),)
SPEC_UP = ((_C, _C, True),)
SPEC_TAIL = ((_C, _C, True), (_C, _C, True), (_C, 3, False))


# ----------------------------------------------------------------------------
# Forward pass (NHWC bf16 internally, NCHW f32 at the interface)
# ----------------------------------------------------------------------------
def upsample2_nearest(x):
    # TODO(synk): fuse this 2x nearest upsample into the following conv kernel.
    return jnp.repeat(jnp.repeat(x, 2, axis=1), 2, axis=2)


def generator_d_forward(lr_nchw, depth_nchw, P):
    lr = jnp.transpose(lr_nchw, (0, 2, 3, 1)).astype(jnp.bfloat16)
    depth = jnp.transpose(depth_nchw, (0, 2, 3, 1)).astype(jnp.bfloat16)

    # RGB branch: conv2 kernel also adds the out1 skip (fused).
    out1 = conv_chain(lr, P["conv1"], SPEC_CONV_RGB)
    trunk = out1
    for blk in P["trunk"]:
        trunk = rrdb_block(trunk, blk)
    out = conv_chain(trunk, P["conv2"], SPEC_CONV_64, residuals=(out1,))

    # Depth branch: conv2_d kernel adds out1_d and the RGB result (fused).
    out1_d = conv_chain(depth, P["conv1_d"], SPEC_CONV_D)
    trunk_d = out1_d
    for blk in P["trunk_d"]:
        trunk_d = rrdb_block(trunk_d, blk)
    out = conv_chain(trunk_d, P["conv2_d"], SPEC_CONV_64,
                     residuals=(out1_d, out))

    out = conv_chain(upsample2_nearest(out), P["up1"], SPEC_UP)      # up1 + leaky
    out = conv_chain(upsample2_nearest(out), P["tail"], SPEC_TAIL)   # up2, conv3, conv4

    # TODO(synk): emit conv4 lane-dense / NCHW in-kernel and drop this transpose.
    return jnp.transpose(out, (0, 3, 1, 2)).astype(jnp.float32)


# ----------------------------------------------------------------------------
if __name__ == "__main__":
    key = jax.random.PRNGKey(0)
    k_params, k_lr, k_depth = jax.random.split(key, 3)

    NUM_RRDB_BLOCKS = 3          # small, but exercises both trunks (trunk_d = 1)
    N, H, W = 2, 16, 16

    params = make_generator_params(k_params, num_rrdb_blocks=NUM_RRDB_BLOCKS)
    lr = jax.random.normal(k_lr, (N, 3, H, W), jnp.float32)        # NCHW like PyTorch
    depth = jax.random.normal(k_depth, (N, 1, H, W), jnp.float32)

    fwd = jax.jit(generator_d_forward)
    out = jax.block_until_ready(fwd(lr, depth, params))

    assert out.shape == (N, 3, 4 * H, 4 * W), out.shape
    assert bool(jnp.all(jnp.isfinite(out)))
    print("KERNEL_OK")
</pallas_src>

<mosaic_0001>
module attributes {stable_mosaic.version = 11 : i64} {
  func.func @_chain_kernel(%arg0: i32, %arg1: memref<1x16x16x3xbf16, #tpu.memory_space<vmem>>, %arg2: memref<1x3x3x192xbf16, #tpu.memory_space<vmem>>, %arg3: memref<1x1x64xf32, #tpu.memory_space<vmem>>, %arg4: memref<1x16x16x64xbf16, #tpu.memory_space<vmem>>, %arg5: memref<18x18x3xbf16, #tpu.memory_space<vmem>>) attributes {dimension_semantics = [#tpu.dimension_semantics<parallel>], iteration_bounds = array<i64: 2>, scalar_prefetch = 0 : i64, scratch_operands = 1 : i64, tpu.core_type = #tpu.core_type<tc>, window_params = [{transform_indices = @transform_0, window_bounds = array<i64: 1, 16, 16, 3>}, {pipeline_mode = #tpu.pipeline_mode<synchronous>, transform_indices = @transform_1, window_bounds = array<i64: 1, 3, 3, 192>}, {pipeline_mode = #tpu.pipeline_mode<synchronous>, transform_indices = @transform_2, window_bounds = array<i64: 1, 1, 64>}, {transform_indices = @transform_3, window_bounds = array<i64: 1, 16, 16, 64>}]} {
    %cst = arith.constant 0.000000e+00 : bf16
    %0 = vector.broadcast %cst : bf16 to vector<1x18x3xbf16>
    %c0 = arith.constant 0 : index
    %c0_0 = arith.constant 0 : index
    %c0_1 = arith.constant 0 : index
    %1 = vector.load %arg5[%c0, %c0_0, %c0_1] : memref<18x18x3xbf16, #tpu.memory_space<vmem>>, vector<1x18x3xbf16>
    tpu.vector_store %arg5[%c0, %c0_0, %c0_1], %0 {strides = array<i32>} : memref<18x18x3xbf16, #tpu.memory_space<vmem>>, vector<1x18x3xbf16>,
    %c17 = arith.constant 17 : index
    %c0_2 = arith.constant 0 : index
    %c0_3 = arith.constant 0 : index
    %2 = vector.load %arg5[%c17, %c0_2, %c0_3] : memref<18x18x3xbf16, #tpu.memory_space<vmem>>, vector<1x18x3xbf16>
    tpu.vector_store %arg5[%c17, %c0_2, %c0_3], %0 {strides = array<i32>} : memref<18x18x3xbf16, #tpu.memory_space<vmem>>, vector<1x18x3xbf16>,
    %cst_4 = arith.constant 0.000000e+00 : bf16
    %3 = vector.broadcast %cst_4 : bf16 to vector<18x1x3xbf16>
    %c0_5 = arith.constant 0 : index
    %c0_6 = arith.constant 0 : index
    %c0_7 = arith.constant 0 : index
    %4 = vector.load %arg5[%c0_5, %c0_6, %c0_7] : memref<18x18x3xbf16, #tpu.memory_space<vmem>>, vector<18x1x3xbf16>
    tpu.vector_store %arg5[%c0_5, %c0_6, %c0_7], %3 {strides = array<i32>} : memref<18x18x3xbf16, #tpu.memory_space<vmem>>, vector<18x1x3xbf16>,
    %c0_8 = arith.constant 0 : index
    %c17_9 = arith.constant 17 : index
    %c0_10 = arith.constant 0 : index
    %5 = vector.load %arg5[%c0_8, %c17_9, %c0_10] : memref<18x18x3xbf16, #tpu.memory_space<vmem>>, vector<18x1x3xbf16>
    tpu.vector_store %arg5[%c0_8, %c17_9, %c0_10], %3 {strides = array<i32>} : memref<18x18x3xbf16, #tpu.memory_space<vmem>>, vector<18x1x3xbf16>,
    %c0_11 = arith.constant 0 : index
    %c0_12 = arith.constant 0 : index
    %c0_13 = arith.constant 0 : index
    %c0_14 = arith.constant 0 : index
    %6 = vector.load %arg1[%c0_11, %c0_12, %c0_13, %c0_14] : memref<1x16x16x3xbf16, #tpu.memory_space<vmem>>, vector<1x16x16x3xbf16>
    %7 = vector.shape_cast %6 : vector<1x16x16x3xbf16> to vector<16x16x3xbf16>
    %c1 = arith.constant 1 : index
    %c1_15 = arith.constant 1 : index
    %c0_16 = arith.constant 0 : index
    %8 = vector.load %arg5[%c1, %c1_15, %c0_16] : memref<18x18x3xbf16, #tpu.memory_space<vmem>>, vector<16x16x3xbf16>
    tpu.vector_store %arg5[%c1, %c1_15, %c0_16], %7 {strides = array<i32>} : memref<18x18x3xbf16, #tpu.memory_space<vmem>>, vector<16x16x3xbf16>,
    %c0_17 = arith.constant 0 : index
    %c0_18 = arith.constant 0 : index
    %c0_19 = arith.constant 0 : index
    %c0_20 = arith.constant 0 : index
    %9 = vector.load %arg2[%c0_17, %c0_18, %c0_19, %c0_20] : memref<1x3x3x192xbf16, #tpu.memory_space<vmem>>, vector<1x1x3x192xbf16>
    %10 = vector.shape_cast %9 : vector<1x1x3x192xbf16> to vector<3x192xbf16>
    %c0_21 = arith.constant 0 : index
    %c1_22 = arith.constant 1 : index
    %c0_23 = arith.constant 0 : index
    %c0_24 = arith.constant 0 : index
    %11 = vector.load %arg2[%c0_21, %c1_22, %c0_23, %c0_24] : memref<1x3x3x192xbf16, #tpu.memory_space<vmem>>, vector<1x1x3x192xbf16>
    %12 = vector.shape_cast %11 : vector<1x1x3x192xbf16> to vector<3x192xbf16>
    %c0_25 = arith.constant 0 : index
    %c2 = arith.constant 2 : index
    %c0_26 = arith.constant 0 : index
    %c0_27 = arith.constant 0 : index
    %13 = vector.load %arg2[%c0_25, %c2, %c0_26, %c0_27] : memref<1x3x3x192xbf16, #tpu.memory_space<vmem>>, vector<1x1x3x192xbf16>
    %14 = vector.shape_cast %13 : vector<1x1x3x192xbf16> to vector<3x192xbf16>
    %c0_28 = arith.constant 0 : index
    %c0_29 = arith.constant 0 : index
    %c0_30 = arith.constant 0 : index
    %15 = vector.load %arg5[%c0_28, %c0_29, %c0_30] : memref<18x18x3xbf16, #tpu.memory_space<vmem>>, vector<16x18x3xbf16>
    %16 = vector.shape_cast %15 : vector<16x18x3xbf16> to vector<288x3xbf16>
    %cst_31 = arith.constant dense<0.000000e+00> : vector<288x192xf32>
    %17 = tpu.matmul %16, %10, %cst_31 {dimension_numbers = #tpu.dot_dimension_numbers<[1], [0], [0], [1], [0, 0, 1, 1], [], []>} : vector<288x3xbf16>, vector<3x192xbf16>, vector<288x192xf32> -> vector<288x192xf32>
    %c1_32 = arith.constant 1 : index
    %c0_33 = arith.constant 0 : index
    %c0_34 = arith.constant 0 : index
    %18 = vector.load %arg5[%c1_32, %c0_33, %c0_34] : memref<18x18x3xbf16, #tpu.memory_space<vmem>>, vector<16x18x3xbf16>
    %19 = vector.shape_cast %18 : vector<16x18x3xbf16> to vector<288x3xbf16>
    %cst_35 = arith.constant dense<0.000000e+00> : vector<288x192xf32>
    %20 = tpu.matmul %19, %12, %cst_35 {dimension_numbers = #tpu.dot_dimension_numbers<[1], [0], [0], [1], [0, 0, 1, 1], [], []>} : vector<288x3xbf16>, vector<3x192xbf16>, vector<288x192xf32> -> vector<288x192xf32>
    %21 = arith.addf %17, %20 : vector<288x192xf32>
    %c2_36 = arith.constant 2 : index
    %c0_37 = arith.constant 0 : index
    %c0_38 = arith.constant 0 : index
    %22 = vector.load %arg5[%c2_36, %c0_37, %c0_38] : memref<18x18x3xbf16, #tpu.memory_space<vmem>>, vector<16x18x3xbf16>
    %23 = vector.shape_cast %22 : vector<16x18x3xbf16> to vector<288x3xbf16>
    %cst_39 = arith.constant dense<0.000000e+00> : vector<288x192xf32>
    %24 = tpu.matmul %23, %14, %cst_39 {dimension_numbers = #tpu.dot_dimension_numbers<[1], [0], [0], [1], [0, 0, 1, 1], [], []>} : vector<288x3xbf16>, vector<3x192xbf16>, vector<288x192xf32> -> vector<288x192xf32>
    %25 = arith.addf %21, %24 : vector<288x192xf32>
    %26 = vector.shape_cast %25 : vector<288x192xf32> to vector<16x18x192xf32>
    %27 = vector.extract_strided_slice %26 {offsets = [0, 0, 0], sizes = [16, 16, 64], strides = [1, 1, 1]} : vector<16x18x192xf32> to vector<16x16x64xf32>
    %28 = vector.extract_strided_slice %26 {offsets = [0, 1, 64], sizes = [16, 16, 64], strides = [1, 1, 1]} : vector<16x18x192xf32> to vector<16x16x64xf32>
    %29 = arith.addf %27, %28 : vector<16x16x64xf32>
    %30 = vector.extract_strided_slice %26 {offsets = [0, 2, 128], sizes = [16, 16, 64], strides = [1, 1, 1]} : vector<16x18x192xf32> to vector<16x16x64xf32>
    %31 = arith.addf %29, %30 : vector<16x16x64xf32>
    %c0_40 = arith.constant 0 : index
    %c0_41 = arith.constant 0 : index
    %c0_42 = arith.constant 0 : index
    %32 = vector.load %arg3[%c0_40, %c0_41, %c0_42] : memref<1x1x64xf32, #tpu.memory_space<vmem>>, vector<1x1x64xf32>
    %33 = vector.shape_cast %32 : vector<1x1x64xf32> to vector<1x64xf32>
    %34 = vector.shape_cast %33 : vector<1x64xf32> to vector<1x1x64xf32>
    %35 = vector.broadcast %34 : vector<1x1x64xf32> to vector<16x16x64xf32>
    %36 = arith.addf %31, %35 : vector<16x16x64xf32>
    %37 = vector.shape_cast %36 : vector<16x16x64xf32> to vector<1x16x16x64xf32>
    %38 = arith.truncf %37 : vector<1x16x16x64xf32> to vector<1x16x16x64xbf16>
    %c0_43 = arith.constant 0 : index
    %c0_44 = arith.constant 0 : index
    %c0_45 = arith.constant 0 : index
    %c0_46 = arith.constant 0 : index
    %39 = vector.load %arg4[%c0_43, %c0_44, %c0_45, %c0_46] : memref<1x16x16x64xbf16, #tpu.memory_space<vmem>>, vector<1x16x16x64xbf16>
    tpu.vector_store %arg4[%c0_43, %c0_44, %c0_45, %c0_46], %38 {strides = array<i32>} : memref<1x16x16x64xbf16, #tpu.memory_space<vmem>>, vector<1x16x16x64xbf16>,
    return
  }
  func.func @transform_0(%arg0: i32) -> (i32, i32, i32, i32) {
    %c0_i32 = arith.constant 0 : i32
    %c0_i32_0 = arith.constant 0 : i32
    %c0_i32_1 = arith.constant 0 : i32
    %c0_i32_2 = arith.constant 0 : i32
    return %arg0, %c0_i32, %c0_i32_0, %c0_i32_1 : i32, i32, i32, i32
  }
  func.func @transform_1(%arg0: i32) -> (i32, i32, i32, i32) {
    %c0_i32 = arith.constant 0 : i32
    %c0_i32_0 = arith.constant 0 : i32
    %c0_i32_1 = arith.constant 0 : i32
    %c0_i32_2 = arith.constant 0 : i32
    %c0_i32_3 = arith.constant 0 : i32
    return %c0_i32, %c0_i32_0, %c0_i32_1, %c0_i32_2 : i32, i32, i32, i32
  }
  func.func @transform_2(%arg0: i32) -> (i32, i32, i32) {
    %c0_i32 = arith.constant 0 : i32
    %c0_i32_0 = arith.constant 0 : i32
    %c0_i32_1 = arith.constant 0 : i32
    %c0_i32_2 = arith.constant 0 : i32
    return %c0_i32, %c0_i32_0, %c0_i32_1 : i32, i32, i32
  }
  func.func @transform_3(%arg0: i32) -> (i32, i32, i32, i32) {
    %c0_i32 = arith.constant 0 : i32
    %c0_i32_0 = arith.constant 0 : i32
    %c0_i32_1 = arith.constant 0 : i32
    %c0_i32_2 = arith.constant 0 : i32
    return %arg0, %c0_i32, %c0_i32_0, %c0_i32_1 : i32, i32, i32, i32
  }
}

</mosaic_0001>

<bundles_post_ra>
// kernel: tpu_custom_call.1
= control target key start
LH: loop header
LB: loop body
LE: loop exit
PB: predicated region body
PF: predicated region fallthrough
CT: control target
= control target key end

     0   :  { %8 = vsyncpa [#allocation4], 0  ;;  %s14584_s0 = inlined_call_operand.vmem [shape: bf16[2,16,16,3], index: 0, kind: input, shape index: {}]   ;;  %s14585_s1 = inlined_call_operand.vmem [shape: bf16[1,3,3,192], index: 1, kind: input, shape index: {}]   ;;  %s14586_s2 = inlined_call_operand.vmem [shape: f32[1,1,64], index: 2, kind: input, shape index: {}]   ;;  %s14587_s3 = inlined_call_operand.hbm [shape: bf16[2,16,16,64], index: 3, kind: output, shape index: {}]  }
   0x1   :  { %10 = vsyncpa [#allocation4 + $0x1], 0  ;;  %s11329_s12 = smov 0   ;;  %s11331_s13 = smov 0  }
   0x2   :  { %s11333_s14 = smov 0   ;;  %s11335_s15 = smov 0  }
   0x3 LB: > { %s11350_s16 = sadd.s32 4294967295, %s11300_s15   ;;  %s10846_s17 = sadd.s32 4294967294, %s11300_s15   ;;  %s11300_s15 = sphi %s11335_s15, %s15110_s15   ;;  %s11296_s14 = sphi %s11333_s14, %s15109_s14   ;;  %s11292_s13 = sphi %s11331_s13, %s15108_s13   ;;  %s11288_s12 = sphi %s11329_s12, %s15107_s12  }
   0x4   : > { %s11354_s18 = sadd.s32 1, %s11300_s15   ;;  %s91_s19 = sadd.s32 1, %s11296_s14 }
   0x5   : > { %s88_s20 = ssub.s32 %s11300_s15, %s11354_s18  ;;  %p101_p0 = scmp.ne.s32.totalorder %s11296_s14, %s11292_s13 }
   0x6   : > { %p89_p1 = scmp.eq.s32.totalorder %s88_s20, 0  ;;  %p102_p2 = scmp.eq.s32.totalorder %s11350_s16, 1 }
   0x7   : > { %p107_p3 = scmp.ne.s32.totalorder %s11292_s13, %s11288_s12  ;;  %p108_p4 = scmp.eq.s32.totalorder %s10846_s17, 1 }
   0x8   : > { %s11365_s21 = scalar_select %p89_p1, %s11296_s14, %s91_s19  }
   0x9   : > { %p11367_p5 = por %p102_p2, %p101_p0  ;;  %p11371_p6 = por %p108_p4, %p107_p3 }
   0xa   : > { %p10849_p7 = scmp.ge.s32.totalorder %s11300_s15, 1  ;;  %p140_p8 = scmp.lt.s32.totalorder %s11300_s15, 3 }
   0xc   : > { %p141_p9 = pnand %p10849_p7, %p140_p8 }
   0xe   : > { %144 = sbr.rel (%p141_p9) target bundleno = 841 (0x349), region = 32 }
  0x13   : > { %v10967_v0 = vld.sshfl [vmem:[%s14585_s1 + $0x4] sm:$0x33 pattern:$0x76325410]  ;;  %vm3888_vm0 = vcmask 1040384   ;;  %vm3889_vm1 = vcmask 1041408   ;;  %v873_v13 = vlaneseq }
  0x14   : > { %v3832_v1 = vcombine.high %v10967_v0, %v10967_v0  ;;  %p164_p10 = scmp.lt.s32.totalorder %s11350_s16, 1  ;;  %v11302_v2 = vmov 65535   ;;  %vm170_vm2 = vcmask 19456   ;;  %v185_v4 = vld [vmem:[#allocation2 + $0xc] sm:$0x1]  ;;  %v14588_v7 = vmov 0  }
  0x15   : > { %v3890_v3 = vsel %vm3888_vm0, 4294967295, %v11302_v2  ;;  %v209_v5 = vld [vmem:[#allocation2 + $0x6c] sm:$0x1]  ;;  %3930 = vmatprep.mubr.bf16.mxu0 %v14588_v7  ;;  %4020 = vmatprep.mubr.bf16.mxu1 %v14588_v7  ;;  %171 = vst.msk [vmem:[#allocation2] sm:$0xf] %vm170_vm2, %v14588_v7  ;;  %vm173_vm3 = vcmask 16384  }
  0x16   : > { %v11382_v6 = vsel %vm3889_vm1, %v3890_v3, 0  ;;  %v11389_v8 = vld.sshfl [vmem:[%s14585_s1] sm:$0x33 pattern:$0x76325410]  ;;  %s165_s28 = scalar_select %p164_p10, %s11350_s16, 1 }
  0x17   : > { %172 = vst.msk [vmem:[#allocation2 + $0x4] sm:$0xf] %vm170_vm2, %v14588_v7  ;;  %176 = vst.msk [vmem:[#allocation2 + $0xcc] sm:$0xf] %vm170_vm2, %v14588_v7  ;;  %v3896_v9 = vand.u32 %v11382_v6, %v3832_v1  ;;  %v3893_v10 = vand.u32 %v10967_v0, %v11382_v6  ;;  %v5001_v11 = vcombine.high %v11389_v8, %v11389_v8  ;;  %vm180_vm4 = vsmask.f32 256 }
  0x18   : > { %177 = vst.msk [vmem:[#allocation2 + $0xd0] sm:$0xf] %vm170_vm2, %v14588_v7  ;;  %v11407_v12 = vld.sshfl [vmem:[%s14585_s1 + $0x8] sm:$0x33 pattern:$0x76325410]  ;;  %vm11421_vm5 = vmand %vm173_vm3, %vm180_vm4 }
  0x19   : > { %s11158_s4 = sshll.u32 %s165_s28, 7  ;;  %174 = vst.msk [vmem:[#allocation2 + $0x8] sm:$0x1] %vm173_vm3, %v14588_v7  ;;  %178 = vst.msk [vmem:[#allocation2 + $0xd4] sm:$0x1] %vm173_vm3, %v14588_v7  ;;  %11192 = vmatprep.subr.bf16.mxu1 %v3896_v9  ;;  %3912 = vmatprep.subr.bf16.mxu0 %v3896_v9  ;;  %v5060_v14 = vand.u32 %v5001_v11, %v11382_v6  ;;  %v186_v16 = vsel %vm11421_vm5, 0, %v185_v4  ;;  %v7254_v22 = vcombine.high %v11407_v12, %v11407_v12 }
  0x1a   : > { %s11417_s7 = scalar_lea.vmem %s14584_s0, %s11158_s4  ;;  %vm236_vm6 = vsmask.f32 7938  ;;  %vm324_vm7 = vsmask.f32 4368  ;;  %11193 = vmatpush1.bf16.msra.mxu1 %v3893_v10  ;;  %3913 = vmatpush1.bf16.msra.mxu0 %v3893_v10  ;;  %v11304_v19 = vmov 1966171168  }
  0x1b   : > { %v292_v17 = vld [vmem:[%s11417_s7] sm:$0xf]  ;;  %v293_v18 = vld [vmem:[%s11417_s7 + $0x4] sm:$0xf]  ;;  %v871_v20 = vunpack.c.l.s4 %v11304_v19  ;;  %v210_v21 = vsel %vm11421_vm5, 0, %v209_v5  ;;  %5076 = vmatprep.subr.bf16.mxu1 %v5060_v14  ;;  %v7313_v31 = vand.u32 %v7254_v22, %v11382_v6  ;;  %vm11438_vm8 = vmand %vm173_vm3, %vm236_vm6  ;;  %v11450_v41 = vshrl.u32 %v873_v13, 7 }
  0x1c   : > { %187 = vst [vmem:[#allocation2 + $0xc] sm:$0x1] %v186_v16  ;;  %v327_v23 = vshrl.u32 %v292_v17, 16  ;;  %v330_v24 = vshll.u32 %v292_v17, 16  ;;  %v335_v25 = vshrl.u32 %v293_v18, 16  ;;  %v338_v26 = vshll.u32 %v293_v18, 16  ;;  %vm11446_vm9 = vmor %vm180_vm4, %vm324_vm7 }
  0x1d   : > { %211 = vst [vmem:[#allocation2 + $0x6c] sm:$0x1] %v210_v21  ;;  %v308_v27 = vld [vmem:[%s11417_s7 + $0x40] sm:$0xf]  ;;  %v309_v28 = vld [vmem:[%s11417_s7 + $0x44] sm:$0xf]  ;;  %v872_v40 = vunpack.c.0.s8 %v871_v20  ;;  %7329 = vmatprep.subr.bf16.mxu0 %v7313_v31  ;;  %vm11461_vm10 = vmand %vm170_vm2, %vm236_vm6 }
  0x1e   : > { %v463_v29 = vshrl.u32 %v308_v27, 16  ;;  %v466_v30 = vshll.u32 %v308_v27, 16  ;;  %v188_v32 = vld [vmem:[#allocation2 + $0x18] sm:$0x1]  ;;  %v329_v34 = vrot.slane %v327_v23, 7  ;;  %v11442_v35 = vrot.slane %v335_v25, 7 }
  0x1f   : > { %v471_v36 = vshrl.u32 %v309_v28, 16  ;;  %v474_v37 = vshll.u32 %v309_v28, 16  ;;  %v241_v38 = vld [vmem:[#allocation2 + $0x14] sm:$0x1]  ;;  %v189_v43 = vsel %vm11421_vm5, 0, %v188_v32  ;;  %v11475_v0 = vsub.s32 %v872_v40, %v11450_v41  ;;  %s11306_s10 = smov 64  }
  0x20   : > { %v465_v42 = vrot.slane %v463_v29, 7  ;;  %v294_v44 = vld [vmem:[%s11417_s7 + $0x8] sm:$0xf]  ;;  %v332_v45 = vor.u32 %v330_v24, %v329_v34  ;;  %v333_v46 = vrot.slane %v329_v34, 4  ;;  %v340_v47 = vor.u32 %v338_v26, %v11442_v35  ;;  %190 = vst [vmem:[#allocation2 + $0x18] sm:$0x1] %v189_v43 }
  0x21   : > { %v11456_v48 = vrot.slane %v471_v36, 7  ;;  %v295_v49 = vld [vmem:[%s11417_s7 + $0xc] sm:$0xf]  ;;  %v212_v50 = vld [vmem:[#allocation2 + $0x78] sm:$0x1]  ;;  %v242_v54 = vsel %vm11438_vm8, 0, %v241_v38  ;;  %v5057_v43 = vand.u32 %v11389_v8, %v11382_v6 }
  0x22   : > { %v468_v52 = vor.u32 %v466_v30, %v465_v42  ;;  %v469_v53 = vrot.slane %v465_v42, 4  ;;  %v342_v55 = vrot.slane %v11442_v35, 4  ;;  %v265_v56 = vld [vmem:[#allocation2 + $0x74] sm:$0x1]  ;;  %v341_v57 = vsel %vm11446_vm9, %v333_v46, %v340_v47  ;;  %243 = vst [vmem:[#allocation2 + $0x14] sm:$0x1] %v242_v54 }
  0x23   : > { %v476_v58 = vor.u32 %v474_v37, %v11456_v48  ;;  %v344_v59 = vshrl.u32 %v294_v44, 16  ;;  %v347_v60 = vshll.u32 %v294_v44, 16  ;;  %v310_v61 = vld [vmem:[%s11417_s7 + $0x48] sm:$0xf]  ;;  %v311_v62 = vld [vmem:[%s11417_s7 + $0x4c] sm:$0xf] }
  0x24   : > { %v649_v63 = vld [vmem:[#allocation2 + $0xc] sm:$0xf]  ;;  %652 = vst.msk [vmem:[#allocation2 + $0x10] sm:$0xf] %vm170_vm2, %v341_v57  ;;  %v352_v2 = vshrl.u32 %v295_v49, 16  ;;  %v355_v3 = vshll.u32 %v295_v49, 16 }
  0x25   : > { %v705_v1 = vld [vmem:[#allocation2 + $0x6c] sm:$0xf]  ;;  %v650_v4 = vsel %vm11461_vm10, %v332_v45, %v649_v63  ;;  %v477_v5 = vsel %vm11446_vm9, %v469_v53, %v476_v58  ;;  %v346_v10 = vrot.slane %v344_v59, 7  ;;  %v191_v11 = vld [vmem:[#allocation2 + $0x24] sm:$0x1]  ;;  %v213_v16 = vsel %vm11421_vm5, 0, %v212_v50 }
  0x26   : > { %v706_v9 = vsel %vm11461_vm10, %v468_v52, %v705_v1  ;;  %v244_v13 = vld [vmem:[#allocation2 + $0x20] sm:$0x1]  ;;  %651 = vst [vmem:[#allocation2 + $0xc] sm:$0xf] %v650_v4  ;;  %708 = vst.msk [vmem:[#allocation2 + $0x70] sm:$0xf] %vm170_vm2, %v477_v5  ;;  %v7310_v53 = vand.u32 %v11407_v12, %v11382_v6 }
  0x27   : > { %707 = vst [vmem:[#allocation2 + $0x6c] sm:$0xf] %v706_v9  ;;  %v11484_v14 = vrot.slane %v352_v2, 7  ;;  %v266_v17 = vsel %vm11438_vm8, 0, %v265_v56  ;;  %v478_v18 = vrot.slane %v11456_v48, 4  ;;  %v349_v20 = vor.u32 %v347_v60, %v346_v10  ;;  %s161_s11 = sand.u32 1, %s11292_s13  }
  0x28   : > { %v296_v19 = vld [vmem:[%s11417_s7 + $0x10] sm:$0xf]  ;;  %v350_v21 = vrot.slane %v346_v10, 4  ;;  %214 = vst [vmem:[#allocation2 + $0x78] sm:$0x1] %v213_v16  ;;  %v480_v22 = vshrl.u32 %v310_v61, 16 }
  0x29   : > { %267 = vst [vmem:[#allocation2 + $0x74] sm:$0x1] %v266_v17  ;;  %v483_v23 = vshll.u32 %v310_v61, 16  ;;  %v11493_v24 = vld [vmem:[%s11417_s7 + $0x14] sm:$0xf]  ;;  %v357_v25 = vor.u32 %v355_v3, %v11484_v14  ;;  %v488_v27 = vshrl.u32 %v311_v62, 16 }
  0x2a   : > { %v656_v26 = vld [vmem:[#allocation2 + $0x18] sm:$0xf]  ;;  %v491_v28 = vshll.u32 %v311_v62, 16  ;;  %v192_v29 = vsel %vm11421_vm5, 0, %v191_v11  ;;  %v482_v31 = vrot.slane %v480_v22, 7  ;;  %v245_v32 = vsel %vm11438_vm8, 0, %v244_v13 }
  0x2b   : > { %v657_v30 = vsel %vm11461_vm10, %v349_v20, %v656_v26  ;;  %193 = vst [vmem:[#allocation2 + $0x24] sm:$0x1] %v192_v29  ;;  %v359_v34 = vrot.slane %v11484_v14, 4  ;;  %v358_v35 = vsel %vm11446_vm9, %v350_v21, %v357_v25  ;;  %v653_v36 = vld [vmem:[#allocation2 + $0x14] sm:$0x1]  ;;  %v11505_v37 = vrot.slane %v488_v27, 7 }
  0x2c   : > { %658 = vst [vmem:[#allocation2 + $0x18] sm:$0xf] %v657_v30  ;;  %246 = vst [vmem:[#allocation2 + $0x20] sm:$0x1] %v245_v32  ;;  %v361_v38 = vshrl.u32 %v296_v19, 16  ;;  %v364_v40 = vshll.u32 %v296_v19, 16  ;;  %v654_v44 = vsel %vm11421_vm5, %v342_v55, %v653_v36  ;;  %v485_v54 = vor.u32 %v483_v23, %v482_v31 }
  0x2d   : > { %v10904_v42 = vld.sshfl [vmem:[#allocation2 + $0x10] sm:$0x33 pattern:$0x75316420]  ;;  %659 = vst.msk [vmem:[#allocation2 + $0x1c] sm:$0xf] %vm170_vm2, %v358_v35  ;;  %v493_v49 = vor.u32 %v491_v28, %v11505_v37 }
  0x2e   : > { %v486_v45 = vrot.slane %v482_v31, 4  ;;  %v369_v46 = vshrl.u32 %v11493_v24, 16  ;;  %v1981_v47 = vcombine.high %v10904_v42, %v10904_v42  ;;  %v1988_v48 = vrot.slane %v10904_v42, %v11475_v0  ;;  %655 = vst [vmem:[#allocation2 + $0x14] sm:$0x1] %v654_v44  ;;  %v312_v8 = vld [vmem:[%s11417_s7 + $0x50] sm:$0xf] }
  0x2f   : > { %v11515_v50 = vrot.slane %v361_v38, 7  ;;  %v10903_v52 = vld.sshfl [vmem:[#allocation2 + $0xc] sm:$0x33 pattern:$0x75316420]  ;;  %v372_v55 = vshll.u32 %v11493_v24, 16 }
  0x30   : > { %v11519_v56 = vrot.slane %v369_v46, 7  ;;  %v1957_v57 = vcombine.high %v10903_v52, %v10903_v52  ;;  %v1964_v58 = vrot.slane %v10903_v52, %v11475_v0  ;;  %v1995_v59 = vrot.slane %v1981_v47, %v11475_v0  ;;  %v10927_v60 = vld.sshfl [vmem:[#allocation2 + $0x6c] sm:$0x33 pattern:$0x75316420]  ;;  %s10850_s17 = sshll.u32 %s161_s11, 7 }
  0x31   : > { %v494_v61 = vsel %vm11446_vm9, %v486_v45, %v493_v49  ;;  %v709_v62 = vld [vmem:[#allocation2 + $0x74] sm:$0x1]  ;;  %v10928_v63 = vld.sshfl [vmem:[#allocation2 + $0x70] sm:$0x33 pattern:$0x75316420]  ;;  %v2453_v1 = vcombine.high %v10927_v60, %v10927_v60  ;;  %v2460_v2 = vrot.slane %v10927_v60, %v11475_v0  ;;  %v11531_v5 = vor.u32 %v364_v40, %v11515_v50 }
  0x32   : > { %v710_v3 = vsel %vm11421_vm5, %v478_v18, %v709_v62  ;;  %v712_v4 = vld [vmem:[#allocation2 + $0x78] sm:$0xf]  ;;  %715 = vst.msk [vmem:[#allocation2 + $0x7c] sm:$0xf] %vm170_vm2, %v494_v61  ;;  %v1971_v9 = vrot.slane %v1957_v57, %v11475_v0  ;;  %v2944_v10 = vcombine.low %v1988_v48, %v1995_v59  ;;  %v10952_v11 = vcombine.high %v1988_v48, %v1995_v59  ;;  %s13657_s19 = scalar_lea.vmem [#allocation3], %s10850_s17  ;;  %s11191_s20 = sshll.u32 %s11350_s16, 11 }
  0x33   : > { %v2477_v13 = vcombine.high %v10928_v63, %v10928_v63  ;;  %711 = vst [vmem:[#allocation2 + $0x74] sm:$0x1] %v710_v3  ;;  %vm3833_vm11 = vcmask 23552   ;;  %v2467_v16 = vrot.slane %v2453_v1, %v11475_v0  ;;  %v2484_v17 = vrot.slane %v10928_v63, %v11475_v0  ;;  %s10784_s24 = sshll.u32 %s13657_s19, 4  ;;  %s14534_s27 = scalar_lea.hbm %s14587_s3, %s11191_s20  ;;  %s14536_s24 = int_to_ptr.vmem [resolvable:$true] %s10784_s24 }
  0x34   : > { %v10906_v19 = vld.sshfl [vmem:[#allocation2 + $0x18] sm:$0x33 pattern:$0x75316420]  ;;  %v713_v18 = vsel %vm11461_vm10, %v485_v54, %v712_v4  ;;  %v367_v20 = vrot.slane %v11515_v50, 4  ;;  %v2942_v21 = vcombine.low %v1964_v58, %v1971_v9  ;;  %v10951_v22 = vcombine.high %v1964_v58, %v1971_v9  ;;  %s14542_s28 = scalar_lea.sflag [#allocation4], %s161_s11 }
  0x35   : > { %v2966_v23 = vrot.slane %v2944_v10, %v11475_v0  ;;  %v2973_v25 = vrot.slane %v10952_v11, %v11475_v0  ;;  %714 = vst [vmem:[#allocation2 + $0x78] sm:$0xf] %v713_v18  ;;  %v2491_v26 = vrot.slane %v2477_v13, %v11475_v0  ;;  %v3383_v27 = vcombine.low %v2460_v2, %v2467_v16  ;;  %v10905_v29 = vld.sshfl [vmem:[#allocation2 + $0x14] sm:$0x1 pattern:$0x75316420] }
  0x36   : > { %v10959_v28 = vcombine.high %v2460_v2, %v2467_v16  ;;  %v2019_v30 = vcombine.high %v10906_v19, %v10906_v19  ;;  %v2952_v31 = vrot.slane %v2942_v21, %v11475_v0  ;;  %v2959_v32 = vrot.slane %v10951_v22, %v11475_v0  ;;  %v10907_v36 = vld.sshfl [vmem:[#allocation2 + $0x1c] sm:$0x33 pattern:$0x75316420]  ;;  %v313_v50 = vld [vmem:[%s11417_s7 + $0x54] sm:$0xf] }
  0x37   : > { %v2975_v35 = vcombine.low %v2966_v23, %v2973_v25  ;;  %v2011_v38 = vrot.slane %v10905_v29, %v11475_v0  ;;  %v3385_v40 = vcombine.low %v2484_v17, %v2491_v26  ;;  %v10960_v42 = vcombine.high %v2484_v17, %v2491_v26  ;;  %s11240_s29 = scalar_lea.vmem %s14536_s24, 2048  ;;  %s11307_s16 = smov [#allocation3]  }
  0x38   : > { %v3393_v44 = vrot.slane %v3383_v27, %v11475_v0  ;;  %v3400_v45 = vrot.slane %v10959_v28, %v11475_v0  ;;  %v2974_v46 = vcombine.low %v2952_v31, %v2959_v32  ;;  %v2026_v48 = vrot.slane %v10906_v19, %v11475_v0  ;;  %v215_v19 = vld [vmem:[#allocation2 + $0x84] sm:$0x1]  ;;  %p11241_p11 = scmp.ne.s32.totalorder %s14536_s24, %s11240_s29  ;;  %s11244_s30 = sshll.u32 %s11307_s16, 4  ;;  %s11245_s30 = int_to_ptr.vmem [resolvable:$false] %s11244_s30 }
  0x39   : > { %v2989_v47 = vrot.slane %v2975_v35, %v11475_v0  ;;  %v2033_v49 = vrot.slane %v2019_v30, %v11475_v0  ;;  %v3407_v52 = vrot.slane %v3385_v40, %v11475_v0  ;;  %v3414_v54 = vrot.slane %v10960_v42, %v11475_v0  ;;  %v10931_v17 = vld.sshfl [vmem:[#allocation2 + $0x7c] sm:$0x33 pattern:$0x75316420]  ;;  %v268_v35 = vld [vmem:[#allocation2 + $0x80] sm:$0x1]  ;;  %p11247_p0 = scmp.lt.s32.totalorder %s14536_s24, %s11245_s30 }
  0x3a   : > { %v3415_v57 = vcombine.low %v3393_v44, %v3400_v45  ;;  %v2043_v58 = vcombine.high %v10907_v36, %v10907_v36  ;;  %v2982_v59 = vrot.slane %v2974_v46, %v11475_v0  ;;  %v2034_v60 = vcombine.high %v2026_v48, %v2026_v48  ;;  %v10929_v63 = vld.sshfl [vmem:[#allocation2 + $0x74] sm:$0x1 pattern:$0x75316420]  ;;  %v660_v46 = vld [vmem:[#allocation2 + $0x20] sm:$0x1]  ;;  %p11242_p12 = pnand %p11241_p11, %p11367_p5 }
  0x3b   : > { %v2035_v61 = vcombine.high %v2033_v49, %v2033_v49  ;;  %v2050_v62 = vrot.slane %v10907_v36, %v11475_v0  ;;  %v3416_v1 = vcombine.low %v3407_v52, %v3414_v54  ;;  %v2991_v4 = vcombine.low %v2011_v38, %v2026_v48  ;;  %s11246_s4 = scalar_lea.vmem %s11245_s30, 4096 }
  0x3c   : > { %v3423_v2 = vrot.slane %v3415_v57, %v11475_v0  ;;  %v11556_v3 = vrot.slane %v2043_v58, %v11475_v0  ;;  %v10930_v9 = vld.sshfl [vmem:[#allocation2 + $0x78] sm:$0x33 pattern:$0x75316420]  ;;  %v2990_v10 = vcombine.low %v2982_v59, %v2989_v47  ;;  %v2992_v13 = vcombine.low %v2033_v49, %v2034_v60  ;;  %v663_v47 = vld [vmem:[#allocation2 + $0x24] sm:$0xf]  ;;  %p11243_p13 = pneg %p11242_p12  ;;  %p11248_p1 = scmp.lt.s32.totalorder %s11246_s4, %s11240_s29 }
  0x3d   : > { %v2058_v11 = vcombine.high %v2050_v62, %v2050_v62  ;;  %v2993_v16 = vcombine.low %v2035_v61, %v2050_v62  ;;  %v3430_v18 = vrot.slane %v3416_v1, %v11475_v0  ;;  %v3001_v21 = vrot.slane %v2991_v4, %v11475_v0 }
  0x3e   : > { %v2507_v22 = vrot.slane %v10929_v63, %v11475_v0  ;;  %v2515_v23 = vcombine.high %v10930_v9, %v10930_v9  ;;  %10968 = vmatmul.mubr.msk.bf16.vlgmr.msra.gmra.mxu0 %vm3833_vm11, %v2990_v10  ;;  %v3008_v26 = vrot.slane %v2992_v13, %v11475_v0  ;;  %v2522_v28 = vrot.slane %v10930_v9, %v11475_v0  ;;  %v247_v63 = vld [vmem:[#allocation2 + $0x2c] sm:$0x1]  ;;  %v298_v9 = vld [vmem:[%s11417_s7 + $0x18] sm:$0xf]  ;;  %p11249_p2 = por %p11248_p1, %p11247_p0 }
  0x3f   : > { %v2994_v25 = vcombine.low %v11556_v3, %v2058_v11  ;;  %v3015_v27 = vrot.slane %v2993_v16, %v11475_v0  ;;  %v3431_v29 = vcombine.low %v3423_v2, %v3430_v18  ;;  %7330 = vmatpush1.bf16.msra.mxu0 %v7310_v53  ;;  %3940 = vmatprep.mubr.bf16.mxu0 %v14588_v7  ;;  %v216_v32 = vsel %vm11421_vm5, 0, %v215_v19  ;;  %v299_v18 = vld [vmem:[%s11417_s7 + $0x1c] sm:$0xf] }
  0x40   : > { %v2529_v30 = vrot.slane %v2515_v23, %v11475_v0  ;;  %v2539_v31 = vcombine.high %v10931_v17, %v10931_v17  ;;  %v3023_v38 = vcombine.low %v3001_v21, %v3008_v26  ;;  %v2530_v40 = vcombine.high %v2522_v28, %v2522_v28  ;;  %217 = vst [vmem:[#allocation2 + $0x84] sm:$0x1] %v216_v32  ;;  %v218_v32 = vld [vmem:[#allocation2 + $0x90] sm:$0x1]  ;;  %p11250_p3 = pnand %p11249_p2, %p11243_p13 }
  0x41   : > { %v3022_v36 = vrot.slane %v2994_v25, %v11475_v0  ;;  %v2546_v42 = vrot.slane %v10931_v17, %v11475_v0  ;;  %10977 = vmatmul.mubr.msk.bf16.vlgmr.msra.gmra.mxu1 %vm3833_vm11, %v3431_v29  ;;  %v3432_v44 = vcombine.low %v2507_v22, %v2522_v28  ;;  %v374_v45 = vor.u32 %v372_v55, %v11519_v56 }
  0x42   : > { %v2531_v12 = vcombine.high %v2529_v30, %v2529_v30  ;;  %v11577_v53 = vrot.slane %v2539_v31, %v11475_v0  ;;  %5077 = vmatpush1.bf16.msra.mxu1 %v5057_v43  ;;  %4030 = vmatprep.mubr.bf16.mxu1 %v14588_v7  ;;  %v3031_v49 = vrot.slane %v3023_v38, %v11475_v0  ;;  %v269_v54 = vsel %vm11438_vm8, 0, %v268_v35 }
  0x43   : > { %v3024_v48 = vcombine.low %v3015_v27, %v3022_v36  ;;  %v2554_v52 = vcombine.high %v2546_v42, %v2546_v42  ;;  %v3433_v57 = vcombine.low %v2529_v30, %v2530_v40  ;;  %v3442_v24 = vrot.slane %v3432_v44, %v11475_v0  ;;  %270 = vst [vmem:[#allocation2 + $0x80] sm:$0x1] %v269_v54 }
  0x44   : > { %v3434_v58 = vcombine.low %v2531_v12, %v2546_v42  ;;  %v375_v6 = vsel %vm11446_vm9, %v367_v20, %v374_v45  ;;  %v661_v59 = vsel %vm11421_vm5, %v359_v34, %v660_v46  ;;  %v664_v60 = vsel %vm11461_vm10, %v11531_v5, %v663_v47  ;;  %v194_v34 = vld [vmem:[#allocation2 + $0x30] sm:$0x1]  ;;  %v271_v47 = vld [vmem:[#allocation2 + $0x8c] sm:$0x1] }
  0x45   : > { %v3038_v43 = vrot.slane %v3024_v48, %v11475_v0  ;;  %v3435_v55 = vcombine.low %v11577_v53, %v2554_v52  ;;  %666 = vst.msk [vmem:[#allocation2 + $0x28] sm:$0xf] %vm170_vm2, %v375_v6  ;;  %v3449_v20 = vrot.slane %v3433_v57, %v11475_v0  ;;  %662 = vst [vmem:[#allocation2 + $0x20] sm:$0x1] %v661_v59  ;;  %v495_v62 = vrot.slane %v11505_v37, 4 }
  0x46   : > { %v3456_v61 = vrot.slane %v3434_v58, %v11475_v0  ;;  %665 = vst [vmem:[#allocation2 + $0x24] sm:$0xf] %v664_v60  ;;  %v2059_v14 = vcombine.high %v11556_v3, %v11556_v3  ;;  %v497_v2 = vshrl.u32 %v312_v8, 16  ;;  %v500_v4 = vshll.u32 %v312_v8, 16 }
  0x47   : > { %v3039_v1 = vcombine.low %v3031_v49, %v3038_v43  ;;  %v3463_v5 = vrot.slane %v3435_v55, %v11475_v0  ;;  %v3464_v10 = vcombine.low %v3442_v24, %v3449_v20  ;;  %v505_v11 = vshrl.u32 %v313_v50, 16  ;;  %v719_v23 = vld [vmem:[#allocation2 + $0x84] sm:$0xf]  ;;  %v314_v20 = vld [vmem:[%s11417_s7 + $0x58] sm:$0xf] }
  0x48   : > { %v508_v13 = vshll.u32 %v313_v50, 16  ;;  %v2555_v16 = vcombine.high %v11577_v53, %v11577_v53  ;;  %v499_v17 = vrot.slane %v497_v2, 7  ;;  %v195_v37 = vsel %vm11421_vm5, 0, %v194_v34 }
  0x49   : > { %10969 = vmatmul.mubr.msk.bf16.gmra.mxu0 %vm3833_vm11, %v3039_v1  ;;  %v3465_v3 = vcombine.low %v3456_v61, %v3463_v5  ;;  %v248_v19 = vsel %vm11438_vm8, 0, %v247_v63  ;;  %v3472_v21 = vrot.slane %v3464_v10, %v11475_v0  ;;  %v11623_v22 = vrot.slane %v505_v11, 7  ;;  %196 = vst [vmem:[#allocation2 + $0x30] sm:$0x1] %v195_v37  ;;  %v315_v10 = vld [vmem:[%s11417_s7 + $0x5c] sm:$0xf] }
  0x4a   : > { %3950 = vmatprep.mubr.bf16.mxu0 %v14588_v7  ;;  %249 = vst [vmem:[#allocation2 + $0x2c] sm:$0x1] %v248_v19  ;;  %v376_v25 = vrot.slane %v11519_v56, 4  ;;  %v378_v26 = vshrl.u32 %v298_v9, 16  ;;  %v502_v28 = vor.u32 %v500_v4, %v499_v17  ;;  %v503_v29 = vrot.slane %v499_v17, 4 }
  0x4b   : > { %v3479_v27 = vrot.slane %v3465_v3, %v11475_v0  ;;  %v716_v30 = vld [vmem:[#allocation2 + $0x80] sm:$0x1]  ;;  %v381_v31 = vshll.u32 %v298_v9, 16  ;;  %v510_v36 = vor.u32 %v508_v13, %v11623_v22  ;;  %v386_v42 = vshrl.u32 %v299_v18, 16 }
  0x4c   : > { %v10910_v35 = vld.sshfl [vmem:[#allocation2 + $0x28] sm:$0x33 pattern:$0x75316420]  ;;  %v717_v38 = vsel %vm11421_vm5, %v495_v62, %v716_v30  ;;  %v380_v40 = vrot.slane %v378_v26, 7  ;;  %v720_v46 = vsel %vm11461_vm10, %v502_v28, %v719_v23  ;;  %v389_v59 = vshll.u32 %v299_v18, 16 }
  0x4d   : > { %v3480_v12 = vcombine.low %v3472_v21, %v3479_v27  ;;  %v10908_v44 = vld.sshfl [vmem:[#allocation2 + $0x20] sm:$0x1 pattern:$0x75316420]  ;;  %v2105_v45 = vcombine.high %v10910_v35, %v10910_v35  ;;  %v2112_v56 = vrot.slane %v10910_v35, %v11475_v0  ;;  %718 = vst [vmem:[#allocation2 + $0x80] sm:$0x1] %v717_v38  ;;  %v511_v52 = vsel %vm11446_vm9, %v503_v29, %v510_v36 }
  0x4e   : > { %v10909_v48 = vld.sshfl [vmem:[#allocation2 + $0x24] sm:$0x33 pattern:$0x75316420]  ;;  %v2073_v49 = vrot.slane %v10908_v44, %v11475_v0  ;;  %721 = vst [vmem:[#allocation2 + $0x84] sm:$0xf] %v720_v46  ;;  %v383_v54 = vor.u32 %v381_v31, %v380_v40 }
  0x4f   : > { %v384_v57 = vrot.slane %v380_v40, 4  ;;  %10978 = vmatmul.mubr.msk.bf16.gmra.mxu1 %vm3833_vm11, %v3480_v12  ;;  %v2081_v58 = vcombine.high %v10909_v48, %v10909_v48  ;;  %v2088_v24 = vrot.slane %v10909_v48, %v11475_v0  ;;  %v2119_v6 = vrot.slane %v2105_v45, %v11475_v0  ;;  %722 = vst.msk [vmem:[#allocation2 + $0x88] sm:$0xf] %vm170_vm2, %v511_v52 }
  0x50   : > { %v11640_v8 = vrot.slane %v386_v42, 7  ;;  %v11642_v43 = vld.sshfl [vmem:[#allocation2 + $0x4] sm:$0x33 pattern:$0x75316420]  ;;  %4040 = vmatprep.mubr.bf16.mxu1 %v14588_v7  ;;  %v3040_v55 = vcombine.low %v2059_v14, %v2073_v49  ;;  %v219_v60 = vsel %vm11421_vm5, 0, %v218_v32 }
  0x51   : > { %v272_v50 = vsel %vm11438_vm8, 0, %v271_v47  ;;  %v2095_v61 = vrot.slane %v2081_v58, %v11475_v0  ;;  %v3043_v62 = vcombine.low %v2112_v56, %v2119_v6  ;;  %v667_v34 = vld [vmem:[#allocation2 + $0x2c] sm:$0x1]  ;;  %v670_v63 = vld [vmem:[#allocation2 + $0x30] sm:$0xf]  ;;  %v10954_v1 = vcombine.high %v2112_v56, %v2119_v6 }
  0x52   : > { %220 = vst [vmem:[#allocation2 + $0x90] sm:$0x1] %v219_v60  ;;  %273 = vst [vmem:[#allocation2 + $0x8c] sm:$0x1] %v272_v50  ;;  %v512_v5 = vrot.slane %v11623_v22, 4  ;;  %v3050_v14 = vrot.slane %v3040_v55, %v11475_v0  ;;  %v391_v2 = vor.u32 %v389_v59, %v11640_v8  ;;  %v668_v4 = vsel %vm11421_vm5, %v376_v25, %v667_v34 }
  0x53   : > { %v671_v9 = vsel %vm11461_vm10, %v383_v54, %v670_v63  ;;  %v3041_v11 = vcombine.low %v2088_v24, %v2095_v61  ;;  %v10953_v13 = vcombine.high %v2088_v24, %v2095_v61  ;;  %v3071_v3 = vrot.slane %v3043_v62, %v11475_v0  ;;  %669 = vst [vmem:[#allocation2 + $0x2c] sm:$0x1] %v668_v4 }
  0x54   : > { %672 = vst [vmem:[#allocation2 + $0x30] sm:$0xf] %v671_v9  ;;  %v11661_v17 = vrot.slane %v10954_v1, %v11475_v0  ;;  %v10932_v37 = vld.sshfl [vmem:[#allocation2 + $0x80] sm:$0x1 pattern:$0x75316420]  ;;  %v392_v19 = vsel %vm11446_vm9, %v384_v57, %v391_v2  ;;  %v893_v22 = vcombine.high %v11642_v43, %v11642_v43 }
  0x55   : > { %v514_v18 = vshrl.u32 %v314_v20, 16  ;;  %v517_v21 = vshll.u32 %v314_v20, 16  ;;  %v3057_v23 = vrot.slane %v3041_v11, %v11475_v0  ;;  %v3064_v25 = vrot.slane %v10953_v13, %v11475_v0  ;;  %v10933_v26 = vld.sshfl [vmem:[#allocation2 + $0x84] sm:$0x33 pattern:$0x75316420] }
  0x56   : > { %v2569_v27 = vrot.slane %v10932_v37, %v11475_v0  ;;  %673 = vst.msk [vmem:[#allocation2 + $0x34] sm:$0xf] %vm170_vm2, %v392_v19  ;;  %v522_v28 = vshrl.u32 %v315_v10, 16  ;;  %v2577_v30 = vcombine.high %v10933_v26, %v10933_v26  ;;  %v2584_v31 = vrot.slane %v10933_v26, %v11475_v0  ;;  %v197_v20 = vld [vmem:[#allocation2 + $0x3c] sm:$0x1] }
  0x57   : > { %v10934_v29 = vld.sshfl [vmem:[#allocation2 + $0x88] sm:$0x33 pattern:$0x75316420]  ;;  %v516_v32 = vrot.slane %v514_v18, 7  ;;  %v525_v35 = vshll.u32 %v315_v10, 16  ;;  %v3072_v36 = vcombine.low %v3050_v14, %v3057_v23  ;;  %v3073_v38 = vcombine.low %v3064_v25, %v3071_v3 }
  0x58   : > { %v2601_v40 = vcombine.high %v10934_v29, %v10934_v29  ;;  %v2608_v42 = vrot.slane %v10934_v29, %v11475_v0  ;;  %v2591_v12 = vrot.slane %v2577_v30, %v11475_v0  ;;  %v3481_v44 = vcombine.low %v2555_v16, %v2569_v27  ;;  %v300_v37 = vld [vmem:[%s11417_s7 + $0x20] sm:$0xf] }
  0x59   : > { %v519_v45 = vor.u32 %v517_v21, %v516_v32  ;;  %v520_v56 = vrot.slane %v516_v32, 4  ;;  %v723_v46 = vld [vmem:[#allocation2 + $0x8c] sm:$0x1]  ;;  %v3080_v47 = vrot.slane %v3072_v36, %v11475_v0  ;;  %v3087_v48 = vrot.slane %v3073_v38, %v11475_v0  ;;  %v726_v16 = vld [vmem:[#allocation2 + $0x90] sm:$0xf] }
  0x5a   : > { %v2615_v49 = vrot.slane %v2601_v40, %v11475_v0  ;;  %v11680_v52 = vrot.slane %v522_v28, 7  ;;  %v3482_v54 = vcombine.low %v2584_v31, %v2591_v12  ;;  %v10961_v57 = vcombine.high %v2584_v31, %v2591_v12  ;;  %v10911_v24 = vld.sshfl [vmem:[#allocation2 + $0x2c] sm:$0x1 pattern:$0x75316420] }
  0x5b   : > { %v3491_v58 = vrot.slane %v3481_v44, %v11475_v0  ;;  %v724_v53 = vsel %vm11421_vm5, %v512_v5, %v723_v46  ;;  %v3088_v6 = vcombine.low %v3080_v47, %v3087_v48  ;;  %v10912_v59 = vld.sshfl [vmem:[#allocation2 + $0x30] sm:$0x33 pattern:$0x75316420]  ;;  %v2135_v60 = vrot.slane %v10911_v24, %v11475_v0  ;;  %v250_v5 = vld [vmem:[#allocation2 + $0x38] sm:$0x1] }
  0x5c   : > { %v3484_v55 = vcombine.low %v2608_v42, %v2615_v49  ;;  %v527_v50 = vor.u32 %v525_v35, %v11680_v52  ;;  %725 = vst [vmem:[#allocation2 + $0x8c] sm:$0x1] %v724_v53  ;;  %v3498_v61 = vrot.slane %v3482_v54, %v11475_v0  ;;  %v3505_v62 = vrot.slane %v10961_v57, %v11475_v0  ;;  %v221_v35 = vld [vmem:[#allocation2 + $0x9c] sm:$0x1]  ;;  %v274_v36 = vld [vmem:[#allocation2 + $0x98] sm:$0x1] }
  0x5d   : > { %v10913_v34 = vld.sshfl [vmem:[#allocation2 + $0x34] sm:$0x33 pattern:$0x75316420]  ;;  %v2143_v63 = vcombine.high %v10912_v59, %v10912_v59  ;;  %v2150_v1 = vrot.slane %v10912_v59, %v11475_v0  ;;  %10970 = vmatmul.mubr.msk.bf16.gmra.mxu0 %vm3833_vm11, %v3088_v6  ;;  %v727_v9 = vsel %vm11461_vm10, %v519_v45, %v726_v16  ;;  %v10962_v18 = vcombine.high %v2608_v42, %v2615_v49  ;;  %v316_v48 = vld [vmem:[%s11417_s7 + $0x60] sm:$0xf] }
  0x5e   : > { %v3512_v14 = vrot.slane %v3484_v55, %v11475_v0  ;;  %v2174_v2 = vrot.slane %v10913_v34, %v11475_v0  ;;  %v528_v4 = vsel %vm11446_vm9, %v520_v56, %v527_v50  ;;  %v3513_v10 = vcombine.low %v3491_v58, %v3498_v61  ;;  %3960 = vmatprep.mubr.bf16.mxu0 %v14588_v7 }
  0x5f   : > { %v2157_v11 = vrot.slane %v2143_v63, %v11475_v0  ;;  %v2158_v13 = vcombine.high %v2150_v1, %v2150_v1  ;;  %v3090_v3 = vcombine.low %v2135_v60, %v2150_v1  ;;  %728 = vst [vmem:[#allocation2 + $0x90] sm:$0xf] %v727_v9  ;;  %729 = vst.msk [vmem:[#allocation2 + $0x94] sm:$0xf] %vm170_vm2, %v528_v4  ;;  %v198_v21 = vsel %vm11421_vm5, 0, %v197_v20 }
  0x60   : > { %v3514_v19 = vcombine.low %v3505_v62, %v3512_v14  ;;  %v251_v23 = vsel %vm11438_vm8, 0, %v250_v5  ;;  %v3521_v25 = vrot.slane %v3513_v10, %v11475_v0  ;;  %199 = vst [vmem:[#allocation2 + $0x3c] sm:$0x1] %v198_v21  ;;  %v11709_v30 = vrot.slane %v10962_v18, %v11475_v0  ;;  %v200_v4 = vld [vmem:[#allocation2 + $0x48] sm:$0x1] }
  0x61   : > { %v2159_v26 = vcombine.high %v2157_v11, %v2157_v11  ;;  %v3091_v27 = vcombine.low %v2157_v11, %v2158_v13  ;;  %v3106_v28 = vrot.slane %v3090_v3, %v11475_v0  ;;  %252 = vst [vmem:[#allocation2 + $0x38] sm:$0x1] %v251_v23  ;;  %v393_v31 = vrot.slane %v11640_v8, 4  ;;  %v253_v3 = vld [vmem:[#allocation2 + $0x44] sm:$0x1] }
  0x62   : > { %v3528_v29 = vrot.slane %v3514_v19, %v11475_v0  ;;  %v395_v32 = vshrl.u32 %v300_v37, 16  ;;  %v398_v44 = vshll.u32 %v300_v37, 16  ;;  %v2167_v47 = vcombine.high %v10913_v34, %v10913_v34  ;;  %v301_v23 = vld [vmem:[%s11417_s7 + $0x24] sm:$0xf] }
  0x63   : > { %v3092_v38 = vcombine.low %v2159_v26, %v2174_v2  ;;  %v3113_v40 = vrot.slane %v3091_v27, %v11475_v0  ;;  %v3121_v42 = vcombine.low %v11661_v17, %v3106_v28  ;;  %v10935_v12 = vld.sshfl [vmem:[#allocation2 + $0x8c] sm:$0x1 pattern:$0x75316420]  ;;  %v2182_v54 = vcombine.high %v2174_v2, %v2174_v2 }
  0x64   : > { %v3529_v45 = vcombine.low %v3521_v25, %v3528_v29  ;;  %v2631_v56 = vrot.slane %v10935_v12, %v11475_v0  ;;  %v11715_v46 = vrot.slane %v395_v32, 7  ;;  %v222_v57 = vsel %vm11421_vm5, 0, %v221_v35  ;;  %v302_v29 = vld [vmem:[%s11417_s7 + $0x28] sm:$0xf] }
  0x65   : > { %v3120_v49 = vrot.slane %v3092_v38, %v11475_v0  ;;  %v3129_v8 = vrot.slane %v3121_v42, %v11475_v0  ;;  %v11725_v24 = vrot.slane %v2167_v47, %v11475_v0  ;;  %223 = vst [vmem:[#allocation2 + $0x9c] sm:$0x1] %v222_v57  ;;  %v275_v53 = vsel %vm11438_vm8, 0, %v274_v36 }
  0x66   : > { %10979 = vmatmul.mubr.msk.bf16.gmra.mxu1 %vm3833_vm11, %v3529_v45  ;;  %v10936_v17 = vld.sshfl [vmem:[#allocation2 + $0x90] sm:$0x33 pattern:$0x75316420]  ;;  %v400_v58 = vor.u32 %v398_v44, %v11715_v46  ;;  %v529_v16 = vrot.slane %v11680_v52, 4  ;;  %v531_v50 = vshrl.u32 %v316_v48, 16 }
  0x67   : > { %4050 = vmatprep.mubr.bf16.mxu1 %v14588_v7  ;;  %v3122_v6 = vcombine.low %v3113_v40, %v3120_v49  ;;  %v10937_v55 = vld.sshfl [vmem:[#allocation2 + $0x94] sm:$0x33 pattern:$0x75316420]  ;;  %v2639_v59 = vcombine.high %v10936_v17, %v10936_v17  ;;  %v2646_v60 = vrot.slane %v10936_v17, %v11475_v0  ;;  %276 = vst [vmem:[#allocation2 + $0x98] sm:$0x1] %v275_v53 }
  0x68   : > { %v2670_v20 = vrot.slane %v10937_v55, %v11475_v0  ;;  %v674_v61 = vld [vmem:[#allocation2 + $0x38] sm:$0x1]  ;;  %v677_v62 = vld [vmem:[#allocation2 + $0x3c] sm:$0xf]  ;;  %v2183_v34 = vcombine.high %v11725_v24, %v11725_v24  ;;  %v11736_v63 = vcombine.low %v11725_v24, %v2182_v54  ;;  %v534_v52 = vshll.u32 %v316_v48, 16 }
  0x69   : > { %v3136_v1 = vrot.slane %v3122_v6, %v11475_v0  ;;  %v2653_v5 = vrot.slane %v2639_v59, %v11475_v0  ;;  %v2654_v14 = vcombine.high %v2646_v60, %v2646_v60  ;;  %v3531_v2 = vcombine.low %v2631_v56, %v2646_v60  ;;  %v224_v40 = vld [vmem:[#allocation2 + $0xa8] sm:$0x1]  ;;  %v277_v56 = vld [vmem:[#allocation2 + $0xa4] sm:$0x1] }
  0x6a   : > { %v675_v9 = vsel %vm11421_vm5, %v393_v31, %v674_v61  ;;  %v678_v10 = vsel %vm11461_vm10, %v400_v58, %v677_v62  ;;  %v3148_v11 = vrot.slane %v11736_v63, %v11475_v0  ;;  %v11746_v13 = vrot.slane %v531_v50, 7  ;;  %v317_v58 = vld [vmem:[%s11417_s7 + $0x64] sm:$0xf]  ;;  %v11781_v59 = vld [vmem:[%s11417_s7 + $0x68] sm:$0xf] }
  0x6b   : > { %v3137_v37 = vcombine.low %v3129_v8, %v3136_v1  ;;  %v2655_v19 = vcombine.high %v2653_v5, %v2653_v5  ;;  %v3532_v18 = vcombine.low %v2653_v5, %v2654_v14  ;;  %v3547_v21 = vrot.slane %v3531_v2, %v11475_v0  ;;  %676 = vst [vmem:[#allocation2 + $0x38] sm:$0x1] %v675_v9 }
  0x6c   : > { %679 = vst [vmem:[#allocation2 + $0x3c] sm:$0xf] %v678_v10  ;;  %v536_v25 = vor.u32 %v534_v52, %v11746_v13  ;;  %v2663_v26 = vcombine.high %v10937_v55, %v10937_v55  ;;  %v2678_v27 = vcombine.high %v2670_v20, %v2670_v20  ;;  %v201_v28 = vsel %vm11421_vm5, 0, %v200_v4  ;;  %v733_v36 = vld [vmem:[#allocation2 + $0x9c] sm:$0xf] }
  0x6d   : > { %10971 = vmatmul.mubr.msk.bf16.gmra.mxu0 %vm3833_vm11, %v3137_v37  ;;  %v3533_v31 = vcombine.low %v2655_v19, %v2670_v20  ;;  %v3554_v32 = vrot.slane %v3532_v18, %v11475_v0  ;;  %v3562_v35 = vcombine.low %v11709_v30, %v3547_v21  ;;  %202 = vst [vmem:[#allocation2 + $0x48] sm:$0x1] %v201_v28  ;;  %v254_v38 = vsel %vm11438_vm8, 0, %v253_v3 }
  0x6e   : > { %3970 = vmatprep.mubr.bf16.mxu0 %v14588_v7  ;;  %v730_v42 = vld [vmem:[#allocation2 + $0x98] sm:$0x1]  ;;  %v734_v12 = vsel %vm11461_vm10, %v536_v25, %v733_v36  ;;  %v11763_v44 = vrot.slane %v2663_v26, %v11475_v0  ;;  %255 = vst [vmem:[#allocation2 + $0x44] sm:$0x1] %v254_v38  ;;  %v401_v45 = vrot.slane %v11715_v46, 4  ;;  %v403_v30 = vshrl.u32 %v301_v23, 16 }
  0x6f   : > { %v3561_v47 = vrot.slane %v3533_v31, %v11475_v0  ;;  %v3570_v48 = vrot.slane %v3562_v35, %v11475_v0  ;;  %v731_v49 = vsel %vm11421_vm5, %v529_v16, %v730_v42  ;;  %735 = vst [vmem:[#allocation2 + $0x9c] sm:$0xf] %v734_v12  ;;  %v406_v8 = vshll.u32 %v301_v23, 16 }
  0x70   : > { %732 = vst [vmem:[#allocation2 + $0x98] sm:$0x1] %v731_v49  ;;  %v2679_v54 = vcombine.high %v11763_v44, %v11763_v44  ;;  %v11773_v57 = vcombine.low %v11763_v44, %v2678_v27  ;;  %v405_v46 = vrot.slane %v403_v30, 7  ;;  %v412_v17 = vshrl.u32 %v302_v29, 16 }
  0x71   : > { %v3563_v53 = vcombine.low %v3554_v32, %v3561_v47  ;;  %v415_v6 = vshll.u32 %v302_v29, 16  ;;  %v225_v55 = vsel %vm11421_vm5, 0, %v224_v40  ;;  %v278_v16 = vsel %vm11438_vm8, 0, %v277_v56  ;;  %v203_v47 = vld [vmem:[#allocation2 + $0x54] sm:$0x1] }
  0x72   : > { %v10914_v60 = vld.sshfl [vmem:[#allocation2 + $0x38] sm:$0x1 pattern:$0x75316420]  ;;  %v3589_v50 = vrot.slane %v11773_v57, %v11475_v0  ;;  %v408_v20 = vor.u32 %v406_v8, %v405_v46  ;;  %v410_v61 = vrot.slane %v405_v46, 4  ;;  %v11785_v62 = vrot.slane %v412_v17, 7 }
  0x73   : > { %226 = vst [vmem:[#allocation2 + $0xa8] sm:$0x1] %v225_v55  ;;  %279 = vst [vmem:[#allocation2 + $0xa4] sm:$0x1] %v278_v16  ;;  %v3577_v52 = vrot.slane %v3563_v53, %v11475_v0  ;;  %v2197_v5 = vrot.slane %v10914_v60, %v11475_v0  ;;  %v537_v14 = vrot.slane %v11746_v13, 4  ;;  %v539_v2 = vshrl.u32 %v317_v58, 16 }
  0x74   : > { %v10915_v1 = vld.sshfl [vmem:[#allocation2 + $0x3c] sm:$0x33 pattern:$0x75316420]  ;;  %v409_v10 = vsel %vm11446_vm9, %v401_v45, %v408_v20  ;;  %v417_v3 = vor.u32 %v415_v6, %v11785_v62  ;;  %v684_v37 = vld [vmem:[#allocation2 + $0x48] sm:$0xf] }
  0x75   : > { %v2205_v4 = vcombine.high %v10915_v1, %v10915_v1  ;;  %v2212_v9 = vrot.slane %v10915_v1, %v11475_v0  ;;  %v3578_v19 = vcombine.low %v3570_v48, %v3577_v52  ;;  %v3139_v18 = vcombine.low %v2183_v34, %v2197_v5  ;;  %680 = vst.msk [vmem:[#allocation2 + $0x40] sm:$0xf] %vm170_vm2, %v409_v10  ;;  %v681_v21 = vld [vmem:[#allocation2 + $0x44] sm:$0x1]  ;;  %v256_v6 = vld [vmem:[#allocation2 + $0x50] sm:$0x1] }
  0x76   : > { %v541_v23 = vrot.slane %v539_v2, 7  ;;  %v542_v13 = vshll.u32 %v317_v58, 16  ;;  %v10939_v26 = vld.sshfl [vmem:[#allocation2 + $0x9c] sm:$0x33 pattern:$0x75316420]  ;;  %v682_v27 = vsel %vm11421_vm5, %v410_v61, %v681_v21  ;;  %v685_v28 = vsel %vm11461_vm10, %v417_v3, %v684_v37 }
  0x77   : > { %v2219_v25 = vrot.slane %v2205_v4, %v11475_v0  ;;  %v548_v29 = vshrl.u32 %v11781_v59, 16  ;;  %10980 = vmatmul.mubr.msk.bf16.gmra.mxu1 %vm3833_vm11, %v3578_v19  ;;  %v3155_v24 = vrot.slane %v3139_v18, %v11475_v0  ;;  %v10938_v34 = vld.sshfl [vmem:[#allocation2 + $0x98] sm:$0x1 pattern:$0x75316420]  ;;  %v2701_v31 = vcombine.high %v10939_v26, %v10939_v26 }
  0x78   : > { %v2708_v32 = vrot.slane %v10939_v26, %v11475_v0  ;;  %683 = vst [vmem:[#allocation2 + $0x44] sm:$0x1] %v682_v27  ;;  %686 = vst [vmem:[#allocation2 + $0x48] sm:$0xf] %v685_v28  ;;  %v544_v35 = vor.u32 %v542_v13, %v541_v23  ;;  %4060 = vmatprep.mubr.bf16.mxu1 %v14588_v7  ;;  %v2693_v40 = vrot.slane %v10938_v34, %v11475_v0  ;;  %v303_v5 = vld [vmem:[%s11417_s7 + $0x2c] sm:$0xf] }
  0x79   : > { %v3140_v36 = vcombine.low %v2212_v9, %v2219_v25  ;;  %v10955_v38 = vcombine.high %v2212_v9, %v2219_v25  ;;  %v546_v42 = vrot.slane %v541_v23, 4  ;;  %v3170_v12 = vcombine.low %v3148_v11, %v3155_v24 }
  0x7a   : > { %v2715_v44 = vrot.slane %v2701_v31, %v11475_v0  ;;  %v545_v45 = vsel %vm11446_vm9, %v537_v14, %v544_v35  ;;  %v11815_v30 = vrot.slane %v548_v29, 7  ;;  %v737_v56 = vld [vmem:[#allocation2 + $0xa4] sm:$0x1]  ;;  %v3580_v8 = vcombine.low %v2679_v54, %v2693_v40  ;;  %v740_v53 = vld [vmem:[#allocation2 + $0xa8] sm:$0xf] }
  0x7b   : > { %v3162_v48 = vrot.slane %v3140_v36, %v11475_v0  ;;  %v3169_v49 = vrot.slane %v10955_v38, %v11475_v0  ;;  %v551_v46 = vshll.u32 %v11781_v59, 16  ;;  %736 = vst.msk [vmem:[#allocation2 + $0xa0] sm:$0xf] %vm170_vm2, %v545_v45  ;;  %v3178_v63 = vrot.slane %v3170_v12, %v11475_v0 }
  0x7c   : > { %v3581_v11 = vcombine.low %v2708_v32, %v2715_v44  ;;  %v10963_v17 = vcombine.high %v2708_v32, %v2715_v44  ;;  %v738_v58 = vsel %vm11421_vm5, %v546_v42, %v737_v56  ;;  %v3596_v16 = vrot.slane %v3580_v8, %v11475_v0  ;;  %v10916_v60 = vld.sshfl [vmem:[#allocation2 + $0x40] sm:$0x33 pattern:$0x75316420]  ;;  %v304_v32 = vld [vmem:[%s11417_s7 + $0x30] sm:$0xf] }
  0x7d   : > { %v3171_v55 = vcombine.low %v3162_v48, %v3169_v49  ;;  %v553_v54 = vor.u32 %v551_v46, %v11815_v30  ;;  %739 = vst [vmem:[#allocation2 + $0xa4] sm:$0x1] %v738_v58  ;;  %v204_v59 = vsel %vm11421_vm5, 0, %v203_v47  ;;  %v2229_v52 = vcombine.high %v10916_v60, %v10916_v60 }
  0x7e   : > { %v3603_v20 = vrot.slane %v3581_v11, %v11475_v0  ;;  %v3610_v61 = vrot.slane %v10963_v17, %v11475_v0  ;;  %v2236_v1 = vrot.slane %v10916_v60, %v11475_v0  ;;  %205 = vst [vmem:[#allocation2 + $0x54] sm:$0x1] %v204_v59  ;;  %v3611_v2 = vcombine.low %v3589_v50, %v3596_v16 }
  0x7f   : > { %v3185_v14 = vrot.slane %v3171_v55, %v11475_v0  ;;  %v10917_v4 = vld.sshfl [vmem:[#allocation2 + $0x44] sm:$0x1 pattern:$0x75316420]  ;;  %v741_v9 = vsel %vm11461_vm10, %v553_v54, %v740_v53  ;;  %v257_v10 = vsel %vm11438_vm8, 0, %v256_v6  ;;  %v2243_v19 = vrot.slane %v2229_v52, %v11475_v0 }
  0x80   : > { %v3612_v3 = vcombine.low %v3603_v20, %v3610_v61  ;;  %v10918_v37 = vld.sshfl [vmem:[#allocation2 + $0x48] sm:$0x33 pattern:$0x75316420]  ;;  %v2259_v18 = vrot.slane %v10917_v4, %v11475_v0  ;;  %742 = vst [vmem:[#allocation2 + $0xa8] sm:$0xf] %v741_v9  ;;  %v3619_v50 = vrot.slane %v3611_v2, %v11475_v0 }
  0x81   : > { %258 = vst [vmem:[#allocation2 + $0x50] sm:$0x1] %v257_v10  ;;  %v418_v21 = vrot.slane %v11785_v62, 4  ;;  %v3186_v57 = vcombine.low %v3178_v63, %v3185_v14  ;;  %v2267_v23 = vcombine.high %v10918_v37, %v10918_v37  ;;  %v2274_v13 = vrot.slane %v10918_v37, %v11475_v0  ;;  %v227_v52 = vld [vmem:[#allocation2 + $0xb4] sm:$0x1] }
  0x82   : > { %v3626_v25 = vrot.slane %v3612_v3, %v11475_v0  ;;  %v3187_v26 = vcombine.low %v2236_v1, %v2243_v19  ;;  %v10956_v27 = vcombine.high %v2236_v1, %v2243_v19  ;;  %v10940_v28 = vld.sshfl [vmem:[#allocation2 + $0xa0] sm:$0x33 pattern:$0x75316420]  ;;  %v420_v29 = vshrl.u32 %v303_v5, 16 }
  0x83   : > { %10972 = vmatmul.mubr.msk.bf16.gmra.mxu0 %vm3833_vm11, %v3186_v57  ;;  %v11848_v24 = vrot.slane %v2267_v23, %v11475_v0  ;;  %v2282_v34 = vcombine.high %v2274_v13, %v2274_v13  ;;  %v3189_v31 = vcombine.low %v2259_v18, %v2274_v13  ;;  %v2725_v62 = vcombine.high %v10940_v28, %v10940_v28  ;;  %v280_v4 = vld [vmem:[#allocation2 + $0xb0] sm:$0x1]  ;;  %v319_v19 = vld [vmem:[%s11417_s7 + $0x6c] sm:$0xf] }
  0x84   : > { %v3627_v35 = vcombine.low %v3619_v50, %v3626_v25  ;;  %3980 = vmatprep.mubr.bf16.mxu0 %v14588_v7  ;;  %v3197_v36 = vrot.slane %v3187_v26, %v11475_v0  ;;  %v3204_v38 = vrot.slane %v10956_v27, %v11475_v0  ;;  %v10941_v40 = vld.sshfl [vmem:[#allocation2 + $0xa4] sm:$0x1 pattern:$0x75316420]  ;;  %v2732_v42 = vrot.slane %v10940_v28, %v11475_v0  ;;  %v320_v13 = vld [vmem:[%s11417_s7 + $0x70] sm:$0xf] }
  0x85   : > { %v3190_v12 = vcombine.low %v11848_v24, %v2282_v34  ;;  %v3211_v44 = vrot.slane %v3189_v31, %v11475_v0  ;;  %v2739_v45 = vrot.slane %v2725_v62, %v11475_v0  ;;  %v2755_v56 = vrot.slane %v10941_v40, %v11475_v0  ;;  %v691_v50 = vld [vmem:[#allocation2 + $0x54] sm:$0xf]  ;;  %v259_v34 = vld [vmem:[#allocation2 + $0x5c] sm:$0x1] }
  0x86   : > { %10981 = vmatmul.mubr.msk.bf16.gmra.mxu1 %vm3833_vm11, %v3627_v35  ;;  %v3219_v47 = vcombine.low %v3197_v36, %v3204_v38  ;;  %v422_v48 = vrot.slane %v420_v29, 7  ;;  %v423_v49 = vshll.u32 %v303_v5, 16  ;;  %v429_v8 = vshrl.u32 %v304_v32, 16  ;;  %v206_v29 = vld [vmem:[#allocation2 + $0x60] sm:$0x1] }
  0x87   : > { %4070 = vmatprep.mubr.bf16.mxu1 %v14588_v7  ;;  %v3218_v46 = vrot.slane %v3190_v12, %v11475_v0  ;;  %v10942_v63 = vld.sshfl [vmem:[#allocation2 + $0xa8] sm:$0x33 pattern:$0x75316420]  ;;  %v3628_v11 = vcombine.low %v2732_v42, %v2739_v45  ;;  %v10964_v17 = vcombine.high %v2732_v42, %v2739_v45  ;;  %v432_v58 = vshll.u32 %v304_v32, 16 }
  0x88   : > { %v3227_v53 = vrot.slane %v3219_v47, %v11475_v0  ;;  %v2763_v6 = vcombine.high %v10942_v63, %v10942_v63  ;;  %v2770_v55 = vrot.slane %v10942_v63, %v11475_v0  ;;  %v425_v16 = vor.u32 %v423_v49, %v422_v48  ;;  %v688_v60 = vld [vmem:[#allocation2 + $0x50] sm:$0x1]  ;;  %v305_v35 = vld [vmem:[%s11417_s7 + $0x34] sm:$0xf]  ;;  %v306_v12 = vld [vmem:[%s11417_s7 + $0x38] sm:$0xf] }
  0x89   : > { %v3220_v54 = vcombine.low %v3211_v44, %v3218_v46  ;;  %v3638_v59 = vrot.slane %v3628_v11, %v11475_v0  ;;  %v3645_v20 = vrot.slane %v10964_v17, %v11475_v0  ;;  %v427_v61 = vrot.slane %v422_v48, 4 }
  0x8a   : > { %v11867_v1 = vrot.slane %v2763_v6, %v11475_v0  ;;  %v2778_v5 = vcombine.high %v2770_v55, %v2770_v55  ;;  %v3630_v14 = vcombine.low %v2755_v56, %v2770_v55  ;;  %v426_v2 = vsel %vm11446_vm9, %v418_v21, %v425_v16 }
  0x8b   : > { %v3234_v9 = vrot.slane %v3220_v54, %v11475_v0  ;;  %v3660_v10 = vcombine.low %v3638_v59, %v3645_v20  ;;  %v11872_v3 = vrot.slane %v429_v8, 7  ;;  %687 = vst.msk [vmem:[#allocation2 + $0x4c] sm:$0xf] %vm170_vm2, %v426_v2  ;;  %v689_v37 = vsel %vm11421_vm5, %v427_v61, %v688_v60 }
  0x8c   : > { %v3631_v18 = vcombine.low %v11867_v1, %v2778_v5  ;;  %v3652_v57 = vrot.slane %v3630_v14, %v11475_v0  ;;  %690 = vst [vmem:[#allocation2 + $0x50] sm:$0x1] %v689_v37  ;;  %v2283_v21 = vcombine.high %v11848_v24, %v11848_v24  ;;  %v228_v23 = vsel %vm11421_vm5, 0, %v227_v52  ;;  %v230_v5 = vld [vmem:[#allocation2 + $0xc0] sm:$0x1] }
  0x8d   : > { %v3235_v25 = vcombine.low %v3227_v53, %v3234_v9  ;;  %v3668_v26 = vrot.slane %v3660_v10, %v11475_v0  ;;  %v434_v27 = vor.u32 %v432_v58, %v11872_v3  ;;  %229 = vst [vmem:[#allocation2 + $0xb4] sm:$0x1] %v228_v23  ;;  %v281_v28 = vsel %vm11438_vm8, 0, %v280_v4 }
  0x8e   : > { %v3659_v31 = vrot.slane %v3631_v18, %v11475_v0  ;;  %282 = vst [vmem:[#allocation2 + $0xb0] sm:$0x1] %v281_v28  ;;  %v554_v24 = vrot.slane %v11815_v30, 4  ;;  %v556_v62 = vshrl.u32 %v319_v19, 16  ;;  %v559_v32 = vshll.u32 %v319_v19, 16 }
  0x8f   : > { %10973 = vmatmul.mubr.msk.bf16.gmra.mxu0 %vm3833_vm11, %v3235_v25  ;;  %v692_v36 = vsel %vm11461_vm10, %v434_v27, %v691_v50  ;;  %v565_v38 = vshrl.u32 %v320_v13, 16  ;;  %v568_v40 = vshll.u32 %v320_v13, 16  ;;  %v2779_v42 = vcombine.high %v11867_v1, %v11867_v1  ;;  %v321_v50 = vld [vmem:[%s11417_s7 + $0x74] sm:$0xf] }
  0x90   : > { %v3661_v44 = vcombine.low %v3652_v57, %v3659_v31  ;;  %3990 = vmatprep.mubr.bf16.mxu0 %v14588_v7  ;;  %693 = vst [vmem:[#allocation2 + $0x54] sm:$0xf] %v692_v36  ;;  %v558_v45 = vrot.slane %v556_v62, 7  ;;  %v207_v30 = vsel %vm11421_vm5, 0, %v206_v29  ;;  %v260_v56 = vsel %vm11438_vm8, 0, %v259_v34 }
  0x91   : > { %v11903_v47 = vrot.slane %v565_v38, 7  ;;  %208 = vst [vmem:[#allocation2 + $0x60] sm:$0x1] %v207_v30  ;;  %261 = vst [vmem:[#allocation2 + $0x5c] sm:$0x1] %v260_v56  ;;  %v435_v48 = vrot.slane %v11872_v3, 4 }
  0x92   : > { %v437_v49 = vshrl.u32 %v305_v35, 16  ;;  %v440_v8 = vshll.u32 %v305_v35, 16  ;;  %v3675_v46 = vrot.slane %v3661_v44, %v11475_v0  ;;  %v10919_v63 = vld.sshfl [vmem:[#allocation2 + $0x4c] sm:$0x33 pattern:$0x75316420]  ;;  %v561_v11 = vor.u32 %v559_v32, %v558_v45 }
  0x93   : > { %v563_v17 = vrot.slane %v558_v45, 4  ;;  %v446_v58 = vshrl.u32 %v306_v12, 16  ;;  %v10920_v53 = vld.sshfl [vmem:[#allocation2 + $0x50] sm:$0x1 pattern:$0x75316420]  ;;  %v2291_v6 = vcombine.high %v10919_v63, %v10919_v63  ;;  %v2298_v55 = vrot.slane %v10919_v63, %v11475_v0 }
  0x94   : > { %v570_v16 = vor.u32 %v568_v40, %v11903_v47  ;;  %v439_v60 = vrot.slane %v437_v49, 7  ;;  %v3676_v54 = vcombine.low %v3668_v26, %v3675_v46  ;;  %v2321_v59 = vrot.slane %v10920_v53, %v11475_v0  ;;  %v747_v61 = vld [vmem:[#allocation2 + $0xb4] sm:$0xf]  ;;  %v283_v57 = vld [vmem:[#allocation2 + $0xbc] sm:$0x1] }
  0x95   : > { %v562_v20 = vsel %vm11446_vm9, %v554_v24, %v561_v11  ;;  %v11912_v52 = vrot.slane %v446_v58, 7  ;;  %v2305_v14 = vrot.slane %v2291_v6, %v11475_v0  ;;  %v2306_v2 = vcombine.high %v2298_v55, %v2298_v55  ;;  %v744_v9 = vld [vmem:[#allocation2 + $0xb0] sm:$0x1]  ;;  %v322_v62 = vld [vmem:[%s11417_s7 + $0x78] sm:$0xf] }
  0x96   : > { %v3236_v4 = vcombine.low %v2283_v21, %v2298_v55  ;;  %743 = vst.msk [vmem:[#allocation2 + $0xac] sm:$0xf] %vm170_vm2, %v562_v20  ;;  %v748_v10 = vsel %vm11461_vm10, %v570_v16, %v747_v61  ;;  %10982 = vmatmul.mubr.msk.bf16.gmra.mxu1 %vm3833_vm11, %v3676_v54  ;;  %v745_v3 = vsel %vm11421_vm5, %v563_v17, %v744_v9  ;;  %v444_v19 = vrot.slane %v439_v60, 4 }
  0x97   : > { %749 = vst [vmem:[#allocation2 + $0xb4] sm:$0xf] %v748_v10  ;;  %v442_v37 = vor.u32 %v440_v8, %v439_v60  ;;  %v449_v18 = vshll.u32 %v306_v12, 16  ;;  %4080 = vmatprep.mubr.bf16.mxu1 %v14588_v7  ;;  %v2307_v23 = vcombine.high %v2305_v14, %v2305_v14  ;;  %v3237_v13 = vcombine.low %v2305_v14, %v2306_v2 }
  0x98   : > { %v10921_v21 = vld.sshfl [vmem:[#allocation2 + $0x54] sm:$0x33 pattern:$0x75316420]  ;;  %v3246_v25 = vrot.slane %v3236_v4, %v11475_v0  ;;  %746 = vst [vmem:[#allocation2 + $0xb0] sm:$0x1] %v745_v3 }
  0x99   : > { %v231_v26 = vsel %vm11421_vm5, 0, %v230_v5  ;;  %v2329_v27 = vcombine.high %v10921_v21, %v10921_v21  ;;  %v2336_v28 = vrot.slane %v10921_v21, %v11475_v0  ;;  %v443_v29 = vsel %vm11446_vm9, %v435_v48, %v442_v37  ;;  %v695_v31 = vld [vmem:[#allocation2 + $0x5c] sm:$0x1]  ;;  %v698_v24 = vld [vmem:[#allocation2 + $0x60] sm:$0xf] }
  0x9a   : > { %v451_v34 = vor.u32 %v449_v18, %v11912_v52  ;;  %232 = vst [vmem:[#allocation2 + $0xc0] sm:$0x1] %v231_v26  ;;  %v3238_v32 = vcombine.low %v2307_v23, %v2321_v59  ;;  %v3253_v35 = vrot.slane %v3237_v13, %v11475_v0  ;;  %694 = vst.msk [vmem:[#allocation2 + $0x58] sm:$0xf] %vm170_vm2, %v443_v29  ;;  %v284_v38 = vsel %vm11438_vm8, 0, %v283_v57 }
  0x9b   : > { %v696_v36 = vsel %vm11421_vm5, %v444_v19, %v695_v31  ;;  %v2343_v40 = vrot.slane %v2329_v27, %v11475_v0  ;;  %285 = vst [vmem:[#allocation2 + $0xbc] sm:$0x1] %v284_v38  ;;  %v571_v44 = vrot.slane %v11903_v47, 4  ;;  %v573_v45 = vshrl.u32 %v321_v50, 16 }
  0x9c   : > { %697 = vst [vmem:[#allocation2 + $0x5c] sm:$0x1] %v696_v36  ;;  %v699_v12 = vsel %vm11461_vm10, %v451_v34, %v698_v24  ;;  %v3260_v30 = vrot.slane %v3238_v32, %v11475_v0  ;;  %v3268_v56 = vcombine.low %v3246_v25, %v3253_v35  ;;  %v576_v48 = vshll.u32 %v321_v50, 16 }
  0x9d   : > { %700 = vst [vmem:[#allocation2 + $0x60] sm:$0xf] %v699_v12  ;;  %v582_v49 = vshrl.u32 %v322_v62, 16  ;;  %v3239_v8 = vcombine.low %v2336_v28, %v2343_v40  ;;  %v10957_v63 = vcombine.high %v2336_v28, %v2343_v40  ;;  %v575_v11 = vrot.slane %v573_v45, 7  ;;  %v262_v45 = vld [vmem:[#allocation2 + $0x68] sm:$0x1] }
  0x9e   : > { %v10943_v46 = vld.sshfl [vmem:[#allocation2 + $0xac] sm:$0x33 pattern:$0x75316420]  ;;  %v585_v17 = vshll.u32 %v322_v62, 16  ;;  %v3276_v58 = vrot.slane %v3268_v56, %v11475_v0  ;;  %vm8448_vm12 = vcmask 1042434  }
  0x9f   : > { %v10945_v53 = vld.sshfl [vmem:[#allocation2 + $0xb4] sm:$0x33 pattern:$0x75316420]  ;;  %v2787_v6 = vcombine.high %v10943_v46, %v10943_v46  ;;  %v2794_v55 = vrot.slane %v10943_v46, %v11475_v0  ;;  %v11944_v16 = vrot.slane %v582_v49, 7  ;;  %v3267_v47 = vrot.slane %v3239_v8, %v11475_v0  ;;  %vm8449_vm13 = vmor %vm3888_vm0, %vm8448_vm12 }
  0xa0   : > { %v10944_v60 = vld.sshfl [vmem:[#allocation2 + $0xb0] sm:$0x1 pattern:$0x75316420]  ;;  %v2825_v54 = vcombine.high %v10945_v53, %v10945_v53  ;;  %v2832_v59 = vrot.slane %v10945_v53, %v11475_v0  ;;  %v11949_v20 = vrot.slane %v10957_v63, %v11475_v0  ;;  %v578_v3 = vor.u32 %v576_v48, %v575_v11  ;;  %v307_v49 = vld [vmem:[%s11417_s7 + $0x3c] sm:$0xf] }
  0xa1   : > { %v2801_v61 = vrot.slane %v2787_v6, %v11475_v0  ;;  %v2802_v5 = vcombine.high %v2794_v55, %v2794_v55  ;;  %v2817_v14 = vrot.slane %v10944_v60, %v11475_v0  ;;  %v3677_v2 = vcombine.low %v2779_v42, %v2794_v55  ;;  %v10922_v10 = vld.sshfl [vmem:[#allocation2 + $0x58] sm:$0x33 pattern:$0x75316420]  ;;  %v754_v31 = vld [vmem:[#allocation2 + $0xc0] sm:$0xf] }
  0xa2   : > { %v3269_v4 = vcombine.low %v3260_v30, %v3267_v47  ;;  %v2839_v9 = vrot.slane %v2825_v54, %v11475_v0  ;;  %v580_v37 = vrot.slane %v575_v11, 4  ;;  %v2353_v21 = vcombine.high %v10922_v10, %v10922_v10  ;;  %v751_v34 = vld [vmem:[#allocation2 + $0xbc] sm:$0x1] }
  0xa3   : > { %v2803_v19 = vcombine.high %v2801_v61, %v2801_v61  ;;  %v3678_v18 = vcombine.low %v2801_v61, %v2802_v5  ;;  %v3687_v57 = vrot.slane %v3677_v2, %v11475_v0  ;;  %v10923_v50 = vld.sshfl [vmem:[#allocation2 + $0x5c] sm:$0x1 pattern:$0x75316420]  ;;  %v11960_v26 = vrot.slane %v10922_v10, %v11475_v0 }
  0xa4   : > { %v3283_v23 = vrot.slane %v3269_v4, %v11475_v0  ;;  %v3680_v13 = vcombine.low %v2832_v59, %v2839_v9  ;;  %v10924_v25 = vld.sshfl [vmem:[#allocation2 + $0x60] sm:$0x33 pattern:$0x75316420]  ;;  %v11963_v1 = vrot.slane %v10923_v50, %v11475_v0  ;;  %v11967_v28 = vrot.slane %v2353_v21, %v11475_v0 }
  0xa5   : > { %v3679_v42 = vcombine.low %v2803_v19, %v2817_v14  ;;  %v3694_v27 = vrot.slane %v3678_v18, %v11475_v0  ;;  %v11970_v29 = vrot.slane %v10924_v25, %v11475_v0  ;;  %v579_v32 = vsel %vm11446_vm9, %v571_v44, %v578_v3 }
  0xa6   : > { %v3284_v24 = vcombine.low %v3276_v58, %v3283_v23  ;;  %v3708_v62 = vrot.slane %v3680_v13, %v11475_v0  ;;  %v587_v35 = vor.u32 %v585_v17, %v11944_v16  ;;  %v3286_v40 = vcombine.low %v11960_v26, %v11967_v28  ;;  %750 = vst.msk [vmem:[#allocation2 + $0xb8] sm:$0xf] %vm170_vm2, %v579_v32  ;;  %v286_v17 = vld [vmem:[#allocation2 + $0xc8] sm:$0x1] }
  0xa7   : > { %v3701_v36 = vrot.slane %v3679_v42, %v11475_v0  ;;  %v3709_v38 = vcombine.low %v3687_v57, %v3694_v27  ;;  %v10958_v12 = vcombine.high %v11960_v26, %v11967_v28  ;;  %v3288_v30 = vcombine.low %v11963_v1, %v11970_v29 }
  0xa8   : > { %10974 = vmatmul.mubr.msk.bf16.gmra.mxu0 %vm3833_vm11, %v3284_v24  ;;  %v752_v44 = vsel %vm11421_vm5, %v580_v37, %v751_v34  ;;  %v755_v56 = vsel %vm11461_vm10, %v587_v35, %v754_v31  ;;  %v10965_v48 = vcombine.high %v2832_v59, %v2839_v9  ;;  %v3302_v63 = vrot.slane %v3286_v40, %v11475_v0  ;;  %v323_v59 = vld [vmem:[%s11417_s7 + $0x7c] sm:$0xf] }
  0xa9   : > { %v3710_v8 = vcombine.low %v3701_v36, %v3708_v62  ;;  %v3717_v46 = vrot.slane %v3709_v38, %v11475_v0  ;;  %4000 = vmatprep.mubr.bf16.mxu0 %v14588_v7  ;;  %v3309_v11 = vrot.slane %v10958_v12, %v11475_v0  ;;  %753 = vst [vmem:[#allocation2 + $0xbc] sm:$0x1] %v752_v44  ;;  %756 = vst [vmem:[#allocation2 + $0xc0] sm:$0xf] %v755_v56  ;;  %vm8450_vm14 = vcmask 1044484  }
  0xaa   : > { %v3316_v58 = vrot.slane %v3288_v30, %v11475_v0  ;;  %v11996_v51 = vrot.slane %v10965_v48, %v11475_v0  ;;  %v263_v53 = vsel %vm11438_vm8, 0, %v262_v45  ;;  %v452_v6 = vrot.slane %v11912_v52, 4  ;;  %vm8451_vm15 = vmor %vm8449_vm13, %vm8450_vm14 }
  0xab   : > { %v3724_v55 = vrot.slane %v3710_v8, %v11475_v0  ;;  %v3317_v47 = vcombine.low %v11949_v20, %v3302_v63  ;;  %264 = vst [vmem:[#allocation2 + $0x68] sm:$0x1] %v263_v53  ;;  %v454_v60 = vshrl.u32 %v307_v49, 16  ;;  %v457_v54 = vshll.u32 %v307_v49, 16  ;;  %v182_v20 = vld [vmem:[#allocation2] sm:$0x1] }
  0xac   : > { %v3318_v61 = vcombine.low %v3309_v11, %v3316_v58  ;;  %v2391_v5 = vcombine.high %v10924_v25, %v10924_v25  ;;  %v2406_v14 = vcombine.high %v11970_v29, %v11970_v29  ;;  %v287_v2 = vsel %vm11438_vm8, 0, %v286_v17  ;;  %v11021_v49 = vld.sshfl [vmem:[#allocation2 + $0x18] sm:$0x33 pattern:$0x75316420] }
  0xad   : > { %v3725_v4 = vcombine.low %v3717_v46, %v3724_v55  ;;  %v3325_v9 = vrot.slane %v3317_v47, %v11475_v0  ;;  %v456_v52 = vrot.slane %v454_v60, 7  ;;  %288 = vst [vmem:[#allocation2 + $0xc8] sm:$0x1] %v287_v2  ;;  %v588_v10 = vrot.slane %v11944_v16, 4 }
  0xae   : > { %v3332_v3 = vrot.slane %v3318_v61, %v11475_v0  ;;  %v10946_v37 = vld.sshfl [vmem:[#allocation2 + $0xb8] sm:$0x33 pattern:$0x75316420]  ;;  %v12012_v19 = vrot.slane %v2391_v5, %v11475_v0  ;;  %v590_v18 = vshrl.u32 %v323_v59, 16  ;;  %v593_v57 = vshll.u32 %v323_v59, 16 }
  0xaf   : > { %10983 = vmatmul.mubr.msk.bf16.gmra.mxu1 %vm3833_vm11, %v3725_v4  ;;  %v2849_v50 = vcombine.high %v10946_v37, %v10946_v37  ;;  %v2856_v21 = vrot.slane %v10946_v37, %v11475_v0  ;;  %v459_v23 = vor.u32 %v457_v54, %v456_v52  ;;  %v461_v13 = vrot.slane %v456_v52, 4  ;;  %v11239_v17 = vld.sshfl [vmem:[#allocation2 + $0x4] sm:$0x33 pattern:$0x75316420] }
  0xb0   : > { %4090 = vmatprep.mubr.bf16.mxu1 %v14588_v7  ;;  %v3333_v25 = vcombine.low %v3325_v9, %v3332_v3  ;;  %v10947_v16 = vld.sshfl [vmem:[#allocation2 + $0xbc] sm:$0x1 pattern:$0x75316420]  ;;  %v2407_v42 = vcombine.high %v12012_v19, %v12012_v19  ;;  %v12020_v27 = vcombine.low %v12012_v19, %v2406_v14  ;;  %v592_v34 = vrot.slane %v590_v18, 7 }
  0xb1   : > { %v10948_v31 = vld.sshfl [vmem:[#allocation2 + $0xc0] sm:$0x33 pattern:$0x75316420]  ;;  %v2863_v24 = vrot.slane %v2849_v50, %v11475_v0  ;;  %v2879_v62 = vrot.slane %v10947_v16, %v11475_v0  ;;  %v460_v32 = vsel %vm11446_vm9, %v452_v6, %v459_v23  ;;  %v183_v35 = vsel %vm11421_vm5, 0, %v182_v20 }
  0xb2   : > { %10975 = vmatmul.mubr.msk.bf16.gmra.mxu0 %vm3833_vm11, %v3333_v25  ;;  %v2894_v36 = vrot.slane %v10948_v31, %v11475_v0  ;;  %701 = vst.msk [vmem:[#allocation2 + $0x64] sm:$0xf] %vm170_vm2, %v460_v32  ;;  %v702_v38 = vld [vmem:[#allocation2 + $0x68] sm:$0x1]  ;;  %v3344_v40 = vrot.slane %v12020_v27, %v11475_v0  ;;  %v595_v12 = vor.u32 %v593_v57, %v592_v34  ;;  %v597_v45 = vrot.slane %v592_v34, 4 }
  0xb3   : > { %184 = vst [vmem:[#allocation2] sm:$0x1] %v183_v35  ;;  %v3727_v30 = vcombine.low %v2856_v21, %v2863_v24  ;;  %v10966_v44 = vcombine.high %v2856_v21, %v2863_v24  ;;  %4010 = vmatprep.mubr.bf16.mxu0 %v14588_v7  ;;  %v703_v56 = vsel %vm11421_vm5, %v461_v13, %v702_v38  ;;  %v11022_v53 = vld.sshfl [vmem:[#allocation2 + $0x1c] sm:$0x33 pattern:$0x75316420] }
  0xb4   : > { %v2887_v48 = vcombine.high %v10948_v31, %v10948_v31  ;;  %v3729_v8 = vcombine.low %v2879_v62, %v2894_v36  ;;  %704 = vst [vmem:[#allocation2 + $0x68] sm:$0x1] %v703_v56  ;;  %v596_v46 = vsel %vm11446_vm9, %v588_v10, %v595_v12  ;;  %v758_v63 = vld [vmem:[#allocation2 + $0xc8] sm:$0x1]  ;;  %v2902_v11 = vcombine.high %v2894_v36, %v2894_v36 }
  0xb5   : > { %v900_v58 = vrot.slane %v11239_v17, %v11475_v0  ;;  %v3743_v6 = vrot.slane %v3727_v30, %v11475_v0  ;;  %v3750_v55 = vrot.slane %v10966_v44, %v11475_v0  ;;  %757 = vst.msk [vmem:[#allocation2 + $0xc4] sm:$0xf] %vm170_vm2, %v596_v46  ;;  %v759_v47 = vsel %vm11421_vm5, %v597_v45, %v758_v63 }
  0xb6   : > { %v2901_v60 = vrot.slane %v2887_v48, %v11475_v0  ;;  %v3757_v39 = vrot.slane %v3729_v8, %v11475_v0  ;;  %760 = vst [vmem:[#allocation2 + $0xc8] sm:$0x1] %v759_v47  ;;  %v907_v54 = vrot.slane %v893_v22, %v11475_v0  ;;  %v5379_v59 = vcombine.high %v11021_v49, %v11021_v49 }
  0xb7   : > { %v12051_v61 = vrot.slane %v11021_v49, %v11475_v0  ;;  %v3758_v5 = vcombine.low %v11996_v51, %v3743_v6  ;;  %v5403_v4 = vcombine.high %v11022_v53, %v11022_v53  ;;  %v12060_v22 = vrot.slane %v11022_v53, %v11475_v0 }
  0xb8   : > { %v2903_v14 = vcombine.high %v2901_v60, %v2901_v60  ;;  %v3775_v2 = vcombine.low %v2901_v60, %v2902_v11  ;;  %v3759_v9 = vcombine.low %v3750_v55, %v3757_v39  ;;  %v4113_v52 = vcombine.low %v900_v58, %v907_v54 }
  0xb9   : > { %v10987_v10 = vcombine.high %v900_v58, %v907_v54  ;;  %v12055_v20 = vrot.slane %v5379_v59, %v11475_v0  ;;  %v3766_v3 = vrot.slane %v3758_v5, %v11475_v0  ;;  %v10925_v37 = vld.sshfl [vmem:[#allocation2 + $0x64] sm:$0x33 pattern:$0x75316420]  ;;  %v12063_v18 = vrot.slane %v5403_v4, %v11475_v0 }
  0xba   : > { %v3785_v43 = vrot.slane %v3775_v2, %v11475_v0  ;;  %v3773_v51 = vrot.slane %v3759_v9, %v11475_v0  ;;  %v2415_v57 = vcombine.high %v10925_v37, %v10925_v37  ;;  %v12067_v50 = vrot.slane %v10925_v37, %v11475_v0  ;;  %v10855_v21 = vld.sshfl [vmem:[#allocation2] sm:$0x33 pattern:$0x75316420]  ;;  %v238_v37 = vld [vmem:[#allocation2 + $0x8] sm:$0x1] }
  0xbb   : > { %v4135_v23 = vrot.slane %v4113_v52, %v11475_v0  ;;  %v10926_v13 = vld.sshfl [vmem:[#allocation2 + $0x68] sm:$0x1 pattern:$0x75316420]  ;;  %v869_v25 = vcombine.high %v10855_v21, %v10855_v21  ;;  %v876_v16 = vrot.slane %v10855_v21, %v11475_v0  ;;  %v4142_v34 = vrot.slane %v10987_v10, %v11475_v0 }
  0xbc   : > { %v6364_v31 = vcombine.low %v12051_v61, %v12055_v20  ;;  %v3774_v24 = vcombine.low %v3766_v3, %v3773_v51  ;;  %v12075_v62 = vrot.slane %v2415_v57, %v11475_v0  ;;  %v2430_v32 = vcombine.high %v12067_v50, %v12067_v50  ;;  %v10949_v36 = vld.sshfl [vmem:[#allocation2 + $0xc4] sm:$0x33 pattern:$0x75316420] }
  0xbd   : > { %v12080_v35 = vrot.slane %v10926_v13, %v11475_v0  ;;  %v3335_v38 = vcombine.low %v2407_v42, %v12067_v50  ;;  %v10950_v12 = vld.sshfl [vmem:[#allocation2 + $0xc8] sm:$0x1 pattern:$0x75316420]  ;;  %v2911_v45 = vcombine.high %v10949_v36, %v10949_v36  ;;  %v2918_v30 = vrot.slane %v10949_v36, %v11475_v0 }
  0xbe   : > { %v883_v44 = vrot.slane %v869_v25, %v11475_v0  ;;  %10984 = vmatmul.mubr.msk.bf16.gmra.mxu1 %vm3833_vm11, %v3774_v24  ;;  %v2431_v56 = vcombine.high %v12075_v62, %v12075_v62  ;;  %v3336_v48 = vcombine.low %v12075_v62, %v2430_v32  ;;  %v2941_v49 = vrot.slane %v10950_v12, %v11475_v0  ;;  %v10858_v51 = vld.sshfl [vmem:[#allocation2 + $0xc] sm:$0x33 pattern:$0x75316420] }
  0xbf   : > { %v4144_v8 = vcombine.low %v4135_v23, %v4142_v34  ;;  %4100 = vmatprep.mubr.bf16.mxu1 %v14588_v7  ;;  %v3351_v42 = vrot.slane %v3335_v38, %v11475_v0  ;;  %v2925_v46 = vrot.slane %v2911_v45, %v11475_v0  ;;  %v2926_v63 = vcombine.high %v2918_v30, %v2918_v30 }
  0xc0   : > { %v3776_v11 = vcombine.low %v2903_v14, %v2918_v30  ;;  %v3337_v17 = vcombine.low %v2431_v56, %v12080_v35  ;;  %v3358_v58 = vrot.slane %v3336_v48, %v11475_v0  ;;  %v4111_v53 = vcombine.low %v876_v16, %v883_v44  ;;  %v11024_v48 = vld.sshfl [vmem:[#allocation2 + $0x24] sm:$0x33 pattern:$0x75316420] }
  0xc1   : > { %v10986_v6 = vcombine.high %v876_v16, %v883_v44  ;;  %v3366_v55 = vcombine.low %v3344_v40, %v3351_v42  ;;  %v2927_v47 = vcombine.high %v2925_v46, %v2925_v46  ;;  %v3777_v60 = vcombine.low %v2925_v46, %v2926_v63  ;;  %v10859_v16 = vld.sshfl [vmem:[#allocation2 + $0x10] sm:$0x33 pattern:$0x75316420] }
  0xc2   : > { %v3792_v39 = vrot.slane %v3776_v11, %v11475_v0  ;;  %v3365_v54 = vrot.slane %v3337_v17, %v11475_v0  ;;  %v4121_v59 = vrot.slane %v4111_v53, %v11475_v0  ;;  %v12106_v14 = vrot.slane %v4144_v8, %v11475_v0  ;;  %v11025_v46 = vld.sshfl [vmem:[#allocation2 + $0x28] sm:$0x33 pattern:$0x75316420] }
  0xc3   : > { %v4128_v5 = vrot.slane %v10986_v6, %v11475_v0  ;;  %v3374_v2 = vrot.slane %v3366_v55, %v11475_v0  ;;  %v3778_v4 = vcombine.low %v2927_v47, %v2941_v49  ;;  %v3799_v9 = vrot.slane %v3777_v60, %v11475_v0 }
  0xc4   : > { %v3807_v27 = vcombine.low %v3785_v43, %v3792_v39  ;;  %v3367_v40 = vcombine.low %v3358_v58, %v3365_v54  ;;  %v11069_v10 = vcombine.high %v12051_v61, %v12055_v20  ;;  %v6366_v3 = vcombine.low %v12060_v22, %v12063_v18 }
  0xc5   : > { %v4143_v52 = vcombine.low %v4121_v59, %v4128_v5  ;;  %v3806_v57 = vrot.slane %v3778_v4, %v11475_v0  ;;  %v11070_v23 = vcombine.high %v12060_v22, %v12063_v18  ;;  %v12119_v13 = vrot.slane %v6364_v31, %v11475_v0  ;;  %v11023_v31 = vld.sshfl [vmem:[#allocation2 + $0x20] sm:$0x1 pattern:$0x75316420] }
  0xc6   : > { %v3815_v21 = vrot.slane %v3807_v27, %v11475_v0  ;;  %v3381_v43 = vrot.slane %v3367_v40, %v11475_v0  ;;  %v12126_v61 = vrot.slane %v11069_v10, %v11475_v0  ;;  %v12129_v20 = vrot.slane %v6366_v3, %v11475_v0  ;;  %v10860_v40 = vld.sshfl [vmem:[#allocation2 + $0x14] sm:$0x1 pattern:$0x75316420] }
  0xc7   : > { %v12123_v25 = vrot.slane %v4143_v52, %v11475_v0  ;;  %v3808_v34 = vcombine.low %v3799_v9, %v3806_v57  ;;  %v12132_v24 = vrot.slane %v11070_v23, %v11475_v0  ;;  %v239_v22 = vsel %vm11438_vm8, 0, %v238_v37 }
  0xc8   : > { %v931_v18 = vcombine.high %v10858_v51, %v10858_v51  ;;  %v3382_v32 = vcombine.low %v3374_v2, %v3381_v43  ;;  %v6396_v38 = vcombine.low %v12119_v13, %v12126_v61  ;;  %240 = vst [vmem:[#allocation2 + $0x8] sm:$0x1] %v239_v22  ;;  %v938_v12 = vrot.slane %v10858_v51, %v11475_v0 }
  0xc9   : > { %v4159_v36 = vcombine.low %v12123_v25, %v12106_v14  ;;  %v3822_v45 = vrot.slane %v3808_v34, %v11475_v0  ;;  %v6397_v30 = vcombine.low %v12129_v20, %v12132_v24  ;;  %v955_v56 = vcombine.high %v10859_v16, %v10859_v16 }
  0xca   : > { %v945_v44 = vrot.slane %v931_v18, %v11475_v0  ;;  %10976 = vmatmul.mubr.msk.bf16.gmra.mxu0 %vm3833_vm11, %v3382_v32  ;;  %v6404_v49 = vrot.slane %v6396_v38, %v11475_v0  ;;  %v946_v8 = vcombine.high %v938_v12, %v938_v12  ;;  %v962_v42 = vrot.slane %v10859_v16, %v11475_v0 }
  0xcb   : > { %v5433_v63 = vrot.slane %v11023_v31, %v11475_v0  ;;  %v3823_v11 = vcombine.low %v3815_v21, %v3822_v45  ;;  %7347 = vmatprep.mubr.bf16.mxu0 %v14588_v7  ;;  %v6411_v17 = vrot.slane %v6397_v30, %v11475_v0  ;;  %v969_v53 = vrot.slane %v955_v56, %v11475_v0  ;;  %v11026_v31 = vld.sshfl [vmem:[#allocation2 + $0x2c] sm:$0x1 pattern:$0x75316420] }
  0xcc   : > { %v947_v58 = vcombine.high %v945_v44, %v945_v44  ;;  %v970_v6 = vcombine.high %v962_v42, %v962_v42  ;;  %v4161_v55 = vcombine.low %v945_v44, %v946_v8  ;;  %v5441_v47 = vcombine.high %v11024_v48, %v11024_v48  ;;  %v11027_v44 = vld.sshfl [vmem:[#allocation2 + $0x30] sm:$0x33 pattern:$0x75316420] }
  0xcd   : > { %v5448_v60 = vrot.slane %v11024_v48, %v11475_v0  ;;  %10985 = vmatmul.mubr.msk.bf16.gmra.mxu1 %vm3833_vm11, %v3823_v11  ;;  %v6412_v39 = vcombine.low %v6404_v49, %v6411_v17  ;;  %v5465_v59 = vcombine.high %v11025_v46, %v11025_v46  ;;  %v5472_v5 = vrot.slane %v11025_v46, %v11475_v0  ;;  %v11028_v46 = vld.sshfl [vmem:[#allocation2 + $0x34] sm:$0x33 pattern:$0x75316420] }
  0xce   : > { %v4162_v54 = vcombine.low %v947_v58, %v962_v42  ;;  %5094 = vmatprep.mubr.bf16.mxu1 %v14588_v7  ;;  %v4163_v2 = vcombine.low %v969_v53, %v970_v6  ;;  %v4177_v4 = vrot.slane %v4161_v55, %v11475_v0  ;;  %v5455_v9 = vrot.slane %v5441_v47, %v11475_v0 }
  0xcf   : > { %v5456_v27 = vcombine.high %v5448_v60, %v5448_v60  ;;  %v10857_v52 = vld.sshfl [vmem:[#allocation2 + $0x8] sm:$0x1 pattern:$0x75316420]  ;;  %v5479_v3 = vrot.slane %v5465_v59, %v11475_v0  ;;  %v5480_v37 = vcombine.high %v5472_v5, %v5472_v5  ;;  %v6413_v51 = vcombine.low %v5433_v63, %v5448_v60 }
  0xd0   : > { %v4184_v10 = vrot.slane %v4162_v54, %v11475_v0  ;;  %v923_v57 = vrot.slane %v10857_v52, %v11475_v0  ;;  %v4191_v21 = vrot.slane %v4163_v2, %v11475_v0  ;;  %v5457_v23 = vcombine.high %v5455_v9, %v5455_v9 }
  0xd1   : > { %v6414_v43 = vcombine.low %v5455_v9, %v5456_v27  ;;  %v6416_v16 = vcombine.low %v5479_v3, %v5480_v37  ;;  %v12163_v34 = vrot.slane %v6413_v51, %v11475_v0  ;;  %v971_v22 = vcombine.high %v969_v53, %v969_v53  ;;  %v233_v37 = vld [vmem:[#allocation2 + $0xcc] sm:$0x1] }
  0xd2   : > { %v985_v18 = vrot.slane %v10860_v40, %v11475_v0  ;;  %11086 = vmatmul.mubr.msk.bf16.vlgmr.msra.gmra.mxu0 %vm3833_vm11, %v6412_v39  ;;  %v4160_v32 = vcombine.low %v923_v57, %v938_v12  ;;  %v4193_v38 = vcombine.low %v4184_v10, %v4191_v21  ;;  %v6415_v45 = vcombine.low %v5457_v23, %v5472_v5  ;;  %v11029_v5 = vld.sshfl [vmem:[#allocation2 + $0x38] sm:$0x1 pattern:$0x75316420] }
  0xd3   : > { %v12168_v30 = vrot.slane %v6414_v43, %v11475_v0  ;;  %7357 = vmatprep.mubr.bf16.mxu0 %v14588_v7  ;;  %v12172_v56 = vrot.slane %v6416_v16, %v11475_v0  ;;  %v4242_v49 = vcombine.low %v12126_v61, %v12129_v20  ;;  %v5481_v63 = vcombine.high %v5479_v3, %v5479_v3  ;;  %v11031_v23 = vld.sshfl [vmem:[#allocation2 + $0x40] sm:$0x33 pattern:$0x75316420] }
  0xd4   : > { %v4209_v48 = vcombine.low %v971_v22, %v985_v18  ;;  %v4170_v8 = vrot.slane %v4160_v32, %v11475_v0  ;;  %v12178_v42 = vrot.slane %v6415_v45, %v11475_v0  ;;  %v4207_v11 = vrot.slane %v4193_v38, %v11475_v0 }
  0xd5   : > { %v6445_v12 = vcombine.low %v12163_v34, %v12168_v30  ;;  %11003 = vmatmul.mubr.msk.bf16.vlgmr.msra.gmra.mxu1 %vm3833_vm11, %v4159_v36  ;;  %v5495_v61 = vrot.slane %v11026_v31, %v11475_v0  ;;  %v5503_v20 = vcombine.high %v11027_v44, %v11027_v44  ;;  %v5510_v55 = vrot.slane %v11027_v44, %v11475_v0 }
  0xd6   : > { %v4219_v17 = vrot.slane %v4209_v48, %v11475_v0  ;;  %5104 = vmatprep.mubr.bf16.mxu1 %v14588_v7  ;;  %v4192_v58 = vcombine.low %v4170_v8, %v4177_v4  ;;  %v6446_v53 = vcombine.low %v12178_v42, %v12172_v56  ;;  %v5527_v36 = vcombine.high %v11028_v46, %v11028_v46 }
  0xd7   : > { %v6453_v6 = vrot.slane %v6445_v12, %v11475_v0  ;;  %v5517_v25 = vrot.slane %v5503_v20, %v11475_v0  ;;  %v5534_v47 = vrot.slane %v11028_v46, %v11475_v0  ;;  %v4256_v54 = vrot.slane %v4242_v49, %v11475_v0 }
  0xd8   : > { %v4241_v14 = vcombine.low %v4219_v17, %v12119_v13  ;;  %v4200_v60 = vrot.slane %v4192_v58, %v11475_v0  ;;  %v6460_v39 = vrot.slane %v6446_v53, %v11475_v0  ;;  %v6462_v59 = vcombine.low %v5481_v63, %v5495_v61  ;;  %v11030_v13 = vld.sshfl [vmem:[#allocation2 + $0x3c] sm:$0x33 pattern:$0x75316420] }
  0xd9   : > { %v5541_v4 = vrot.slane %v5527_v36, %v11475_v0  ;;  %v6463_v9 = vcombine.low %v5510_v55, %v5517_v25  ;;  %v11071_v27 = vcombine.high %v5510_v55, %v5517_v25  ;;  %v4290_v3 = vcombine.low %v12132_v24, %v12163_v34  ;;  %v11033_v58 = vld.sshfl [vmem:[#allocation2 + $0x48] sm:$0x33 pattern:$0x75316420]  ;;  %v289_v36 = vld [vmem:[#allocation2 + $0xd4] sm:$0x1] }
  0xda   : > { %v4249_v2 = vrot.slane %v4241_v14, %v11475_v0  ;;  %v4208_v40 = vcombine.low %v4200_v60, %v4207_v11  ;;  %v6461_v52 = vcombine.low %v6453_v6, %v6460_v39  ;;  %v6472_v10 = vrot.slane %v6462_v59, %v11475_v0  ;;  %v11032_v11 = vld.sshfl [vmem:[#allocation2 + $0x44] sm:$0x1 pattern:$0x75316420] }
  0xdb   : > { %v6465_v51 = vcombine.low %v5534_v47, %v5541_v4  ;;  %v6479_v57 = vrot.slane %v6463_v9, %v11475_v0  ;;  %v6486_v21 = vrot.slane %v11071_v27, %v11475_v0  ;;  %v4291_v16 = vcombine.low %v12168_v30, %v12178_v42 }
  0xdc   : > { %11087 = vmatmul.mubr.msk.bf16.gmra.mxu0 %vm3833_vm11, %v6461_v52  ;;  %v4257_v43 = vcombine.low %v4249_v2, %v4256_v54  ;;  %v5557_v22 = vrot.slane %v11029_v5, %v11475_v0  ;;  %v5565_v18 = vcombine.high %v11030_v13, %v11030_v13  ;;  %v5572_v31 = vrot.slane %v11030_v13, %v11475_v0 }
  0xdd   : > { %11004 = vmatmul.mubr.msk.bf16.gmra.mxu1 %vm3833_vm11, %v4208_v40  ;;  %7367 = vmatprep.mubr.bf16.mxu0 %v14588_v7  ;;  %v12214_v24 = vrot.slane %v6465_v51, %v11475_v0  ;;  %v6494_v34 = vcombine.low %v6472_v10, %v6479_v57  ;;  %v234_v32 = vsel %vm11421_vm5, 0, %v233_v37  ;;  %v12221_v38 = vrot.slane %v4290_v3, %v11475_v0 }
  0xde   : > { %5114 = vmatprep.mubr.bf16.mxu1 %v14588_v7  ;;  %v5579_v45 = vrot.slane %v5565_v18, %v11475_v0  ;;  %v5596_v30 = vrot.slane %v11031_v23, %v11475_v0  ;;  %v11072_v44 = vcombine.high %v5534_v47, %v5541_v4  ;;  %235 = vst [vmem:[#allocation2 + $0xcc] sm:$0x1] %v234_v32  ;;  %v11034_v4 = vld.sshfl [vmem:[#allocation2 + $0x4c] sm:$0x33 pattern:$0x75316420] }
  0xdf   : > { %v6495_v48 = vcombine.low %v6486_v21, %v12214_v24  ;;  %v6502_v49 = vrot.slane %v6494_v34, %v11475_v0  ;;  %v5580_v8 = vcombine.high %v5572_v31, %v5572_v31  ;;  %v6512_v42 = vcombine.low %v5557_v22, %v5572_v31  ;;  %v11036_v18 = vld.sshfl [vmem:[#allocation2 + $0x54] sm:$0x33 pattern:$0x75316420] }
  0xe0   : > { %v5581_v12 = vcombine.high %v5579_v45, %v5579_v45  ;;  %v6521_v15 = vrot.slane %v11072_v44, %v11475_v0  ;;  %v4339_v46 = vcombine.low %v12172_v56, %v6472_v10  ;;  %v4340_v63 = vcombine.low %v6479_v57, %v6486_v21  ;;  %v11035_v21 = vld.sshfl [vmem:[#allocation2 + $0x50] sm:$0x1 pattern:$0x75316420] }
  0xe1   : > { %v6509_v17 = vrot.slane %v6495_v48, %v11475_v0  ;;  %v6513_v61 = vcombine.low %v5579_v45, %v5580_v8  ;;  %v12231_v20 = vrot.slane %v6512_v42, %v11475_v0  ;;  %v5589_v53 = vcombine.high %v11031_v23, %v11031_v23 }
  0xe2   : > { %v4305_v6 = vrot.slane %v4291_v16, %v11475_v0  ;;  %v6514_v55 = vcombine.low %v5581_v12, %v5596_v30  ;;  %v12235_v14 = vrot.slane %v4339_v46, %v11475_v0  ;;  %v5604_v25 = vcombine.high %v5596_v30, %v5596_v30 }
  0xe3   : > { %v6510_v47 = vcombine.low %v6502_v49, %v6509_v17  ;;  %v6535_v56 = vrot.slane %v6513_v61, %v11475_v0  ;;  %v6543_v60 = vcombine.low %v6521_v15, %v12231_v20  ;;  %v5603_v39 = vrot.slane %v5589_v53, %v11475_v0 }
  0xe4   : > { %v6542_v54 = vrot.slane %v6514_v55, %v11475_v0  ;;  %v12242_v59 = vrot.slane %v4340_v63, %v11475_v0  ;;  %v5619_v5 = vrot.slane %v11032_v11, %v11475_v0  ;;  %v5627_v2 = vcombine.high %v11033_v58, %v11033_v58 }
  0xe5   : > { %11005 = vmatmul.mubr.msk.bf16.gmra.mxu1 %vm3833_vm11, %v4257_v43  ;;  %11088 = vmatmul.mubr.msk.bf16.gmra.mxu0 %vm3833_vm11, %v6510_v47  ;;  %v6551_v9 = vrot.slane %v6543_v60, %v11475_v0  ;;  %v5605_v27 = vcombine.high %v5603_v39, %v5603_v39  ;;  %v5634_v13 = vrot.slane %v11033_v58, %v11475_v0  ;;  %v290_v40 = vsel %vm11438_vm8, 0, %v289_v36 }
  0xe6   : > { %5124 = vmatprep.mubr.bf16.mxu1 %v14588_v7  ;;  %7377 = vmatprep.mubr.bf16.mxu0 %v14588_v7  ;;  %v6544_v52 = vcombine.low %v6535_v56, %v6542_v54  ;;  %v5641_v10 = vrot.slane %v5627_v2, %v11475_v0  ;;  %v6560_v3 = vcombine.low %v5603_v39, %v5604_v25  ;;  %vm8452_vm0 = vcmask 1046534  }
  0xe7   : > { %291 = vst [vmem:[#allocation2 + $0xd4] sm:$0x1] %v290_v40  ;;  %v4306_v37 = vcombine.low %v12221_v38, %v4305_v6  ;;  %v6561_v51 = vcombine.low %v5605_v27, %v5619_v5  ;;  %v4388_v57 = vcombine.low %v12214_v24, %v6521_v15  ;;  %v5651_v23 = vcombine.high %v11034_v4, %v11034_v4  ;;  %vm12857_vm1 = vmor %vm8451_vm15, %vm8452_vm0 }
  0xe8   : > { %v6558_v43 = vrot.slane %v6544_v52, %v11475_v0  ;;  %v6562_v33 = vcombine.low %v5634_v13, %v5641_v10  ;;  %v11073_v16 = vcombine.high %v5634_v13, %v5641_v10  ;;  %v6570_v22 = vrot.slane %v6560_v3, %v11475_v0  ;;  %v11042_v10 = vld.sshfl [vmem:[#allocation2 + $0x6c] sm:$0x33 pattern:$0x75316420] }
  0xe9   : > { %v4355_v34 = vcombine.low %v12235_v14, %v12242_v59  ;;  %v6577_v31 = vrot.slane %v6561_v51, %v11475_v0  ;;  %v4389_v32 = vcombine.low %v12231_v20, %v6535_v56  ;;  %v5658_v38 = vrot.slane %v11034_v4, %v11475_v0 }
  0xea   : > { %v6559_v45 = vcombine.low %v6551_v9, %v6558_v43  ;;  %v6584_v24 = vrot.slane %v6562_v33, %v11475_v0  ;;  %v6591_v30 = vrot.slane %v11073_v16, %v11475_v0  ;;  %v5665_v44 = vrot.slane %v5651_v23, %v11475_v0 }
  0xeb   : > { %v6592_v48 = vcombine.low %v6570_v22, %v6577_v31  ;;  %v12267_v49 = vrot.slane %v4388_v57, %v11475_v0  ;;  %v5681_v8 = vrot.slane %v11035_v21, %v11475_v0  ;;  %v5689_v42 = vcombine.high %v11036_v18, %v11036_v18 }
  0xec   : > { %v6593_v12 = vcombine.low %v6584_v24, %v6591_v30  ;;  %v5696_v15 = vrot.slane %v11036_v18, %v11475_v0  ;;  %v6609_v46 = vcombine.low %v5658_v38, %v5665_v44  ;;  %v11074_v63 = vcombine.high %v5658_v38, %v5665_v44 }
  0xed   : > { %11006 = vmatmul.mubr.msk.bf16.gmra.mxu1 %vm3833_vm11, %v4306_v37  ;;  %11089 = vmatmul.mubr.msk.bf16.gmra.mxu0 %vm3833_vm11, %v6559_v45  ;;  %v6600_v11 = vrot.slane %v6592_v48, %v11475_v0  ;;  %v5703_v17 = vrot.slane %v5689_v42, %v11475_v0  ;;  %v4437_v61 = vcombine.low %v6542_v54, %v6570_v22  ;;  %vm10737_vm2 = vcmask 519168  }
  0xee   : > { %5134 = vmatprep.mubr.bf16.mxu1 %v14588_v7  ;;  %7387 = vmatprep.mubr.bf16.mxu0 %v14588_v7  ;;  %v6607_v20 = vrot.slane %v6593_v12, %v11475_v0  ;;  %v5704_v58 = vcombine.high %v5696_v15, %v5696_v15  ;;  %v6611_v53 = vcombine.low %v5681_v8, %v5696_v15 }
  0xef   : > { %v4403_v6 = vrot.slane %v4389_v32, %v11475_v0  ;;  %v6619_v55 = vrot.slane %v6609_v46, %v11475_v0  ;;  %v12281_v14 = vrot.slane %v11074_v63, %v11475_v0  ;;  %v4438_v25 = vcombine.low %v6577_v31, %v6584_v24  ;;  %v10878_v24 = vld.sshfl [vmem:[#allocation2 + $0x5c] sm:$0x1 pattern:$0x75316420] }
  0xf0   : > { %v6612_v36 = vcombine.low %v5703_v17, %v5704_v58  ;;  %v12284_v47 = vrot.slane %v6611_v53, %v11475_v0  ;;  %v12287_v56 = vrot.slane %v4437_v61, %v11475_v0  ;;  %v12289_v60 = vcombine.high %v5703_v17, %v5703_v17  ;;  %v11043_v17 = vld.sshfl [vmem:[#allocation2 + $0x70] sm:$0x33 pattern:$0x75316420] }
  0xf1   : > { %v6608_v39 = vcombine.low %v6600_v11, %v6607_v20  ;;  %v6641_v54 = vcombine.low %v6619_v55, %v12281_v14  ;;  %v5728_v59 = vcombine.high %v11960_v26, %v11960_v26  ;;  %v5729_v5 = vcombine.high %v11967_v28, %v11967_v28 }
  0xf2   : > { %v12297_v2 = vrot.slane %v6612_v36, %v11475_v0  ;;  %v12300_v4 = vrot.slane %v4438_v25, %v11475_v0  ;;  %v6658_v9 = vcombine.low %v12289_v60, %v11960_v26  ;;  %v6661_v27 = vcombine.low %v11970_v29, %v12012_v19 }
  0xf3   : > { %v4404_v13 = vcombine.low %v12267_v49, %v4403_v6  ;;  %v6659_v40 = vcombine.low %v11967_v28, %v5728_v59  ;;  %v6660_v52 = vcombine.low %v5729_v5, %v11963_v1  ;;  %v4486_v57 = vcombine.low %v6591_v30, %v6619_v55 }
  0xf4   : > { %v6642_v3 = vcombine.low %v12284_v47, %v12297_v2  ;;  %v6668_v37 = vrot.slane %v6658_v9, %v11475_v0  ;;  %v6689_v51 = vrot.slane %v6661_v27, %v11475_v0  ;;  %v6649_v26 = vrot.slane %v6641_v54, %v11475_v0 }
  0xf5   : > { %11007 = vmatmul.mubr.msk.bf16.gmra.mxu1 %vm3833_vm11, %v4355_v34  ;;  %11090 = vmatmul.mubr.msk.bf16.gmra.mxu0 %vm3833_vm11, %v6608_v39  ;;  %v6675_v21 = vrot.slane %v6659_v40, %v11475_v0  ;;  %v6682_v28 = vrot.slane %v6660_v52, %v11475_v0  ;;  %v4453_v23 = vcombine.low %v12287_v56, %v12300_v4  ;;  %v10877_v34 = vld.sshfl [vmem:[#allocation2 + $0x58] sm:$0x33 pattern:$0x75316420] }
  0xf6   : > { %5144 = vmatprep.mubr.bf16.mxu1 %v14588_v7  ;;  %7397 = vmatprep.mubr.bf16.mxu0 %v14588_v7  ;;  %v6656_v1 = vrot.slane %v6642_v3, %v11475_v0  ;;  %v12324_v43 = vrot.slane %v11042_v10, %v11475_v0  ;;  %v11075_v22 = vcombine.high %v11970_v29, %v12012_v19  ;;  %v10879_v39 = vld.sshfl [vmem:[#allocation2 + $0x60] sm:$0x33 pattern:$0x75316420] }
  0xf7   : > { %v6690_v33 = vcombine.low %v6668_v37, %v6675_v21  ;;  %v6691_v16 = vcombine.low %v6682_v28, %v6689_v51  ;;  %v6708_v18 = vcombine.low %v12067_v50, %v12075_v62  ;;  %v4487_v31 = vcombine.low %v12281_v14, %v12284_v47  ;;  %v11044_v14 = vld.sshfl [vmem:[#allocation2 + $0x74] sm:$0x1 pattern:$0x75316420] }
  0xf8   : > { %v12333_v32 = vrot.slane %v4486_v57, %v11475_v0  ;;  %v11076_v38 = vcombine.high %v12067_v50, %v12075_v62  ;;  %v6710_v45 = vcombine.low %v12080_v35, %v12324_v43  ;;  %v6657_v30 = vcombine.low %v6649_v26, %v6656_v1 }
  0xf9   : > { %v6698_v29 = vrot.slane %v6690_v33, %v11475_v0  ;;  %v6717_v19 = vrot.slane %v11075_v22, %v11475_v0  ;;  %v6724_v44 = vrot.slane %v6708_v18, %v11475_v0  ;;  %v1327_v8 = vcombine.high %v10877_v34, %v10877_v34 }
  0xfa   : > { %v6731_v48 = vrot.slane %v11076_v38, %v11475_v0  ;;  %v6738_v49 = vrot.slane %v6710_v45, %v11475_v0  ;;  %v1334_v42 = vrot.slane %v10877_v34, %v11475_v0  ;;  %v6705_v50 = vrot.slane %v6691_v16, %v11475_v0  ;;  %v11045_v34 = vld.sshfl [vmem:[#allocation2 + $0x78] sm:$0x33 pattern:$0x75316420] }
  0xfb   : > { %v6739_v62 = vcombine.low %v6717_v19, %v6724_v44  ;;  %v1357_v35 = vrot.slane %v10878_v24, %v11475_v0  ;;  %v5813_v12 = vcombine.high %v11042_v10, %v11042_v10  ;;  %v1341_v46 = vrot.slane %v1327_v8, %v11475_v0  ;;  %v10880_v10 = vld.sshfl [vmem:[#allocation2 + $0x64] sm:$0x33 pattern:$0x75316420] }
  0xfc   : > { %v6740_v15 = vcombine.low %v6731_v48, %v6738_v49  ;;  %v1342_v63 = vcombine.high %v1334_v42, %v1334_v42  ;;  %v4504_v11 = vcombine.low %v12289_v60, %v1334_v42  ;;  %v5828_v58 = vcombine.high %v12324_v43, %v12324_v43  ;;  %v10881_v49 = vld.sshfl [vmem:[#allocation2 + $0x68] sm:$0x1 pattern:$0x75316420] }
  0xfd   : > { %11008 = vmatmul.mubr.msk.bf16.gmra.mxu1 %vm3833_vm11, %v4404_v13  ;;  %11091 = vmatmul.mubr.msk.bf16.gmra.mxu0 %vm3833_vm11, %v6657_v30  ;;  %v12352_v61 = vrot.slane %v6739_v62, %v11475_v0  ;;  %v5827_v20 = vrot.slane %v5813_v12, %v11475_v0  ;;  %v1343_v6 = vcombine.high %v1341_v46, %v1341_v46 }
  0xfe   : > { %5154 = vmatprep.mubr.bf16.mxu1 %v14588_v7  ;;  %7407 = vmatprep.mubr.bf16.mxu0 %v14588_v7  ;;  %v12360_v53 = vrot.slane %v6740_v15, %v11475_v0  ;;  %v4505_v55 = vcombine.low %v1341_v46, %v1342_v63  ;;  %v4520_v25 = vrot.slane %v4504_v11, %v11475_v0  ;;  %v12405_v46 = vpop.f32.mrf.mxu0 }
  0xff   : > { %v5829_v36 = vcombine.high %v5827_v20, %v5827_v20  ;;  %v5837_v47 = vcombine.high %v11043_v17, %v11043_v17  ;;  %v5844_v60 = vrot.slane %v11043_v17, %v11475_v0  ;;  %v6706_v54 = vcombine.low %v6698_v29, %v6705_v50 }
 0x100   : > { %v4501_v59 = vrot.slane %v4487_v31, %v11475_v0  ;;  %v6755_v5 = vcombine.low %v12352_v61, %v12360_v53  ;;  %v4506_v9 = vcombine.low %v1343_v6, %v1357_v35  ;;  %v5867_v40 = vrot.slane %v11044_v14, %v11475_v0 }
 0x101   : > { %v5851_v27 = vrot.slane %v5837_v47, %v11475_v0  ;;  %v5852_v13 = vcombine.high %v5844_v60, %v5844_v60  ;;  %v6756_v52 = vcombine.low %v5827_v20, %v5828_v58  ;;  %v4527_v3 = vrot.slane %v4505_v55, %v11475_v0 }
 0x102   : > { %v4535_v37 = vcombine.low %v12297_v2, %v4520_v25  ;;  %v6757_v51 = vcombine.low %v5829_v36, %v5844_v60  ;;  %v1365_v57 = vcombine.high %v10879_v39, %v10879_v39  ;;  %v4534_v26 = vrot.slane %v4506_v9, %v11475_v0  ;;  %v11047_v25 = vld.sshfl [vmem:[#allocation2 + $0x80] sm:$0x1 pattern:$0x75316420] }
 0x103   : > { %v5853_v21 = vcombine.high %v5851_v27, %v5851_v27  ;;  %v6758_v28 = vcombine.low %v5851_v27, %v5852_v13  ;;  %v1372_v1 = vrot.slane %v10879_v39, %v11475_v0  ;;  %v12374_v33 = vrot.slane %v6756_v52, %v11475_v0  ;;  %v11048_v39 = vld.sshfl [vmem:[#allocation2 + $0x84] sm:$0x33 pattern:$0x75316420] }
 0x104   : > { %v12377_v16 = vrot.slane %v6757_v51, %v11475_v0  ;;  %v1379_v22 = vrot.slane %v1365_v57, %v11475_v0  ;;  %v1389_v18 = vcombine.high %v10880_v10, %v10880_v10  ;;  %v1396_v38 = vrot.slane %v10880_v10, %v11475_v0  ;;  %v11049_v13 = vld.sshfl [vmem:[#allocation2 + $0x88] sm:$0x33 pattern:$0x75316420] }
 0x105   : > { %11009 = vmatmul.mubr.msk.bf16.gmra.mxu1 %vm3833_vm11, %v4453_v23  ;;  %11092 = vmatmul.mubr.msk.bf16.gmra.mxu0 %vm3833_vm11, %v6706_v54  ;;  %v6759_v2 = vcombine.low %v5853_v21, %v5867_v40  ;;  %v12386_v31 = vrot.slane %v6758_v28, %v11475_v0  ;;  %v11046_v23 = vld.sshfl [vmem:[#allocation2 + $0x7c] sm:$0x33 pattern:$0x75316420]  ;;  %v5875_v30 = vcombine.high %v11045_v34, %v11045_v34  ;;  %v12419_v54 = vpop.f32.mrf.mxu0  ;;  %v12428_v40 = vpop.f32.mrf.mxu1 }
 0x106   : > { %5164 = vmatprep.mubr.bf16.mxu1 %v14588_v7  ;;  %7417 = vmatprep.mubr.bf16.mxu0 %v14588_v7  ;;  %v1403_v45 = vrot.slane %v1389_v18, %v11475_v0  ;;  %v4552_v56 = vcombine.low %v1372_v1, %v1379_v22  ;;  %v10994_v4 = vcombine.high %v1372_v1, %v1379_v22 }
 0x107   : > { %v12393_v24 = vrot.slane %v6759_v2, %v11475_v0  ;;  %v4502_v29 = vcombine.low %v12333_v32, %v4501_v59  ;;  %v4536_v19 = vcombine.low %v4527_v3, %v4534_v26  ;;  %v4543_v8 = vrot.slane %v4535_v37, %v11475_v0  ;;  %v12443_v22 = vpop.f32.mrf.mxu0 }
 0x108   : > { %v4554_v44 = vcombine.low %v1396_v38, %v1403_v45  ;;  %v10995_v48 = vcombine.high %v1396_v38, %v1403_v45  ;;  %v6788_v42 = vcombine.low %v12374_v33, %v12377_v16  ;;  %v5882_v62 = vrot.slane %v11045_v34, %v11475_v0  ;;  %v12449_v45 = vpop.f32.mrf.mxu1 }
 0x109   : > { %v6789_v50 = vcombine.low %v12386_v31, %v12393_v24  ;;  %v4562_v35 = vrot.slane %v4552_v56, %v11475_v0  ;;  %v4569_v12 = vrot.slane %v10994_v4, %v11475_v0  ;;  %v5889_v32 = vrot.slane %v5875_v30, %v11475_v0 }
 0x10a   : > { %v5899_v15 = vcombine.high %v11046_v23, %v11046_v23  ;;  %v4576_v63 = vrot.slane %v4554_v44, %v11475_v0  ;;  %v4583_v11 = vrot.slane %v10995_v48, %v11475_v0  ;;  %v5906_v17 = vrot.slane %v11046_v23, %v11475_v0  ;;  %v11050_v48 = vld.sshfl [vmem:[#allocation2 + $0x8c] sm:$0x1 pattern:$0x75316420] }
 0x10b   : > { %v1419_v61 = vrot.slane %v10881_v49, %v11475_v0  ;;  %v4550_v20 = vrot.slane %v4536_v19, %v11475_v0  ;;  %v6805_v53 = vcombine.low %v5882_v62, %v5889_v32  ;;  %v11077_v6 = vcombine.high %v5882_v62, %v5889_v32  ;;  %v12460_v62 = vpop.f32.mrf.mxu0 }
 0x10c   : > { %v5913_v58 = vrot.slane %v5899_v15, %v11475_v0  ;;  %v6796_v55 = vrot.slane %v6788_v42, %v11475_v0  ;;  %v6803_v14 = vrot.slane %v6789_v50, %v11475_v0  ;;  %v4584_v36 = vcombine.low %v4562_v35, %v4569_v12  ;;  %v11051_v50 = vld.sshfl [vmem:[#allocation2 + $0x90] sm:$0x33 pattern:$0x75316420] }
 0x10d   : > { %11010 = vmatmul.mubr.msk.bf16.gmra.mxu1 %vm3833_vm11, %v4502_v29  ;;  %11093 = vmatmul.mubr.msk.bf16.gmra.mxu0 %vm3833_vm11, %v6755_v5  ;;  %v4585_v59 = vcombine.low %v4576_v63, %v4583_v11  ;;  %v12422_v9 = vrot.slane %v6805_v53, %v11475_v0  ;;  %v12425_v5 = vrot.slane %v11077_v6, %v11475_v0  ;;  %v11052_v63 = vld.sshfl [vmem:[#allocation2 + $0x94] sm:$0x33 pattern:$0x75316420]  ;;  %v12466_v11 = vpop.f32.mrf.mxu1 }
 0x10e   : > { %5174 = vmatprep.mubr.bf16.mxu1 %v14588_v7  ;;  %7427 = vmatprep.mubr.bf16.mxu0 %v14588_v7  ;;  %v6807_v47 = vcombine.low %v5906_v17, %v5913_v58  ;;  %v11078_v60 = vcombine.high %v5906_v17, %v5913_v58  ;;  %v4601_v27 = vcombine.low %v1419_v61, %v12324_v43 }
 0x10f   : > { %v4551_v52 = vcombine.low %v4543_v8, %v4550_v20  ;;  %v6804_v37 = vcombine.low %v6796_v55, %v6803_v14  ;;  %v6837_v51 = vcombine.low %v12422_v9, %v12425_v5  ;;  %v5929_v57 = vrot.slane %v11047_v25, %v11475_v0 }
 0x110   : > { %v12431_v10 = vrot.slane %v6807_v47, %v11475_v0  ;;  %v12434_v3 = vrot.slane %v11078_v60, %v11475_v0  ;;  %v5937_v26 = vcombine.high %v11048_v39, %v11048_v39  ;;  %v5944_v21 = vrot.slane %v11048_v39, %v11475_v0 }
 0x111   : > { %v5961_v28 = vcombine.high %v11049_v13, %v11049_v13  ;;  %v5968_v1 = vrot.slane %v11049_v13, %v11475_v0  ;;  %v4592_v18 = vrot.slane %v4584_v36, %v11475_v0  ;;  %v4599_v34 = vrot.slane %v4585_v59, %v11475_v0  ;;  %v12482_v36 = vpop.f32.mrf.mxu0  ;;  %v12488_v59 = vpop.f32.mrf.mxu1 }
 0x112   : > { %v6838_v43 = vcombine.low %v12431_v10, %v12434_v3  ;;  %v4611_v2 = vrot.slane %v4601_v27, %v11475_v0  ;;  %v5951_v38 = vrot.slane %v5937_v26, %v11475_v0  ;;  %v6845_v56 = vrot.slane %v6837_v51, %v11475_v0  ;;  %v11053_v51 = vld.sshfl [vmem:[#allocation2 + $0x98] sm:$0x1 pattern:$0x75316420] }
 0x113   : > { %v5952_v4 = vcombine.high %v5944_v21, %v5944_v21  ;;  %v5975_v23 = vrot.slane %v5961_v28, %v11475_v0  ;;  %v5976_v30 = vcombine.high %v5968_v1, %v5968_v1  ;;  %v6854_v44 = vcombine.low %v5929_v57, %v5944_v21  ;;  %v11054_v21 = vld.sshfl [vmem:[#allocation2 + $0x9c] sm:$0x33 pattern:$0x75316420] }
 0x114   : > { %v6852_v29 = vrot.slane %v6838_v43, %v11475_v0  ;;  %v5953_v19 = vcombine.high %v5951_v38, %v5951_v38  ;;  %v4634_v49 = vcombine.low %v12377_v16, %v12386_v31  ;;  %v4600_v35 = vcombine.low %v4592_v18, %v4599_v34  ;;  %v11055_v18 = vld.sshfl [vmem:[#allocation2 + $0xa0] sm:$0x33 pattern:$0x75316420]  ;;  %v12503_v34 = vpop.f32.mrf.mxu0 }
 0x115   : > { %11011 = vmatmul.mubr.msk.bf16.gmra.mxu1 %vm3833_vm11, %v4551_v52  ;;  %11094 = vmatmul.mubr.msk.bf16.gmra.mxu0 %vm3833_vm11, %v6804_v37  ;;  %v6855_v8 = vcombine.low %v5951_v38, %v5952_v4  ;;  %v6857_v42 = vcombine.low %v5975_v23, %v5976_v30  ;;  %v4633_v12 = vcombine.low %v4611_v2, %v12374_v33 }
 0x116   : > { %5184 = vmatprep.mubr.bf16.mxu1 %v14588_v7  ;;  %7437 = vmatprep.mubr.bf16.mxu0 %v14588_v7  ;;  %v6856_v32 = vcombine.low %v5953_v19, %v5968_v1  ;;  %v12464_v15 = vrot.slane %v6854_v44, %v11475_v0  ;;  %v5977_v31 = vcombine.high %v5975_v23, %v5975_v23  ;;  %v12514_v23 = vpop.f32.mrf.mxu1 }
 0x117   : > { %v12469_v17 = vrot.slane %v6855_v8, %v11475_v0  ;;  %v12472_v16 = vrot.slane %v6857_v42, %v11475_v0  ;;  %v5991_v61 = vrot.slane %v11050_v48, %v11475_v0  ;;  %v6853_v20 = vcombine.low %v6845_v56, %v6852_v29 }
 0x118   : > { %v12476_v58 = vrot.slane %v6856_v32, %v11475_v0  ;;  %v5999_v33 = vcombine.high %v11051_v50, %v11051_v50  ;;  %v6006_v53 = vrot.slane %v11051_v50, %v11475_v0  ;;  %v6023_v55 = vcombine.high %v11052_v63, %v11052_v63  ;;  %v12526_v50 = vpop.f32.mrf.mxu0 }
 0x119   : > { %v6886_v6 = vcombine.low %v12464_v15, %v12469_v17  ;;  %v6030_v14 = vrot.slane %v11052_v63, %v11475_v0  ;;  %v6903_v25 = vcombine.low %v5977_v31, %v5991_v61  ;;  %v4648_v47 = vrot.slane %v4634_v49, %v11475_v0  ;;  %v12535_v31 = vpop.f32.mrf.mxu1 }
 0x11a   : > { %v6887_v60 = vcombine.low %v12476_v58, %v12472_v16  ;;  %v6013_v39 = vrot.slane %v5999_v33, %v11475_v0  ;;  %v4641_v27 = vrot.slane %v4633_v12, %v11475_v0  ;;  %v6037_v52 = vrot.slane %v6023_v55, %v11475_v0 }
 0x11b   : > { %v6894_v13 = vrot.slane %v6886_v6, %v11475_v0  ;;  %v12494_v37 = vrot.slane %v6903_v25, %v11475_v0  ;;  %v4682_v28 = vcombine.low %v12393_v24, %v12422_v9  ;;  %v4683_v2 = vcombine.low %v12425_v5, %v12431_v10  ;;  %v11056_v6 = vld.sshfl [vmem:[#allocation2 + $0xa4] sm:$0x1 pattern:$0x75316420] }
 0x11c   : > { %v6901_v57 = vrot.slane %v6887_v60, %v11475_v0  ;;  %v6904_v26 = vcombine.low %v6006_v53, %v6013_v39  ;;  %v11079_v43 = vcombine.high %v6006_v53, %v6013_v39  ;;  %v6906_v1 = vcombine.low %v6030_v14, %v6037_v52  ;;  %v12551_v39 = vpop.f32.mrf.mxu0 }
 0x11d   : > { %11012 = vmatmul.mubr.msk.bf16.gmra.mxu1 %vm3833_vm11, %v4600_v35  ;;  %11095 = vmatmul.mubr.msk.bf16.gmra.mxu0 %vm3833_vm11, %v6853_v20  ;;  %v6053_v4 = vrot.slane %v11053_v51, %v11475_v0  ;;  %v4649_v30 = vcombine.low %v4641_v27, %v4648_v47  ;;  %v6061_v9 = vcombine.high %v11054_v21, %v11054_v21  ;;  %v11058_v51 = vld.sshfl [vmem:[#allocation2 + $0xac] sm:$0x33 pattern:$0x75316420] }
 0x11e   : > { %5194 = vmatprep.mubr.bf16.mxu1 %v14588_v7  ;;  %7447 = vmatprep.mubr.bf16.mxu0 %v14588_v7  ;;  %v12508_v38 = vrot.slane %v6904_v26, %v11475_v0  ;;  %v12511_v56 = vrot.slane %v11079_v43, %v11475_v0  ;;  %v12517_v24 = vrot.slane %v6906_v1, %v11475_v0 }
 0x11f   : > { %v6068_v29 = vrot.slane %v11054_v21, %v11475_v0  ;;  %v6902_v19 = vcombine.low %v6894_v13, %v6901_v57  ;;  %v6092_v10 = vrot.slane %v11055_v18, %v11475_v0  ;;  %v11080_v44 = vcombine.high %v6030_v14, %v6037_v52  ;;  %v12557_v57 = vpop.f32.mrf.mxu1 }
 0x120   : > { %v6935_v5 = vcombine.low %v12494_v37, %v12508_v38  ;;  %v6936_v48 = vcombine.low %v12511_v56, %v12517_v24  ;;  %v6075_v49 = vrot.slane %v6061_v9, %v11475_v0  ;;  %v4690_v35 = vrot.slane %v4682_v28, %v11475_v0  ;;  %14794 = vst [vmem:[#allocation6_spill] sm:$0xff] %v12557_v57  ;;  %v11059_v9 = vld.sshfl [vmem:[#allocation2 + $0xb0] sm:$0x1 pattern:$0x75316420] }
 0x121   : > { %v6076_v8 = vcombine.high %v6068_v29, %v6068_v29  ;;  %v6953_v42 = vcombine.low %v6053_v4, %v6068_v29  ;;  %v4697_v12 = vrot.slane %v4683_v2, %v11475_v0  ;;  %v4731_v32 = vcombine.low %v12434_v3, %v12464_v15  ;;  %v11057_v3 = vld.sshfl [vmem:[#allocation2 + $0xa8] sm:$0x33 pattern:$0x75316420] }
 0x122   : > { %v12533_v63 = vrot.slane %v11080_v44, %v11475_v0  ;;  %v6943_v61 = vrot.slane %v6935_v5, %v11475_v0  ;;  %v6077_v20 = vcombine.high %v6075_v49, %v6075_v49  ;;  %v6950_v55 = vrot.slane %v6936_v48, %v11475_v0 }
 0x123   : > { %v6954_v33 = vcombine.low %v6075_v49, %v6076_v8  ;;  %v12539_v53 = vrot.slane %v6953_v42, %v11475_v0  ;;  %v6085_v15 = vcombine.high %v11055_v18, %v11055_v18  ;;  %v6100_v14 = vcombine.high %v6092_v10, %v6092_v10  ;;  %v12575_v49 = vpop.f32.mrf.mxu1 }
 0x124   : > { %v4732_v25 = vcombine.low %v12469_v17, %v12476_v58  ;;  %v6955_v47 = vcombine.low %v6077_v20, %v6092_v10  ;;  %v6115_v52 = vrot.slane %v11056_v6, %v11475_v0  ;;  %v4698_v26 = vcombine.low %v4690_v35, %v4697_v12  ;;  %14795 = vst [vmem:[#allocation7_spill] sm:$0xff] %v12575_v49  ;;  %v11060_v12 = vld.sshfl [vmem:[#allocation2 + $0xb4] sm:$0x33 pattern:$0x75316420] }
 0x125   : > { %11013 = vmatmul.mubr.msk.bf16.gmra.mxu1 %vm3833_vm11, %v4649_v30  ;;  %11096 = vmatmul.mubr.msk.bf16.gmra.mxu0 %vm3833_vm11, %v6902_v19  ;;  %v12549_v60 = vrot.slane %v6954_v33, %v11475_v0  ;;  %v6984_v27 = vcombine.low %v12533_v63, %v12539_v53  ;;  %v6099_v13 = vrot.slane %v6085_v15, %v11475_v0  ;;  %v12568_v19 = vpop.f32.mrf.mxu0 }
 0x126   : > { %5204 = vmatprep.mubr.bf16.mxu1 %v14588_v7  ;;  %7457 = vmatprep.mubr.bf16.mxu0 %v14588_v7  ;;  %v12560_v43 = vrot.slane %v6955_v47, %v11475_v0  ;;  %v6123_v17 = vcombine.high %v11057_v3, %v11057_v3  ;;  %v6130_v58 = vrot.slane %v11057_v3, %v11475_v0 }
 0x127   : > { %v6951_v21 = vcombine.low %v6943_v61, %v6950_v55  ;;  %v4739_v28 = vrot.slane %v4731_v32, %v11475_v0  ;;  %v6101_v1 = vcombine.high %v6099_v13, %v6099_v13  ;;  %v7001_v18 = vcombine.low %v6099_v13, %v6100_v14  ;;  %v12597_v15 = vpop.f32.mrf.mxu0 }
 0x128   : > { %v4746_v2 = vrot.slane %v4732_v25, %v11475_v0  ;;  %v6985_v4 = vcombine.low %v12549_v60, %v12560_v43  ;;  %v6137_v30 = vrot.slane %v6123_v17, %v11475_v0  ;;  %v6147_v29 = vcombine.high %v11058_v51, %v11058_v51  ;;  %v12602_v25 = vpop.f32.mrf.mxu1  ;;  %v11061_v17 = vld.sshfl [vmem:[#allocation2 + $0xb8] sm:$0x33 pattern:$0x75316420] }
 0x129   : > { %v6992_v5 = vrot.slane %v6984_v27, %v11475_v0  ;;  %v7002_v10 = vcombine.low %v6101_v1, %v6115_v52  ;;  %v12572_v44 = vrot.slane %v7001_v18, %v11475_v0  ;;  %v6154_v48 = vrot.slane %v11058_v51, %v11475_v0  ;;  %14796 = vst [vmem:[#allocation8_spill] sm:$0xff] %v12602_v25  ;;  %v12609_v1 = vpop.f32.mrf.mxu0 }
 0x12a   : > { %v6999_v8 = vrot.slane %v6985_v4, %v11475_v0  ;;  %v7003_v42 = vcombine.low %v6130_v58, %v6137_v30  ;;  %v11081_v35 = vcombine.high %v6130_v58, %v6137_v30  ;;  %v6161_v32 = vrot.slane %v6147_v29, %v11475_v0  ;;  %v11062_v4 = vld.sshfl [vmem:[#allocation2 + $0xbc] sm:$0x1 pattern:$0x75316420] }
 0x12b   : > { %v4780_v61 = vcombine.low %v12472_v16, %v12494_v37  ;;  %v12584_v20 = vrot.slane %v7002_v10, %v11475_v0  ;;  %v6177_v33 = vrot.slane %v11059_v9, %v11475_v0  ;;  %v4781_v6 = vcombine.low %v12508_v38, %v12511_v56  ;;  %v12614_v9 = vpop.f32.mrf.mxu1  ;;  %v11063_v10 = vld.sshfl [vmem:[#allocation2 + $0xc0] sm:$0x33 pattern:$0x75316420] }
 0x12c   : > { %v12592_v55 = vrot.slane %v7003_v42, %v11475_v0  ;;  %v12595_v3 = vrot.slane %v11081_v35, %v11475_v0  ;;  %v6185_v37 = vcombine.high %v11060_v12, %v11060_v12  ;;  %v6192_v14 = vrot.slane %v11060_v12, %v11475_v0  ;;  %14797 = vst [vmem:[#allocation9_spill] sm:$0xff] %v12614_v9 }
 0x12d   : > { %11014 = vmatmul.mubr.msk.bf16.gmra.mxu1 %vm3833_vm11, %v4698_v26  ;;  %11097 = vmatmul.mubr.msk.bf16.gmra.mxu0 %vm3833_vm11, %v6951_v21  ;;  %v7033_v16 = vcombine.low %v12572_v44, %v12584_v20  ;;  %v4747_v47 = vcombine.low %v4739_v28, %v4746_v2  ;;  %v7000_v27 = vcombine.low %v6992_v5, %v6999_v8 }
 0x12e   : > { %5214 = vmatprep.mubr.bf16.mxu1 %v14588_v7  ;;  %7467 = vmatprep.mubr.bf16.mxu0 %v14588_v7  ;;  %v7050_v13 = vcombine.low %v6154_v48, %v6161_v32  ;;  %v11082_v38 = vcombine.high %v6154_v48, %v6161_v32  ;;  %v7034_v56 = vcombine.low %v12592_v55, %v12595_v3 }
 0x12f   : > { %v6199_v52 = vrot.slane %v6185_v37, %v11475_v0  ;;  %v6200_v51 = vcombine.high %v6192_v14, %v6192_v14  ;;  %v7052_v26 = vcombine.low %v6177_v33, %v6192_v14  ;;  %v4788_v58 = vrot.slane %v4780_v61, %v11475_v0  ;;  %v11064_v61 = vld.sshfl [vmem:[#allocation2 + $0xc4] sm:$0x33 pattern:$0x75316420]  ;;  %v12636_v33 = vpop.f32.mrf.mxu0 }
 0x130   : > { %v4795_v21 = vrot.slane %v4781_v6, %v11475_v0  ;;  %v7041_v18 = vrot.slane %v7033_v16, %v11475_v0  ;;  %v4829_v28 = vcombine.low %v12517_v24, %v12533_v63  ;;  %v12617_v29 = vrot.slane %v7050_v13, %v11475_v0 }
 0x131   : > { %v7053_v2 = vcombine.low %v6199_v52, %v6200_v51  ;;  %v6201_v30 = vcombine.high %v6199_v52, %v6199_v52  ;;  %v12620_v5 = vrot.slane %v11082_v38, %v11475_v0  ;;  %v6209_v48 = vcombine.high %v11061_v17, %v11061_v17 }
 0x132   : > { %v6216_v8 = vrot.slane %v11061_v17, %v11475_v0  ;;  %v7048_v24 = vrot.slane %v7034_v56, %v11475_v0  ;;  %v12627_v63 = vrot.slane %v7052_v26, %v11475_v0  ;;  %v6239_v32 = vrot.slane %v11062_v4, %v11475_v0  ;;  %v11065_v17 = vld.sshfl [vmem:[#allocation2 + $0xc8] sm:$0x1 pattern:$0x75316420] }
 0x133   : > { %v12630_v42 = vrot.slane %v7053_v2, %v11475_v0  ;;  %v6223_v35 = vrot.slane %v6209_v48, %v11475_v0  ;;  %v4830_v6 = vcombine.low %v12539_v53, %v12549_v60  ;;  %v6247_v16 = vcombine.high %v11063_v10, %v11063_v10 }
 0x134   : > { %v6224_v12 = vcombine.high %v6216_v8, %v6216_v8  ;;  %v6254_v37 = vrot.slane %v11063_v10, %v11475_v0  ;;  %v7099_v14 = vcombine.low %v6201_v30, %v6216_v8  ;;  %v7082_v13 = vcombine.low %v12617_v29, %v12620_v5  ;;  %v12655_v30 = vpop.f32.mrf.mxu0 }
 0x135   : > { %11015 = vmatmul.mubr.msk.bf16.gmra.mxu1 %vm3833_vm11, %v4747_v47  ;;  %11098 = vmatmul.mubr.msk.bf16.gmra.mxu0 %vm3833_vm11, %v7000_v27  ;;  %v12641_v47 = vpop.f32.mrf.mxu1  ;;  %v4796_v27 = vcombine.low %v4788_v58, %v4795_v21  ;;  %v6225_v38 = vcombine.high %v6223_v35, %v6223_v35  ;;  %v7049_v52 = vcombine.low %v7041_v18, %v7048_v24  ;;  %v11066_v21 = vld.sshfl [vmem:[#allocation2 + $0xcc] sm:$0x33 pattern:$0x75316420] }
 0x136   : > { %5224 = vmatprep.mubr.bf16.mxu1 %v14588_v7  ;;  %7477 = vmatprep.mubr.bf16.mxu0 %v14588_v7  ;;  %14798 = vst [vmem:[#allocation10_spill] sm:$0xff] %v12641_v47  ;;  %v7100_v56 = vcombine.low %v6223_v35, %v6224_v12  ;;  %v7083_v51 = vcombine.low %v12627_v63, %v12630_v42 }
 0x137   : > { %v6261_v26 = vrot.slane %v6247_v16, %v11475_v0  ;;  %v6271_v53 = vcombine.high %v11064_v61, %v11064_v61  ;;  %v4837_v60 = vrot.slane %v4829_v28, %v11475_v0  ;;  %v7101_v2 = vcombine.low %v6225_v38, %v6239_v32  ;;  %v12660_v24 = vpop.f32.mrf.mxu1 }
 0x138   : > { %v12650_v4 = vrot.slane %v7099_v14, %v11475_v0  ;;  %v12653_v58 = vrot.slane %v7100_v56, %v11475_v0  ;;  %v4844_v18 = vrot.slane %v4830_v6, %v11475_v0  ;;  %v6278_v48 = vrot.slane %v11064_v61, %v11475_v0  ;;  %14799 = vst [vmem:[#allocation11_spill] sm:$0xff] %v12660_v24  ;;  %v12680_v14 = vpop.f32.mrf.mxu0  ;;  %v11067_v56 = vld.sshfl [vmem:[#allocation2 + $0xd0] sm:$0x33 pattern:$0x75316420] }
 0x139   : > { %v7102_v10 = vcombine.low %v6254_v37, %v6261_v26  ;;  %v6285_v8 = vrot.slane %v6271_v53, %v11475_v0  ;;  %v7090_v28 = vrot.slane %v7082_v13, %v11475_v0  ;;  %v4878_v35 = vcombine.low %v12560_v43, %v12572_v44  ;;  %v11068_v24 = vld.sshfl [vmem:[#allocation2 + $0xd4] sm:$0x1 pattern:$0x75316420] }
 0x13a   : > { %v12666_v12 = vrot.slane %v7101_v2, %v11475_v0  ;;  %v6301_v32 = vrot.slane %v11065_v17, %v11475_v0  ;;  %v7097_v61 = vrot.slane %v7083_v51, %v11475_v0  ;;  %v6316_v16 = vrot.slane %v11066_v21, %v11475_v0 }
 0x13b   : > { %v7130_v6 = vrot.slane %v7102_v10, %v11475_v0  ;;  %v4879_v43 = vcombine.low %v12584_v20, %v12592_v55  ;;  %v7131_v44 = vcombine.low %v12650_v4, %v12653_v58  ;;  %v7149_v13 = vcombine.low %v6278_v48, %v6285_v8 }
 0x13c   : > { %v11084_v38 = vcombine.high %v6278_v48, %v6285_v8  ;;  %v7151_v17 = vcombine.low %v6301_v32, %v6316_v16  ;;  %v6309_v53 = vcombine.high %v11066_v21, %v11066_v21  ;;  %v4845_v2 = vcombine.low %v4837_v60, %v4844_v18  ;;  %v12689_v48 = vpop.f32.mrf.mxu0 }
 0x13d   : > { %11016 = vmatmul.mubr.msk.bf16.gmra.mxu1 %vm3833_vm11, %v4796_v27  ;;  %11099 = vmatmul.mubr.msk.bf16.gmra.mxu0 %vm3833_vm11, %v7049_v52  ;;  %v11083_v27 = vcombine.high %v6254_v37, %v6261_v26  ;;  %v12682_v52 = vpop.f32.mrf.mxu1  ;;  %v7132_v51 = vcombine.low %v12666_v12, %v7130_v6  ;;  %v7098_v10 = vcombine.low %v7090_v28, %v7097_v61 }
 0x13e   : > { %5234 = vmatprep.mubr.bf16.mxu1 %v14588_v7  ;;  %7487 = vmatprep.mubr.bf16.mxu0 %v14588_v7  ;;  %14800 = vst [vmem:[#allocation12_spill] sm:$0xff] %v12682_v52  ;;  %v4886_v7 = vrot.slane %v4878_v35, %v11475_v0  ;;  %v4893_v20 = vrot.slane %v4879_v43, %v11475_v0 }
 0x13f   : > { %v7139_v55 = vrot.slane %v7131_v44, %v11475_v0  ;;  %v6323_v37 = vrot.slane %v6309_v53, %v11475_v0  ;;  %v6333_v26 = vcombine.high %v11067_v56, %v11067_v56  ;;  %v7158_v8 = vrot.slane %v11083_v27, %v11475_v0  ;;  %v12695_v18 = vpop.f32.mrf.mxu1 }
 0x140   : > { %v7165_v6 = vrot.slane %v7149_v13, %v11475_v0  ;;  %v7172_v21 = vrot.slane %v11084_v38, %v11475_v0  ;;  %v6340_v60 = vrot.slane %v11067_v56, %v11475_v0  ;;  %14801 = vst [vmem:[#allocation13_spill] sm:$0xff] %v12695_v18  ;;  %v7146_v28 = vrot.slane %v7132_v51, %v11475_v0  ;;  %v12705_v56 = vpop.f32.mrf.mxu0 }
 0x141   : > { %v7179_v35 = vrot.slane %v7151_v17, %v11475_v0  ;;  %v6324_v32 = vcombine.high %v6316_v16, %v6316_v16  ;;  %v6347_v61 = vrot.slane %v6333_v26, %v11475_v0  ;;  %v6325_v43 = vcombine.high %v6323_v37, %v6323_v37  ;;  %v12709_v17 = vpop.f32.mrf.mxu1 }
 0x142   : > { %v6348_v44 = vcombine.high %v6340_v60, %v6340_v60  ;;  %v6363_v27 = vrot.slane %v11068_v24, %v11475_v0  ;;  %v14802_v13 = vmov 0   ;;  %v4894_v51 = vcombine.low %v4886_v7, %v4893_v20  ;;  %14803 = vst [vmem:[#allocation14_spill] sm:$0xff] %v12709_v17 }
 0x143   : > { %v6349_v38 = vcombine.high %v6347_v61, %v6347_v61  ;;  %v4927_v16 = vcombine.low %v12595_v3, %v12617_v29  ;;  %v4928_v53 = vcombine.low %v12620_v5, %v12627_v63  ;;  %v7197_v26 = vcombine.low %v6323_v37, %v6324_v32  ;;  %v12713_v9 = vpop.f32.mrf.mxu0  ;;  %v12716_v7 = vpop.f32.mrf.mxu1 }
 0x144   : > { %v7147_v24 = vcombine.low %v7139_v55, %v7146_v28  ;;  %v7198_v18 = vcombine.low %v6325_v43, %v6340_v60  ;;  %v7199_v52 = vcombine.low %v6347_v61, %v6348_v44  ;;  %14804 = vst [vmem:[#allocation15_spill] sm:$0xff] %v12716_v7  ;;  %v4976_v60 = vcombine.low %v12630_v42, %v12650_v4 }
 0x145   : > { %11017 = vmatmul.mubr.msk.bf16.gmra.mxu1 %vm3833_vm11, %v4845_v2  ;;  %11100 = vmatmul.mubr.msk.bf16.gmra.mxu0 %vm3833_vm11, %v7098_v10  ;;  %v7180_v2 = vcombine.low %v7158_v8, %v7165_v6  ;;  %v7181_v10 = vcombine.low %v7172_v21, %v7179_v35  ;;  %v7200_v47 = vcombine.low %v6349_v38, %v6363_v27  ;;  %v12729_v8 = vpop.f32.mrf.mxu0 }
 0x146   : > { %5244 = vmatprep.mubr.bf16.mxu1 %v14802_v13  ;;  %7497 = vmatprep.mubr.bf16.mxu0 %v14802_v13  ;;  %v4935_v25 = vrot.slane %v4927_v16, %v11475_v0  ;;  %v4942_v3 = vrot.slane %v4928_v53, %v11475_v0  ;;  %v7207_v5 = vrot.slane %v7197_v26, %v11475_v0  ;;  %v12731_v6 = vpop.f32.mrf.mxu1 }
 0x147   : > { %v7188_v29 = vrot.slane %v7180_v2, %v11475_v0  ;;  %v7195_v20 = vrot.slane %v7181_v10, %v11475_v0  ;;  %v7214_v63 = vrot.slane %v7198_v18, %v11475_v0  ;;  %v7221_v55 = vrot.slane %v7199_v52, %v11475_v0  ;;  %14805 = vst [vmem:[#allocation16_spill] sm:$0xff] %v12731_v6  ;;  %v12737_v32 = vpop.f32.mrf.mxu0 }
 0x148   : > { %v7228_v37 = vrot.slane %v7200_v47, %v11475_v0  ;;  %v4943_v21 = vcombine.low %v4935_v25, %v4942_v3  ;;  %v4977_v18 = vcombine.low %v12653_v58, %v12666_v12  ;;  %v12739_v47 = vpop.f32.mrf.mxu1  ;;  %v4984_v61 = vrot.slane %v4976_v60, %v11475_v0 }
 0x149   : > { %v7196_v28 = vcombine.low %v7188_v29, %v7195_v20  ;;  %v7229_v35 = vcombine.low %v7207_v5, %v7214_v63  ;;  %14806 = vst [vmem:[#allocation17_spill] sm:$0xff] %v12739_v47  ;;  %v12749_v58 = vpop.f32.mrf.mxu0 }
 0x14a   : > { %v7230_v52 = vcombine.low %v7221_v55, %v7228_v37  ;;  %v4991_v25 = vrot.slane %v4977_v18, %v11475_v0  ;;  %v12751_v12 = vpop.f32.mrf.mxu1 }
 0x14b   : > { %v7237_v42 = vrot.slane %v7229_v35, %v11475_v0  ;;  %14807 = vst [vmem:[#allocation18_spill] sm:$0xff] %v12751_v12 }
 0x14c   : > { %v7244_v4 = vrot.slane %v7230_v52, %v11475_v0  ;;  %v4992_v43 = vcombine.low %v4984_v61, %v4991_v25  ;;  %v12755_v38 = vpop.f32.mrf.mxu1 }
 0x14d   : > { %11018 = vmatmul.mubr.msk.bf16.gmra.mxu1 %vm3833_vm11, %v4894_v51  ;;  %11101 = vmatmul.mubr.msk.bf16.gmra.mxu0 %vm3833_vm11, %v7147_v24  ;;  %14808 = vst [vmem:[#allocation19_spill] sm:$0xff] %v12755_v38 }
 0x14e   : > { %5254 = vmatprep.mubr.bf16.mxu1 %v14802_v13  ;;  %7507 = vmatprep.mubr.bf16.mxu0 %v14802_v13  ;;  %v7245_v44 = vcombine.low %v7237_v42, %v7244_v4 }
 0x14f   : > { %v12753_v27 = vpop.f32.mrf.mxu0 }
 0x151   : > { %v12759_v51 = vpop.f32.mrf.mxu0 }
 0x153   : > { %v12763_v16 = vpop.f32.mrf.mxu0 }
 0x155   : > { %11019 = vmatmul.mubr.msk.bf16.gmra.mxu1 %vm3833_vm11, %v4943_v21  ;;  %11102 = vmatmul.mubr.msk.bf16.gmra.mxu0 %vm3833_vm11, %v7196_v28  ;;  %v12767_v53 = vpop.f32.mrf.mxu0 }
 0x156   : > { %5264 = vmatprep.mubr.bf16.mxu1 %v14802_v13  ;;  %7517 = vmatprep.mubr.bf16.mxu0 %v14802_v13  ;;  %v12761_v0 = vpop.f32.mrf.mxu1 }
 0x157   : > { %14809 = vst [vmem:[#allocation20_spill] sm:$0xff] %v12761_v0 }
 0x158   : > { %v12765_v13 = vpop.f32.mrf.mxu1 }
 0x159   : > { %14810 = vst [vmem:[#allocation21_spill] sm:$0xff] %v12765_v13 }
 0x15a   : > { %v12769_v2 = vpop.f32.mrf.mxu1 }
 0x15b   : > { %14811 = vst [vmem:[#allocation22_spill] sm:$0xff] %v12769_v2 }
 0x15c   : > { %v12773_v26 = vpop.f32.mrf.mxu1 }
 0x15d   : > { %11020 = vmatmul.mubr.msk.bf16.gmra.mxu1 %vm3833_vm11, %v4992_v43  ;;  %11103 = vmatmul.mubr.msk.bf16.gmra.mxu0 %vm3833_vm11, %v7245_v44  ;;  %14812 = vst [vmem:[#allocation23_spill] sm:$0xff] %v12773_v26 }
 0x168   : > { %v12771_v10 = vpop.f32.mrf.mxu0 }
 0x16a   : > { %v12775_v24 = vpop.f32.mrf.mxu0 }
 0x16c   : > { %v12781_v20 = vpop.f32.mrf.mxu0 }
 0x16e   : > { %v12785_v63 = vpop.f32.mrf.mxu0 }
 0x16f   : > { %v12777_v3 = vpop.f32.mrf.mxu1 }
 0x170   : > { %14813 = vst [vmem:[#allocation24_spill] sm:$0xff] %v12777_v3 }
 0x171   : > { %v12779_v29 = vpop.f32.mrf.mxu1 }
 0x172   : > { %14814 = vst [vmem:[#allocation25_spill] sm:$0xff] %v12779_v29  ;;  %v12789_v37 = vpop.f32.mrf.mxu0 }
 0x173   : > { %v12783_v5 = vpop.f32.mrf.mxu1 }
 0x174   : > { %14815 = vst [vmem:[#allocation26_spill] sm:$0xff] %v12783_v5  ;;  %v12793_v60 = vpop.f32.mrf.mxu0 }
 0x175   : > { %v12787_v55 = vpop.f32.mrf.mxu1 }
 0x176   : > { %14816 = vst [vmem:[#allocation27_spill] sm:$0xff] %v12787_v55  ;;  %v12797_v18 = vpop.f32.mrf.mxu0 }
 0x178   : > { %v12801_v52 = vpop.f32.mrf.mxu0 }
 0x17e   : > { %v12791_v21 = vpop.f32.mrf.mxu1 }
 0x17f   : > { %14817 = vst [vmem:[#allocation28_spill] sm:$0xff] %v12791_v21 }
 0x180   : > { %v12795_v28 = vpop.f32.mrf.mxu1 }
 0x181   : > { %14818 = vst [vmem:[#allocation29_spill] sm:$0xff] %v12795_v28 }
 0x182   : > { %v12799_v35 = vpop.f32.mrf.mxu1 }
 0x183   : > { %14819 = vst [vmem:[#allocation30_spill] sm:$0xff] %v12799_v35  ;;  %v11305_v35 = vmov 1983009808  }
 0x184   : > { %v12803_v61 = vpop.f32.mrf.mxu1  ;;  %v7675_v5 = vunpack.c.l.s4 %v11305_v35 }
 0x185   : > { %14820 = vst [vmem:[#allocation31_spill] sm:$0xff] %v12803_v61 }
 0x186   : > { %v7676_v2 = vunpack.c.0.s8 %v7675_v5 }
 0x18a   : > { %v12805_v25 = vpop.f32.mrf.mxu0 }
 0x18c   : > { %v12807_v42 = vpop.f32.mrf.mxu0 }
 0x18d   : > { %v12809_v4 = vpop.f32.mrf.mxu1 }
 0x18e   : > { %14821 = vst [vmem:[#allocation32_spill] sm:$0xff] %v12809_v4  ;;  %v12811_v43 = vpop.f32.mrf.mxu0 }
 0x18f   : > { %v12813_v44 = vpop.f32.mrf.mxu1 }
 0x190   : > { %14822 = vst [vmem:[#allocation33_spill] sm:$0xff] %v12813_v44  ;;  %v12815_v21 = vpop.f32.mrf.mxu0 }
 0x191   : > { %v12817_v28 = vpop.f32.mrf.mxu1 }
 0x192   : > { %14823 = vst [vmem:[#allocation34_spill] sm:$0xff] %v12817_v28  ;;  %v7349_v55 = vpop.f32.mrf.mxu0  ;;  %v12824_v28 = vsub.s32 %v7676_v2, %v11450_v41 }
 0x193   : > { %v12819_v29 = vpop.f32.mrf.mxu1 }
 0x194   : > { %14824 = vst [vmem:[#allocation35_spill] sm:$0xff] %v12819_v29  ;;  %v7351_v61 = vpop.f32.mrf.mxu0 }
 0x195   : > { %v5096_v3 = vpop.f32.mrf.mxu1 }
 0x196   : > { %v5097_v26 = vadd.f32 %v5096_v3, %v12405_v46  ;;  %v7353_v13 = vpop.f32.mrf.mxu0 }
 0x197   : > { %v5098_v4 = vpop.f32.mrf.mxu1 }
 0x198   : > { %v5099_v0 = vadd.f32 %v5098_v4, %v12419_v54  ;;  %v7528_v38 = vadd.f32 %v7349_v55, %v5097_v26  ;;  %v7355_v47 = vpop.f32.mrf.mxu0  ;;  %v12832_v54 = vld [vmem:[%s14586_s2] ss:$0 sm:$0xff] }
 0x199   : > { %v5100_v44 = vpop.f32.mrf.mxu1 }
 0x19a   : > { %v7529_v12 = vadd.f32 %v7351_v61, %v5099_v0  ;;  %v5101_v35 = vadd.f32 %v5100_v44, %v12443_v22 }
 0x19b   : > { %v5102_v29 = vpop.f32.mrf.mxu1 }
 0x19c   : > { %v7672_v46 = vcombine.low %v7528_v38, %v7529_v12  ;;  %v7673_v3 = vcombine.high %v7528_v38, %v7529_v12  ;;  %v5103_v5 = vadd.f32 %v5102_v29, %v12460_v62  ;;  %v7359_v6 = vpop.f32.mrf.mxu0  ;;  %v7530_v0 = vadd.f32 %v7353_v13, %v5101_v35 }
 0x19d   : > { %v5106_v41 = vpop.f32.mrf.mxu1 }
 0x19e   : > { %v12835_v2 = vrot.slane %v7672_v46, %v12824_v28  ;;  %v12838_v22 = vrot.slane %v7673_v3, %v12824_v28  ;;  %v7531_v26 = vadd.f32 %v7355_v47, %v5103_v5  ;;  %v5107_v55 = vadd.f32 %v5106_v41, %v12482_v36  ;;  %v7361_v12 = vpop.f32.mrf.mxu0 }
 0x19f   : > { %v5108_v62 = vpop.f32.mrf.mxu1  ;;  %v12855_v3 = vrot.slane %v12832_v54, %v12824_v28 }
 0x1a0   : > { %14825 = vst [vmem:[#allocation36_spill] sm:$0xff] %v12835_v2  ;;  %14826 = vst [vmem:[#allocation37_spill] sm:$0xff] %v12838_v22  ;;  %v12845_v13 = vcombine.high %v12835_v2, %v12835_v2  ;;  %v7690_v29 = vcombine.low %v7530_v0, %v7531_v26  ;;  %v7691_v61 = vcombine.high %v7530_v0, %v7531_v26  ;;  %v7363_v44 = vpop.f32.mrf.mxu0  ;;  %v8459_v46 = vrot.slane %v12838_v22, 7 }
 0x1a1   : > { %v5109_v4 = vadd.f32 %v5108_v62, %v12503_v34  ;;  %v7532_v35 = vadd.f32 %v7359_v6, %v5107_v55  ;;  %v5110_v47 = vpop.f32.mrf.mxu1  ;;  %v12850_v36 = vcombine.high %v12838_v22, %v12838_v22  ;;  %14829 = vst [vmem:[#allocation40_spill] sm:$0xff] %v12855_v3  ;;  %v11104_v41 = vrot.slane %v12835_v2, 9 }
 0x1a2   : > { %14827 = vst [vmem:[#allocation38_spill] sm:$0xff] %v12845_v13  ;;  %v12862_v0 = vrot.slane %v7690_v29, %v12824_v28  ;;  %v5111_v34 = vadd.f32 %v5110_v47, %v12526_v50  ;;  %v7365_v26 = vpop.f32.mrf.mxu0  ;;  %v12867_v55 = vrot.slane %v7691_v61, %v12824_v28  ;;  %v8461_v38 = vrot.slane %v8459_v46, 2 }
 0x1a3   : > { %14828 = vst [vmem:[#allocation39_spill] sm:$0xff] %v12850_v36  ;;  %v7533_v6 = vadd.f32 %v7361_v12, %v5109_v4  ;;  %v5112_v62 = vpop.f32.mrf.mxu1  ;;  %v8462_v3 = vrot.slane %v12850_v36, 7  ;;  %v8456_v22 = vrot.slane %v12845_v13, 7 }
 0x1a4   : > { %v12873_v7 = vcombine.high %v12862_v0, %v12862_v0  ;;  %v5113_v50 = vadd.f32 %v5112_v62, %v12551_v39  ;;  %v7534_v12 = vadd.f32 %v7363_v44, %v5111_v34 }
 0x1a5   : > { %v7708_v29 = vcombine.low %v7532_v35, %v7533_v6  ;;  %v7709_v17 = vcombine.high %v7532_v35, %v7533_v6  ;;  %v8463_v4 = vsel %vm12857_vm1, %v8461_v38, %v8462_v3  ;;  %v8457_v61 = vsel %vm12857_vm1, %v11104_v41, %v8456_v22  ;;  %v5116_v47 = vpop.f32.mrf.mxu1  ;;  %v7369_v2 = vpop.f32.mrf.mxu0 }
 0x1a6   : > { %14832 = vst [vmem:[#allocation41_spill] sm:$0xff] %v12873_v7  ;;  %v8458_v49 = vrot.slane %v8456_v22, 2  ;;  %8858 = vrot.lane.b32.xlu1 %v8463_v4, %s11306_s10  ;;  %8854 = vrot.lane.b32.xlu0 %v8457_v61, %s11306_s10  ;;  %v5117_v39 = vadd.f32 %v5116_v47, %v12568_v19  ;;  %v8464_v38 = vrot.slane %v8462_v3, 2  ;;  %v7535_v44 = vadd.f32 %v7365_v26, %v5113_v50 }
 0x1a7   : > { %v12881_v13 = vrot.slane %v7708_v29, %v12824_v28  ;;  %v12884_v57 = vrot.slane %v7709_v17, %v12824_v28  ;;  %v5118_v35 = vpop.f32.mrf.mxu1  ;;  %v8465_v22 = vrot.slane %v12862_v0, 7  ;;  %v7371_v6 = vpop.f32.mrf.mxu0  ;;  %v8468_v41 = vrot.slane %v12873_v7, 7 }
 0x1a8   : > { %v8460_v34 = vsel %vm12857_vm1, %v8458_v49, %v8459_v46  ;;  %v5119_v17 = vadd.f32 %v5118_v35, %v12597_v15  ;;  %v7536_v62 = vadd.f32 %v7369_v2, %v5117_v39  ;;  %v8471_v29 = vrot.slane %v12867_v55, 7 }
 0x1a9   : > { %14833 = vst [vmem:[#allocation42_spill] sm:$0xff] %v12881_v13  ;;  %14834 = vst [vmem:[#allocation43_spill] sm:$0xff] %v12884_v57  ;;  %v12897_v4 = vcombine.high %v12867_v55, %v12867_v55  ;;  %v7726_v19 = vcombine.low %v7534_v12, %v7535_v44  ;;  %v7727_v3 = vcombine.high %v7534_v12, %v7535_v44  ;;  %v5120_v49 = vpop.f32.mrf.mxu1  ;;  %v7373_v46 = vpop.f32.mrf.mxu0  ;;  %v8470_v50 = vrot.slane %v8468_v41, 2 }
 0x1aa   : > { %v8466_v26 = vsel %vm12857_vm1, %v8464_v38, %v8465_v22  ;;  %8856 = vrot.lane.b32.xlu0 %v8460_v34, %s11306_s10  ;;  %v5121_v15 = vadd.f32 %v5120_v49, %v12609_v1  ;;  %v7537_v2 = vadd.f32 %v7371_v6, %v5119_v17  ;;  %v8467_v61 = vrot.slane %v8465_v22, 2 }
 0x1ab   : > { %14835 = vst [vmem:[#allocation44_spill] sm:$0xff] %v12897_v4  ;;  %8860 = vrot.lane.b32.xlu1 %v8466_v26, %s11306_s10  ;;  %v8473_v47 = vrot.slane %v8471_v29, 2  ;;  %v12905_v39 = vrot.slane %v7726_v19, %v12824_v28  ;;  %v5122_v35 = vpop.f32.mrf.mxu1  ;;  %v7375_v12 = vpop.f32.mrf.mxu0  ;;  %v8474_v44 = vrot.slane %v12897_v4, 7  ;;  %v14837_v34 = vcombine.high %v12832_v54, %v12832_v54 }
 0x1ac   : > { %v12916_v1 = vrot.slane %v7727_v3, %v12824_v28  ;;  %v7745_v22 = vcombine.high %v7536_v62, %v7537_v2  ;;  %v5123_v6 = vadd.f32 %v5122_v35, %v12636_v33  ;;  %v8472_v17 = vsel %vm12857_vm1, %v8470_v50, %v8471_v29 }
 0x1ad   : > { %14836 = vst [vmem:[#allocation45_spill] sm:$0xff] %v12905_v39  ;;  %v12913_v7 = vrot.slane %v14837_v34, %v12824_v28  ;;  %v7744_v19 = vcombine.low %v7536_v62, %v7537_v2  ;;  %v8469_v26 = vsel %vm12857_vm1, %v8467_v61, %v8468_v41  ;;  %v5126_v49 = vpop.f32.mrf.mxu1  ;;  %v7379_v38 = vpop.f32.mrf.mxu0  ;;  %v8476_v4 = vrot.slane %v8474_v44, 2 }
 0x1ae   : > { %14838 = vst [vmem:[#allocation46_spill] sm:$0xff] %v12916_v1  ;;  %v8477_v54 = vrot.slane %v12881_v13, 7  ;;  %v7538_v34 = vadd.f32 %v7373_v46, %v5121_v15  ;;  %8862 = vrot.lane.b32.xlu0 %v8469_v26, %s11306_s10  ;;  %v5127_v3 = vadd.f32 %v5126_v49, %v12655_v30  ;;  %v8475_v33 = vsel %vm12857_vm1, %v8473_v47, %v8474_v44 }
 0x1af   : > { %8864 = vrot.lane.b32.xlu1 %v8472_v17, %s11306_s10  ;;  %v8481_v62 = vrot.slane %v12884_v57, 7  ;;  %v12931_v29 = vrot.slane %v7745_v22, %v12824_v28  ;;  %v7539_v41 = vadd.f32 %v7375_v12, %v5123_v6  ;;  %v5128_v50 = vpop.f32.mrf.mxu1  ;;  %v7381_v2 = vpop.f32.mrf.mxu0  ;;  %v12935_v46 = vcombine.high %v12884_v57, %v12884_v57 }
 0x1b0   : > { %v12939_v15 = vcombine.high %v12881_v13, %v12881_v13  ;;  %v5129_v30 = vadd.f32 %v5128_v50, %v12680_v14  ;;  %v7540_v61 = vadd.f32 %v7379_v38, %v5127_v3  ;;  %v8478_v47 = vsel %vm12857_vm1, %v8476_v4, %v8477_v54 }
 0x1b1   : > { %14839 = vst [vmem:[#allocation47_spill] sm:$0xff] %v12935_v46  ;;  %v8483_v35 = vrot.slane %v8481_v62, 2  ;;  %v7762_v44 = vcombine.low %v7538_v34, %v7539_v41  ;;  %v7763_v22 = vcombine.high %v7538_v34, %v7539_v41  ;;  %v5130_v12 = vpop.f32.mrf.mxu1  ;;  %v7383_v6 = vpop.f32.mrf.mxu0  ;;  %v8484_v17 = vrot.slane %v12935_v46, 7 }
 0x1b2   : > { %14840 = vst [vmem:[#allocation48_spill] sm:$0xff] %v12939_v15  ;;  %v11105_v26 = vrot.slane %v12939_v15, 9  ;;  %8866 = vrot.lane.b32.xlu0 %v8475_v33, %s11306_s10  ;;  %v5131_v49 = vadd.f32 %v5130_v12, %v12689_v48  ;;  %v7541_v57 = vadd.f32 %v7381_v2, %v5129_v30  ;;  %v12951_v14 = vcombine.high %v12905_v39, %v12905_v39 }
 0x1b3   : > { %8868 = vrot.lane.b32.xlu1 %v8478_v47, %s11306_s10  ;;  %v8487_v4 = vrot.slane %v12905_v39, 7  ;;  %v12955_v38 = vrot.slane %v7744_v19, %v12824_v28  ;;  %v12959_v54 = vcombine.high %v12931_v29, %v12931_v29  ;;  %v12962_v34 = vrot.slane %v7762_v44, %v12824_v28  ;;  %v5132_v3 = vpop.f32.mrf.mxu1  ;;  %v7385_v33 = vpop.f32.mrf.mxu0 }
 0x1b4   : > { %14841 = vst [vmem:[#allocation49_spill] sm:$0xff] %v12951_v14  ;;  %v12965_v48 = vrot.slane %v7763_v22, %v12824_v28  ;;  %v7780_v41 = vcombine.low %v7540_v61, %v7541_v57  ;;  %v7781_v50 = vcombine.high %v7540_v61, %v7541_v57  ;;  %v5133_v2 = vadd.f32 %v5132_v3, %v12705_v56 }
 0x1b5   : > { %14842 = vst [vmem:[#allocation50_spill] sm:$0xff] %v12955_v38  ;;  %v8485_v19 = vsel %vm12857_vm1, %v8483_v35, %v8484_v17  ;;  %v7542_v30 = vadd.f32 %v7383_v6, %v5131_v49  ;;  %v5136_v47 = vpop.f32.mrf.mxu1  ;;  %v8482_v12 = vsel %vm12857_vm1, %v11105_v26, %v8481_v62  ;;  %v7389_v39 = vpop.f32.mrf.mxu0  ;;  %v8489_v44 = vrot.slane %v8487_v4, 2 }
 0x1b6   : > { %14843 = vst [vmem:[#allocation51_spill] sm:$0xff] %v12965_v48  ;;  %v8490_v15 = vrot.slane %v12951_v14, 7  ;;  %v12975_v22 = vcombine.high %v12962_v34, %v12962_v34  ;;  %v12978_v57 = vrot.slane %v7780_v41, %v12824_v28  ;;  %v5137_v56 = vadd.f32 %v5136_v47, %v12713_v9  ;;  %8870 = vrot.lane.b32.xlu0 %v8482_v12, %s11306_s10 }
 0x1b7   : > { %v7543_v61 = vadd.f32 %v7385_v33, %v5133_v2  ;;  %8872 = vrot.lane.b32.xlu1 %v8485_v19, %s11306_s10  ;;  %v12984_v35 = vcombine.high %v12965_v48, %v12965_v48  ;;  %v5138_v62 = vpop.f32.mrf.mxu1  ;;  %v7391_v6 = vpop.f32.mrf.mxu0  ;;  %v8486_v26 = vrot.slane %v8484_v17, 2  ;;  %v12989_v49 = vcombine.high %v12916_v1, %v12916_v1 }
 0x1b8   : > { %14844 = vst [vmem:[#allocation52_spill] sm:$0xff] %v12975_v22  ;;  %14845 = vst [vmem:[#allocation53_spill] sm:$0xff] %v12978_v57  ;;  %v8493_v3 = vrot.slane %v12916_v1, 7  ;;  %v12993_v9 = vrot.slane %v7781_v50, %v12824_v28  ;;  %v5139_v2 = vadd.f32 %v5138_v62, %v12729_v8  ;;  %v12998_v19 = vcombine.high %v12978_v57, %v12978_v57 }
 0x1b9   : > { %14846 = vst [vmem:[#allocation54_spill] sm:$0xff] %v12984_v35  ;;  %14847 = vst [vmem:[#allocation55_spill] sm:$0xff] %v12989_v49  ;;  %v7798_v33 = vcombine.low %v7542_v30, %v7543_v61  ;;  %v7799_v41 = vcombine.high %v7542_v30, %v7543_v61  ;;  %v5140_v47 = vpop.f32.mrf.mxu1  ;;  %v8491_v17 = vsel %vm12857_vm1, %v8489_v44, %v8490_v15  ;;  %v7393_v12 = vpop.f32.mrf.mxu0  ;;  %v8496_v46 = vrot.slane %v12989_v49, 7 }
 0x1ba   : > { %14848 = vst [vmem:[#allocation56_spill] sm:$0xff] %v12993_v9  ;;  %14849 = vst [vmem:[#allocation57_spill] sm:$0xff] %v12998_v19  ;;  %v8495_v14 = vrot.slane %v8493_v3, 2  ;;  %v7544_v1 = vadd.f32 %v7389_v39, %v5137_v56  ;;  %v5141_v50 = vadd.f32 %v5140_v47, %v12737_v32  ;;  %v7545_v13 = vadd.f32 %v7391_v6, %v5139_v2 }
 0x1bb   : > { %8876 = vrot.lane.b32.xlu1 %v8491_v17, %s11306_s10  ;;  %v8488_v8 = vsel %vm12857_vm1, %v8486_v26, %v8487_v4  ;;  %v13008_v30 = vrot.slane %v7798_v33, %v12824_v28  ;;  %v5142_v61 = vpop.f32.mrf.mxu1  ;;  %v7395_v44 = vpop.f32.mrf.mxu0  ;;  %v8492_v62 = vrot.slane %v8490_v15, 2  ;;  %v13013_v49 = vcombine.high %v12955_v38, %v12955_v38 }
 0x1bc   : > { %8874 = vrot.lane.b32.xlu0 %v8488_v8, %s11306_s10  ;;  %v8499_v32 = vrot.slane %v12955_v38, 7  ;;  %v13017_v39 = vrot.slane %v7799_v41, %v12824_v28  ;;  %v7816_v56 = vcombine.low %v7544_v1, %v7545_v13  ;;  %v5143_v4 = vadd.f32 %v5142_v61, %v12749_v58 }
 0x1bd   : > { %14850 = vst [vmem:[#allocation58_spill] sm:$0xff] %v13008_v30  ;;  %v8497_v6 = vsel %vm12857_vm1, %v8495_v14, %v8496_v46  ;;  %v7817_v26 = vcombine.high %v7544_v1, %v7545_v13  ;;  %v5146_v33 = vpop.f32.mrf.mxu1  ;;  %v7399_v2 = vpop.f32.mrf.mxu0  ;;  %v8502_v15 = vrot.slane %v13013_v49, 7  ;;  %v8498_v17 = vrot.slane %v8496_v46, 2 }
 0x1be   : > { %14851 = vst [vmem:[#allocation59_spill] sm:$0xff] %v13017_v39  ;;  %v8501_v47 = vrot.slane %v8499_v32, 2  ;;  %v7546_v8 = vadd.f32 %v7393_v12, %v5141_v50  ;;  %v5147_v36 = vadd.f32 %v5146_v33, %v12753_v27  ;;  %v7547_v38 = vadd.f32 %v7395_v44, %v5143_v4 }
 0x1bf   : > { %8880 = vrot.lane.b32.xlu1 %v8497_v6, %s11306_s10  ;;  %v8494_v41 = vsel %vm12857_vm1, %v8492_v62, %v8493_v3  ;;  %v13028_v58 = vrot.slane %v7816_v56, %v12824_v28  ;;  %v5148_v13 = vpop.f32.mrf.mxu1  ;;  %v7401_v1 = vpop.f32.mrf.mxu0  ;;  %v8506_v46 = vrot.slane %v12959_v54, 7  ;;  %v8509_v27 = vrot.slane %v12962_v34, 7 }
 0x1c0   : > { %8878 = vrot.lane.b32.xlu0 %v8494_v41, %s11306_s10  ;;  %v8503_v14 = vsel %vm12857_vm1, %v8501_v47, %v8502_v15  ;;  %v7834_v12 = vcombine.low %v7546_v8, %v7547_v38  ;;  %v7835_v50 = vcombine.high %v7546_v8, %v7547_v38  ;;  %v5149_v61 = vadd.f32 %v5148_v13, %v12759_v51 }
 0x1c1   : > { %14852 = vst [vmem:[#allocation60_spill] sm:$0xff] %v13028_v58  ;;  %v8500_v3 = vsel %vm12857_vm1, %v8498_v17, %v8499_v32  ;;  %v7548_v44 = vadd.f32 %v7399_v2, %v5147_v36  ;;  %v5150_v62 = vpop.f32.mrf.mxu1  ;;  %v7403_v56 = vpop.f32.mrf.mxu0  ;;  %v8508_v4 = vrot.slane %v8506_v46, 2  ;;  %v11106_v6 = vrot.slane %v12931_v29, 9 }
 0x1c2   : > { %v8512_v33 = vrot.slane %v12975_v22, 7  ;;  %v13041_v47 = vrot.slane %v7834_v12, %v12824_v28  ;;  %v13044_v15 = vrot.slane %v7835_v50, %v12824_v28  ;;  %v5151_v38 = vadd.f32 %v5150_v62, %v12763_v16 }
 0x1c3   : > { %v7549_v51 = vadd.f32 %v7401_v1, %v5149_v61  ;;  %8884 = vrot.lane.b32.xlu1 %v8503_v14, %s11306_s10  ;;  %v13049_v36 = vrot.slane %v7817_v26, %v12824_v28  ;;  %v5152_v32 = vpop.f32.mrf.mxu1  ;;  %v7405_v2 = vpop.f32.mrf.mxu0  ;;  %v8510_v17 = vsel %vm12857_vm1, %v8508_v4, %v8509_v27  ;;  %v8507_v8 = vsel %vm12857_vm1, %v11106_v6, %v8506_v46 }
 0x1c4   : > { %14853 = vst [vmem:[#allocation61_spill] sm:$0xff] %v13041_v47  ;;  %14854 = vst [vmem:[#allocation62_spill] sm:$0xff] %v13044_v15  ;;  %8882 = vrot.lane.b32.xlu0 %v8500_v3, %s11306_s10  ;;  %v8515_v41 = vrot.slane %v12965_v48, 7  ;;  %v8514_v1 = vrot.slane %v8512_v33, 2  ;;  %v8511_v12 = vrot.slane %v8509_v27, 2  ;;  %v13059_v26 = vcombine.high %v13041_v47, %v13041_v47 }
 0x1c5   : > { %14855 = vst [vmem:[#allocation63_spill] sm:$0xff] %v13049_v36  ;;  %v7852_v13 = vcombine.low %v7548_v44, %v7549_v51  ;;  %v7853_v16 = vcombine.high %v7548_v44, %v7549_v51  ;;  %v13063_v14 = vcombine.high %v13044_v15, %v13044_v15  ;;  %v5153_v50 = vadd.f32 %v5152_v32, %v12767_v53  ;;  %v5156_v3 = vpop.f32.mrf.mxu1  ;;  %v7409_v62 = vpop.f32.mrf.mxu0 }
 0x1c6   : > { %14856 = vst [vmem:[#allocation64_spill] sm:$0xff] %v13059_v26  ;;  %v7550_v61 = vadd.f32 %v7403_v56, %v5151_v38  ;;  %v5157_v27 = vadd.f32 %v5156_v3, %v12771_v10  ;;  %v8518_v4 = vrot.slane %v12984_v35, 7  ;;  %v8521_v56 = vrot.slane %v12978_v57, 7 }
 0x1c7   : > { %14857 = vst [vmem:[#allocation65_spill] sm:$0xff] %v13063_v14  ;;  %v13067_v46 = vrot.slane %v7852_v13, %v12824_v28  ;;  %v13070_v44 = vrot.slane %v7853_v16, %v12824_v28  ;;  %8888 = vrot.lane.b32.xlu1 %v8510_v17, %s11306_s10  ;;  %v7551_v6 = vadd.f32 %v7405_v2, %v5153_v50  ;;  %v5158_v51 = vpop.f32.mrf.mxu1  ;;  %v7411_v53 = vpop.f32.mrf.mxu0  ;;  %v8517_v38 = vrot.slane %v8515_v41, 2 }
 0x1c8   : > { %8886 = vrot.lane.b32.xlu0 %v8507_v8, %s11306_s10  ;;  %v8524_v32 = vrot.slane %v12998_v19, 7  ;;  %v5159_v10 = vadd.f32 %v5158_v51, %v12775_v24  ;;  %v8516_v17 = vsel %vm12857_vm1, %v8514_v1, %v8515_v41  ;;  %v8513_v2 = vsel %vm12857_vm1, %v8511_v12, %v8512_v33 }
 0x1c9   : > { %14858 = vst [vmem:[#allocation66_spill] sm:$0xff] %v13067_v46  ;;  %14859 = vst [vmem:[#allocation67_spill] sm:$0xff] %v13070_v44  ;;  %v13080_v13 = vcombine.high %v13067_v46, %v13067_v46  ;;  %v13089_v8 = vcombine.high %v13070_v44, %v13070_v44  ;;  %v7870_v16 = vcombine.low %v7550_v61, %v7551_v6  ;;  %v5160_v3 = vpop.f32.mrf.mxu1  ;;  %v7413_v19 = vpop.f32.mrf.mxu0  ;;  %v8520_v35 = vrot.slane %v8518_v4, 2 }
 0x1ca   : > { %v7871_v50 = vcombine.high %v7550_v61, %v7551_v6  ;;  %v7552_v57 = vadd.f32 %v7409_v62, %v5157_v27  ;;  %v5161_v22 = vadd.f32 %v5160_v3, %v12781_v20  ;;  %v7553_v48 = vadd.f32 %v7411_v53, %v5159_v10 }
 0x1cb   : > { %14860 = vst [vmem:[#allocation68_spill] sm:$0xff] %v13080_v13  ;;  %14861 = vst [vmem:[#allocation69_spill] sm:$0xff] %v13089_v8  ;;  %8892 = vrot.lane.b32.xlu1 %v8516_v17, %s11306_s10  ;;  %v8526_v24 = vrot.slane %v8524_v32, 2  ;;  %v13094_v41 = vrot.slane %v7870_v16, %v12824_v28  ;;  %v5162_v33 = vpop.f32.mrf.mxu1  ;;  %v7415_v1 = vpop.f32.mrf.mxu0  ;;  %v8519_v12 = vsel %vm12857_vm1, %v8517_v38, %v8518_v4  ;;  %v8527_v61 = vrot.slane %v12993_v9, 7 }
 0x1cc   : > { %8890 = vrot.lane.b32.xlu0 %v8513_v2, %s11306_s10  ;;  %v8523_v6 = vrot.slane %v8521_v56, 2  ;;  %v13101_v62 = vrot.slane %v7871_v50, %v12824_v28  ;;  %v7888_v20 = vcombine.low %v7552_v57, %v7553_v48  ;;  %v5163_v27 = vadd.f32 %v5162_v33, %v12785_v63 }
 0x1cd   : > { %14862 = vst [vmem:[#allocation70_spill] sm:$0xff] %v13094_v41  ;;  %v8522_v51 = vsel %vm12857_vm1, %v8520_v35, %v8521_v56  ;;  %v7889_v53 = vcombine.high %v7552_v57, %v7553_v48  ;;  %v7554_v10 = vadd.f32 %v7413_v19, %v5161_v22  ;;  %v5166_v17 = vpop.f32.mrf.mxu1  ;;  %v7419_v2 = vpop.f32.mrf.mxu0  ;;  %v13108_v16 = vcombine.high %v13008_v30, %v13008_v30 }
 0x1ce   : > { %14863 = vst [vmem:[#allocation71_spill] sm:$0xff] %v13101_v62  ;;  %v8531_v4 = vrot.slane %v13008_v30, 7  ;;  %v5167_v38 = vadd.f32 %v5166_v17, %v12789_v37  ;;  %v7555_v50 = vadd.f32 %v7415_v1, %v5163_v27  ;;  %v8528_v63 = vsel %vm12857_vm1, %v8526_v24, %v8527_v61 }
 0x1cf   : > { %14864 = vst [vmem:[#allocation72_spill] sm:$0xff] %v13108_v16  ;;  %8896 = vrot.lane.b32.xlu1 %v8522_v51, %s11306_s10  ;;  %v8525_v48 = vsel %vm12857_vm1, %v8523_v6, %v8524_v32  ;;  %v5168_v22 = vpop.f32.mrf.mxu1  ;;  %v7421_v57 = vpop.f32.mrf.mxu0  ;;  %v8534_v19 = vrot.slane %v13108_v16, 7  ;;  %v13121_v56 = vcombine.high %v12993_v9, %v12993_v9  ;;  %v13125_v37 = vcombine.high %v13017_v39, %v13017_v39 }
 0x1d0   : > { %8894 = vrot.lane.b32.xlu0 %v8519_v12, %s11306_s10  ;;  %v8533_v35 = vrot.slane %v8531_v4, 2  ;;  %v13128_v3 = vrot.slane %v7888_v20, %v12824_v28  ;;  %v7906_v24 = vcombine.low %v7554_v10, %v7555_v50  ;;  %v7907_v32 = vcombine.high %v7554_v10, %v7555_v50 }
 0x1d1   : > { %14865 = vst [vmem:[#allocation73_spill] sm:$0xff] %v13121_v56  ;;  %14866 = vst [vmem:[#allocation74_spill] sm:$0xff] %v13125_v37  ;;  %v5169_v33 = vadd.f32 %v5168_v22, %v12793_v60  ;;  %v13132_v1 = vrot.slane %v7889_v53, %v12824_v28  ;;  %v7556_v12 = vadd.f32 %v7419_v2, %v5167_v38  ;;  %v5170_v61 = vpop.f32.mrf.mxu1  ;;  %v7423_v6 = vpop.f32.mrf.mxu0  ;;  %v8537_v51 = vrot.slane %v13017_v39, 7 }
 0x1d2   : > { %14867 = vst [vmem:[#allocation75_spill] sm:$0xff] %v13128_v3  ;;  %v8535_v27 = vsel %vm12857_vm1, %v8533_v35, %v8534_v19  ;;  %v13138_v17 = vrot.slane %v7907_v32, %v12824_v28  ;;  %v5171_v20 = vadd.f32 %v5170_v61, %v12797_v18  ;;  %v11107_v60 = vrot.slane %v13121_v56, 9  ;;  %v14893_v56 = vld [vmem:[#allocation10_spill] sm:$0xff] }
 0x1d3   : > { %14868 = vst [vmem:[#allocation76_spill] sm:$0xff] %v13132_v1  ;;  %v7557_v30 = vadd.f32 %v7421_v57, %v5169_v33  ;;  %8900 = vrot.lane.b32.xlu1 %v8528_v63, %s11306_s10  ;;  %v13144_v53 = vrot.slane %v7906_v24, %v12824_v28  ;;  %v5172_v10 = vpop.f32.mrf.mxu1  ;;  %v7425_v2 = vpop.f32.mrf.mxu0  ;;  %v8539_v38 = vrot.slane %v8537_v51, 2  ;;  %v8540_v50 = vrot.slane %v13125_v37, 7 }
 0x1d4   : > { %14869 = vst [vmem:[#allocation77_spill] sm:$0xff] %v13138_v17  ;;  %8898 = vrot.lane.b32.xlu0 %v8525_v48, %s11306_s10  ;;  %v13150_v22 = vcombine.high %v13028_v58, %v13028_v58  ;;  %v5173_v63 = vadd.f32 %v5172_v10, %v12801_v52  ;;  %v8536_v35 = vrot.slane %v8534_v19, 2  ;;  %v13155_v24 = vcombine.high %v13138_v17, %v13138_v17 }
 0x1d5   : > { %14870 = vst [vmem:[#allocation78_spill] sm:$0xff] %v13144_v53  ;;  %v7924_v18 = vcombine.low %v7556_v12, %v7557_v30  ;;  %v7925_v57 = vcombine.high %v7556_v12, %v7557_v30  ;;  %v7558_v32 = vadd.f32 %v7423_v6, %v5171_v20  ;;  %v5176_v48 = vpop.f32.mrf.mxu1  ;;  %v8532_v33 = vsel %vm12857_vm1, %v11107_v60, %v8531_v4  ;;  %v7429_v61 = vpop.f32.mrf.mxu0 }
 0x1d6   : > { %14871 = vst [vmem:[#allocation79_spill] sm:$0xff] %v13150_v22  ;;  %14872 = vst [vmem:[#allocation80_spill] sm:$0xff] %v13155_v24  ;;  %v8543_v39 = vrot.slane %v13028_v58, 7  ;;  %v5177_v52 = vadd.f32 %v5176_v48, %v12805_v25  ;;  %v7559_v19 = vadd.f32 %v7425_v2, %v5173_v63  ;;  %v8541_v4 = vsel %vm12857_vm1, %v8539_v38, %v8540_v50 }
 0x1d7   : > { %v13161_v37 = vrot.slane %v7924_v18, %v12824_v28  ;;  %v13164_v30 = vrot.slane %v7925_v57, %v12824_v28  ;;  %8904 = vrot.lane.b32.xlu1 %v8535_v27, %s11306_s10  ;;  %v5178_v12 = vpop.f32.mrf.mxu1  ;;  %v7431_v6 = vpop.f32.mrf.mxu0  ;;  %v8546_v60 = vrot.slane %v13150_v22, 7  ;;  %v13174_v10 = vcombine.high %v13049_v36, %v13049_v36 }
 0x1d8   : > { %8902 = vrot.lane.b32.xlu0 %v8532_v33, %s11306_s10  ;;  %v8545_v20 = vrot.slane %v8543_v39, 2  ;;  %v7942_v18 = vcombine.low %v7558_v32, %v7559_v19  ;;  %v7943_v57 = vcombine.high %v7558_v32, %v7559_v19  ;;  %v8538_v25 = vsel %vm12857_vm1, %v8536_v35, %v8537_v51 }
 0x1d9   : > { %14873 = vst [vmem:[#allocation81_spill] sm:$0xff] %v13161_v37  ;;  %14874 = vst [vmem:[#allocation82_spill] sm:$0xff] %v13164_v30  ;;  %v8542_v27 = vrot.slane %v8540_v50, 2  ;;  %v13180_v2 = vcombine.high %v13161_v37, %v13161_v37  ;;  %v13184_v38 = vcombine.high %v13164_v30, %v13164_v30  ;;  %v5179_v63 = vadd.f32 %v5178_v12, %v12807_v42  ;;  %v5180_v33 = vpop.f32.mrf.mxu1  ;;  %v7433_v58 = vpop.f32.mrf.mxu0 }
 0x1da   : > { %14875 = vst [vmem:[#allocation83_spill] sm:$0xff] %v13174_v10  ;;  %v7560_v48 = vadd.f32 %v7429_v61, %v5177_v52  ;;  %v13188_v22 = vrot.slane %v7942_v18, %v12824_v28  ;;  %v5181_v32 = vadd.f32 %v5180_v33, %v12811_v43  ;;  %v8547_v51 = vsel %vm12857_vm1, %v8545_v20, %v8546_v60 }
 0x1db   : > { %14876 = vst [vmem:[#allocation84_spill] sm:$0xff] %v13180_v2  ;;  %14877 = vst [vmem:[#allocation85_spill] sm:$0xff] %v13184_v38  ;;  %8908 = vrot.lane.b32.xlu1 %v8541_v4, %s11306_s10  ;;  %v8549_v50 = vrot.slane %v13049_v36, 7  ;;  %v7561_v35 = vadd.f32 %v7431_v6, %v5179_v63  ;;  %v5182_v19 = vpop.f32.mrf.mxu1  ;;  %v7435_v42 = vpop.f32.mrf.mxu0  ;;  %v8552_v61 = vrot.slane %v13174_v10, 7  ;;  %v8548_v52 = vrot.slane %v8546_v60, 2 }
 0x1dc   : > { %14878 = vst [vmem:[#allocation86_spill] sm:$0xff] %v13188_v22  ;;  %8906 = vrot.lane.b32.xlu0 %v8538_v25, %s11306_s10  ;;  %v8556_v12 = vrot.slane %v13059_v26, 7  ;;  %v13199_v18 = vrot.slane %v7943_v57, %v12824_v28  ;;  %v5183_v43 = vadd.f32 %v5182_v19, %v12815_v21  ;;  %v8544_v4 = vsel %vm12857_vm1, %v8542_v27, %v8543_v39 }
 0x1dd   : > { %v8551_v20 = vrot.slane %v8549_v50, 2  ;;  %v13206_v6 = vcombine.high %v13188_v22, %v13188_v22  ;;  %v7960_v25 = vcombine.low %v7560_v48, %v7561_v35  ;;  %v7961_v63 = vcombine.high %v7560_v48, %v7561_v35  ;;  %v5186_v33 = vpop.f32.mrf.mxu1  ;;  %v7439_v36 = vpop.f32.mrf.mxu0 }
 0x1de   : > { %14879 = vst [vmem:[#allocation87_spill] sm:$0xff] %v13199_v18  ;;  %v8558_v60 = vrot.slane %v8556_v12, 2  ;;  %v7562_v10 = vadd.f32 %v7433_v58, %v5181_v32  ;;  %v5187_v26 = vadd.f32 %v5186_v33, %v12428_v40  ;;  %v7563_v57 = vadd.f32 %v7435_v42, %v5183_v43 }
 0x1df   : > { %14880 = vst [vmem:[#allocation88_spill] sm:$0xff] %v13206_v6  ;;  %8912 = vrot.lane.b32.xlu1 %v8547_v51, %s11306_s10  ;;  %v8550_v21 = vsel %vm12857_vm1, %v8548_v52, %v8549_v50  ;;  %v13213_v39 = vrot.slane %v7960_v25, %v12824_v28  ;;  %v5188_v27 = vpop.f32.mrf.mxu1  ;;  %v7441_v19 = vpop.f32.mrf.mxu0  ;;  %v8553_v48 = vsel %vm12857_vm1, %v8551_v20, %v8552_v61  ;;  %v8559_v58 = vrot.slane %v13044_v15, 7 }
 0x1e0   : > { %8910 = vrot.lane.b32.xlu0 %v8544_v4, %s11306_s10  ;;  %v8562_v40 = vrot.slane %v13063_v14, 7  ;;  %v7978_v32 = vcombine.low %v7562_v10, %v7563_v57  ;;  %v7979_v35 = vcombine.high %v7562_v10, %v7563_v57  ;;  %v5189_v51 = vadd.f32 %v5188_v27, %v12449_v45 }
 0x1e1   : > { %14881 = vst [vmem:[#allocation89_spill] sm:$0xff] %v13213_v39  ;;  %v11108_v50 = vrot.slane %v13041_v47, 9  ;;  %v13223_v42 = vrot.slane %v7961_v63, %v12824_v28  ;;  %v7564_v52 = vadd.f32 %v7439_v36, %v5187_v26  ;;  %v5190_v43 = vpop.f32.mrf.mxu1  ;;  %v7443_v4 = vpop.f32.mrf.mxu0  ;;  %v8560_v25 = vsel %vm12857_vm1, %v8558_v60, %v8559_v58 }
 0x1e2   : > { %v8565_v61 = vrot.slane %v13067_v46, 7  ;;  %v5191_v20 = vadd.f32 %v5190_v43, %v12466_v11  ;;  %v7565_v33 = vadd.f32 %v7441_v19, %v5189_v51  ;;  %v8564_v10 = vrot.slane %v8562_v40, 2  ;;  %v14890_v46 = vld [vmem:[#allocation8_spill] sm:$0xff] }
 0x1e3   : > { %14882 = vst [vmem:[#allocation90_spill] sm:$0xff] %v13223_v42  ;;  %8916 = vrot.lane.b32.xlu1 %v8553_v48, %s11306_s10  ;;  %v8557_v45 = vsel %vm12857_vm1, %v11108_v50, %v8556_v12  ;;  %v13233_v63 = vrot.slane %v7978_v32, %v12824_v28  ;;  %v13236_v36 = vrot.slane %v7979_v35, %v12824_v28  ;;  %v5192_v26 = vpop.f32.mrf.mxu1  ;;  %v7445_v60 = vpop.f32.mrf.mxu0  ;;  %v8561_v57 = vrot.slane %v8559_v58, 2 }
 0x1e4   : > { %8914 = vrot.lane.b32.xlu0 %v8550_v21, %s11306_s10  ;;  %v8568_v11 = vrot.slane %v13080_v13, 7  ;;  %v7996_v27 = vcombine.low %v7564_v52, %v7565_v33  ;;  %v7997_v19 = vcombine.high %v7564_v52, %v7565_v33  ;;  %v5193_v48 = vadd.f32 %v5192_v26, %v12488_v59 }
 0x1e5   : > { %14883 = vst [vmem:[#allocation91_spill] sm:$0xff] %v13233_v63  ;;  %14884 = vst [vmem:[#allocation92_spill] sm:$0xff] %v13236_v36  ;;  %v8571_v12 = vrot.slane %v13070_v44, 7  ;;  %v7566_v51 = vadd.f32 %v7443_v4, %v5191_v20  ;;  %v5196_v50 = vpop.f32.mrf.mxu1  ;;  %v7449_v32 = vpop.f32.mrf.mxu0  ;;  %v8567_v14 = vrot.slane %v8565_v61, 2  ;;  %v8574_v35 = vrot.slane %v13089_v8, 7 }
 0x1e6   : > { %v8570_v43 = vrot.slane %v8568_v11, 2  ;;  %v13244_v21 = vrot.slane %v7996_v27, %v12824_v28  ;;  %v13247_v58 = vrot.slane %v7997_v19, %v12824_v28  ;;  %v5197_v13 = vadd.f32 %v5196_v50, %v12514_v23 }
 0x1e7   : > { %v7567_v52 = vadd.f32 %v7445_v60, %v5193_v48  ;;  %8920 = vrot.lane.b32.xlu1 %v8560_v25, %s11306_s10  ;;  %v5198_v59 = vpop.f32.mrf.mxu1  ;;  %v7451_v4 = vpop.f32.mrf.mxu0  ;;  %v8566_v20 = vsel %vm12857_vm1, %v8564_v10, %v8565_v61  ;;  %v8563_v33 = vsel %vm12857_vm1, %v8561_v57, %v8562_v40  ;;  %v8569_v27 = vsel %vm12857_vm1, %v8567_v14, %v8568_v11 }
 0x1e8   : > { %8918 = vrot.lane.b32.xlu0 %v8557_v45, %s11306_s10  ;;  %v8572_v26 = vsel %vm12857_vm1, %v8570_v43, %v8571_v12  ;;  %v8576_v19 = vrot.slane %v8574_v35, 2  ;;  %v8577_v25 = vrot.slane %v13094_v41, 7  ;;  %v13263_v45 = vcombine.high %v13244_v21, %v13244_v21 }
 0x1e9   : > { %v8014_v23 = vcombine.low %v7566_v51, %v7567_v52  ;;  %v8015_v60 = vcombine.high %v7566_v51, %v7567_v52  ;;  %v13267_v61 = vcombine.high %v13247_v58, %v13247_v58  ;;  %v5199_v40 = vadd.f32 %v5198_v59, %v12535_v31  ;;  %v5200_v10 = vpop.f32.mrf.mxu1  ;;  %v7453_v57 = vpop.f32.mrf.mxu0  ;;  %v14886_v51 = vld [vmem:[#allocation6_spill] sm:$0xff] }
 0x1ea   : > { %v8573_v48 = vrot.slane %v8571_v12, 2  ;;  %v7568_v11 = vadd.f32 %v7449_v32, %v5197_v13  ;;  %v5201_v50 = vadd.f32 %v5200_v10, %v14886_v51  ;;  %v13277_v43 = vcombine.high %v13101_v62, %v13101_v62  ;;  %v14889_v32 = vld [vmem:[#allocation7_spill] sm:$0xff] }
 0x1eb   : > { %14885 = vst [vmem:[#allocation93_spill] sm:$0xff] %v13267_v61  ;;  %v13271_v14 = vrot.slane %v8014_v23, %v12824_v28  ;;  %8924 = vrot.lane.b32.xlu1 %v8566_v20, %s11306_s10  ;;  %v13280_v52 = vrot.slane %v8015_v60, %v12824_v28  ;;  %v7569_v8 = vadd.f32 %v7451_v4, %v5199_v40  ;;  %v5202_v31 = vpop.f32.mrf.mxu1  ;;  %v7455_v12 = vpop.f32.mrf.mxu0  ;;  %v8581_v59 = vrot.slane %v13101_v62, 7 }
 0x1ec   : > { %14887 = vst [vmem:[#allocation6_spill] sm:$0xff] %v13277_v43  ;;  %8922 = vrot.lane.b32.xlu0 %v8563_v33, %s11306_s10  ;;  %v13286_v13 = vcombine.high %v13094_v41, %v13094_v41  ;;  %v5203_v20 = vadd.f32 %v5202_v31, %v14889_v32  ;;  %v7570_v23 = vadd.f32 %v7453_v57, %v5201_v50  ;;  %v8584_v62 = vrot.slane %v13277_v43, 7 }
 0x1ed   : > { %v8578_v10 = vsel %vm12857_vm1, %v8576_v19, %v8577_v25  ;;  %v8575_v60 = vsel %vm12857_vm1, %v8573_v48, %v8574_v35  ;;  %v8032_v4 = vcombine.low %v7568_v11, %v7569_v8  ;;  %v8033_v40 = vcombine.high %v7568_v11, %v7569_v8  ;;  %v5206_v33 = vpop.f32.mrf.mxu1  ;;  %v7459_v51 = vpop.f32.mrf.mxu0 }
 0x1ee   : > { %14888 = vst [vmem:[#allocation94_spill] sm:$0xff] %v13286_v13  ;;  %v8583_v44 = vrot.slane %v8581_v59, 2  ;;  %v5207_v47 = vadd.f32 %v5206_v33, %v14890_v46  ;;  %v7571_v41 = vadd.f32 %v7455_v12, %v5203_v20  ;;  %v11109_v57 = vrot.slane %v13286_v13, 9  ;;  %v14892_v12 = vld [vmem:[#allocation9_spill] sm:$0xff] }
 0x1ef   : > { %8928 = vrot.lane.b32.xlu1 %v8572_v26, %s11306_s10  ;;  %v13299_v19 = vcombine.high %v13128_v3, %v13128_v3  ;;  %v13303_v35 = vcombine.high %v13271_v14, %v13271_v14  ;;  %v13307_v8 = vcombine.high %v13280_v52, %v13280_v52  ;;  %v13310_v25 = vrot.slane %v8032_v4, %v12824_v28  ;;  %v5208_v46 = vpop.f32.mrf.mxu1  ;;  %v7461_v26 = vpop.f32.mrf.mxu0 }
 0x1f0   : > { %8926 = vrot.lane.b32.xlu0 %v8569_v27, %s11306_s10  ;;  %v8587_v48 = vrot.slane %v13128_v3, 7  ;;  %v13315_v11 = vrot.slane %v8033_v40, %v12824_v28  ;;  %v8050_v50 = vcombine.low %v7570_v23, %v7571_v41  ;;  %v8051_v31 = vcombine.high %v7570_v23, %v7571_v41 }
 0x1f1   : > { %14891 = vst [vmem:[#allocation7_spill] sm:$0xff] %v13299_v19  ;;  %v5209_v32 = vadd.f32 %v5208_v46, %v14892_v12  ;;  %v5210_v20 = vpop.f32.mrf.mxu1  ;;  %v7463_v33 = vpop.f32.mrf.mxu0  ;;  %v8585_v13 = vsel %vm12857_vm1, %v8583_v44, %v8584_v62  ;;  %v8590_v43 = vrot.slane %v13299_v19, 7  ;;  %v8586_v27 = vrot.slane %v8584_v62, 2 }
 0x1f2   : > { %v8589_v4 = vrot.slane %v8587_v48, 2  ;;  %v7572_v15 = vadd.f32 %v7459_v51, %v5207_v47  ;;  %v5211_v16 = vadd.f32 %v5210_v20, %v14893_v56  ;;  %v8582_v41 = vsel %vm12857_vm1, %v11109_v57, %v8581_v59  ;;  %v14895_v51 = vld [vmem:[#allocation11_spill] sm:$0xff] }
 0x1f3   : > { %v7573_v3 = vadd.f32 %v7461_v26, %v5209_v32  ;;  %8932 = vrot.lane.b32.xlu1 %v8578_v10, %s11306_s10  ;;  %v13326_v23 = vrot.slane %v8050_v50, %v12824_v28  ;;  %v13329_v40 = vrot.slane %v8051_v31, %v12824_v28  ;;  %v5212_v44 = vpop.f32.mrf.mxu1  ;;  %v7465_v46 = vpop.f32.mrf.mxu0  ;;  %v13334_v47 = vcombine.high %v13132_v1, %v13132_v1 }
 0x1f4   : > { %8930 = vrot.lane.b32.xlu0 %v8575_v60, %s11306_s10  ;;  %v8593_v62 = vrot.slane %v13132_v1, 7  ;;  %v5213_v59 = vadd.f32 %v5212_v44, %v14895_v51  ;;  %v8591_v57 = vsel %vm12857_vm1, %v8589_v4, %v8590_v43  ;;  %v8588_v60 = vsel %vm12857_vm1, %v8586_v27, %v8587_v48  ;;  %v14897_v1 = vld [vmem:[#allocation12_spill] sm:$0xff] }
 0x1f5   : > { %14894 = vst [vmem:[#allocation8_spill] sm:$0xff] %v13334_v47  ;;  %v8068_v56 = vcombine.low %v7572_v15, %v7573_v3  ;;  %v8069_v10 = vcombine.high %v7572_v15, %v7573_v3  ;;  %v5216_v26 = vpop.f32.mrf.mxu1  ;;  %v7469_v50 = vpop.f32.mrf.mxu0  ;;  %v8596_v12 = vrot.slane %v13334_v47, 7  ;;  %v13345_v32 = vcombine.high %v13144_v53, %v13144_v53 }
 0x1f6   : > { %v8595_v31 = vrot.slane %v8593_v62, 2  ;;  %v7574_v20 = vadd.f32 %v7463_v33, %v5211_v16  ;;  %v5217_v15 = vadd.f32 %v5216_v26, %v14897_v1  ;;  %v7575_v3 = vadd.f32 %v7465_v46, %v5213_v59  ;;  %v14900_v46 = vld [vmem:[#allocation13_spill] sm:$0xff] }
 0x1f7   : > { %14896 = vst [vmem:[#allocation9_spill] sm:$0xff] %v13345_v32  ;;  %8936 = vrot.lane.b32.xlu1 %v8585_v13, %s11306_s10  ;;  %v8592_v44 = vrot.slane %v8590_v43, 2  ;;  %v13350_v4 = vrot.slane %v8068_v56, %v12824_v28  ;;  %v13353_v51 = vrot.slane %v8069_v10, %v12824_v28  ;;  %v5218_v48 = vpop.f32.mrf.mxu1  ;;  %v7471_v27 = vpop.f32.mrf.mxu0  ;;  %v8599_v16 = vrot.slane %v13144_v53, 7  ;;  %v14902_v53 = vld [vmem:[#allocation14_spill] sm:$0xff] }
 0x1f8   : > { %8934 = vrot.lane.b32.xlu0 %v8582_v41, %s11306_s10  ;;  %v8597_v47 = vsel %vm12857_vm1, %v8595_v31, %v8596_v12  ;;  %v8086_v1 = vcombine.low %v7574_v20, %v7575_v3  ;;  %v8087_v33 = vcombine.high %v7574_v20, %v7575_v3  ;;  %v5219_v13 = vadd.f32 %v5218_v48, %v14900_v46 }
 0x1f9   : > { %14898 = vst [vmem:[#allocation10_spill] sm:$0xff] %v13350_v4  ;;  %14899 = vst [vmem:[#allocation11_spill] sm:$0xff] %v13353_v51  ;;  %v8602_v43 = vrot.slane %v13345_v32, 7  ;;  %v7576_v56 = vadd.f32 %v7469_v50, %v5217_v15  ;;  %v5220_v59 = vpop.f32.mrf.mxu1  ;;  %v7473_v26 = vpop.f32.mrf.mxu0  ;;  %v8601_v10 = vrot.slane %v8599_v16, 2  ;;  %v8598_v19 = vrot.slane %v8596_v12, 2 }
 0x1fa   : > { %v8606_v41 = vrot.slane %v13155_v24, 7  ;;  %v13363_v9 = vrot.slane %v8086_v1, %v12824_v28  ;;  %v13366_v31 = vrot.slane %v8087_v33, %v12824_v28  ;;  %v5221_v4 = vadd.f32 %v5220_v59, %v14902_v53 }
 0x1fb   : > { %v7577_v20 = vadd.f32 %v7471_v27, %v5219_v13  ;;  %8940 = vrot.lane.b32.xlu1 %v8591_v57, %s11306_s10  ;;  %v13372_v50 = vcombine.high %v13353_v51, %v13353_v51  ;;  %v5222_v12 = vpop.f32.mrf.mxu1  ;;  %v7475_v15 = vpop.f32.mrf.mxu0  ;;  %v8594_v3 = vsel %vm12857_vm1, %v8592_v44, %v8593_v62  ;;  %v8609_v1 = vrot.slane %v13161_v37, 7  ;;  %v14905_v62 = vld [vmem:[#allocation15_spill] sm:$0xff] }
 0x1fc   : > { %14901 = vst [vmem:[#allocation12_spill] sm:$0xff] %v13363_v9  ;;  %8938 = vrot.lane.b32.xlu0 %v8588_v60, %s11306_s10  ;;  %v8608_v48 = vrot.slane %v8606_v41, 2  ;;  %v8603_v53 = vsel %vm12857_vm1, %v8601_v10, %v8602_v43  ;;  %v8600_v57 = vsel %vm12857_vm1, %v8598_v19, %v8599_v16  ;;  %v13384_v27 = vcombine.high %v13363_v9, %v13363_v9  ;;  %v14907_v43 = vld [vmem:[#allocation16_spill] sm:$0xff] }
 0x1fd   : > { %v8104_v33 = vcombine.low %v7576_v56, %v7577_v20  ;;  %v8105_v46 = vcombine.high %v7576_v56, %v7577_v20  ;;  %v13388_v60 = vcombine.high %v13366_v31, %v13366_v31  ;;  %v5223_v44 = vadd.f32 %v5222_v12, %v14905_v62  ;;  %v5226_v59 = vpop.f32.mrf.mxu1  ;;  %v7479_v24 = vpop.f32.mrf.mxu0  ;;  %v14909_v62 = vld [vmem:[#allocation17_spill] sm:$0xff] }
 0x1fe   : > { %14903 = vst [vmem:[#allocation13_spill] sm:$0xff] %v13384_v27  ;;  %v7578_v13 = vadd.f32 %v7473_v26, %v5221_v4  ;;  %v5227_v10 = vadd.f32 %v5226_v59, %v14907_v43  ;;  %v11110_v19 = vrot.slane %v13138_v17, 9  ;;  %v8612_v16 = vrot.slane %v13180_v2, 7  ;;  %v14911_v17 = vld [vmem:[#allocation18_spill] sm:$0xff] }
 0x1ff   : > { %14904 = vst [vmem:[#allocation14_spill] sm:$0xff] %v13388_v60  ;;  %v13392_v56 = vrot.slane %v8104_v33, %v12824_v28  ;;  %8944 = vrot.lane.b32.xlu1 %v8597_v47, %s11306_s10  ;;  %v7579_v20 = vadd.f32 %v7475_v15, %v5223_v44  ;;  %v5228_v37 = vpop.f32.mrf.mxu1  ;;  %v7481_v32 = vpop.f32.mrf.mxu0  ;;  %v8610_v4 = vsel %vm12857_vm1, %v8608_v48, %v8609_v1  ;;  %v8615_v26 = vrot.slane %v13164_v30, 7 }
 0x200   : > { %8942 = vrot.lane.b32.xlu0 %v8594_v3, %s11306_s10  ;;  %v8611_v12 = vrot.slane %v8609_v1, 2  ;;  %v13403_v33 = vrot.slane %v8105_v46, %v12824_v28  ;;  %v5229_v47 = vadd.f32 %v5228_v37, %v14909_v62  ;;  %v8607_v59 = vsel %vm12857_vm1, %v11110_v19, %v8606_v41 }
 0x201   : > { %14906 = vst [vmem:[#allocation15_spill] sm:$0xff] %v13392_v56  ;;  %v8614_v43 = vrot.slane %v8612_v16, 2  ;;  %v13410_v15 = vcombine.high %v13392_v56, %v13392_v56  ;;  %v8122_v3 = vcombine.low %v7578_v13, %v7579_v20  ;;  %v8123_v44 = vcombine.high %v7578_v13, %v7579_v20  ;;  %v5230_v2 = vpop.f32.mrf.mxu1  ;;  %v7483_v48 = vpop.f32.mrf.mxu0 }
 0x202   : > { %14908 = vst [vmem:[#allocation16_spill] sm:$0xff] %v13403_v33  ;;  %v8618_v30 = vrot.slane %v13184_v38, 7  ;;  %v7580_v1 = vadd.f32 %v7479_v24, %v5227_v10  ;;  %v5231_v46 = vadd.f32 %v5230_v2, %v14911_v17  ;;  %v7581_v33 = vadd.f32 %v7481_v32, %v5229_v47  ;;  %v14914_v32 = vld [vmem:[#allocation19_spill] sm:$0xff] }
 0x203   : > { %14910 = vst [vmem:[#allocation17_spill] sm:$0xff] %v13410_v15  ;;  %8948 = vrot.lane.b32.xlu1 %v8603_v53, %s11306_s10  ;;  %v8621_v37 = vrot.slane %v13188_v22, 7  ;;  %v5232_v41 = vpop.f32.mrf.mxu1  ;;  %v7485_v19 = vpop.f32.mrf.mxu0  ;;  %v8616_v62 = vsel %vm12857_vm1, %v8614_v43, %v8615_v26  ;;  %v8613_v13 = vsel %vm12857_vm1, %v8611_v12, %v8612_v16  ;;  %v8617_v38 = vrot.slane %v8615_v26, 2  ;;  %v14915_v12 = vld [vmem:[#allocation20_spill] sm:$0xff] }
 0x204   : > { %8946 = vrot.lane.b32.xlu0 %v8600_v57, %s11306_s10  ;;  %v8620_v20 = vrot.slane %v8618_v30, 2  ;;  %v13422_v24 = vrot.slane %v8122_v3, %v12824_v28  ;;  %v13425_v17 = vrot.slane %v8123_v44, %v12824_v28  ;;  %v8140_v2 = vcombine.low %v7580_v1, %v7581_v33 }
 0x205   : > { %v5233_v53 = vadd.f32 %v5232_v41, %v14914_v32  ;;  %v8141_v57 = vcombine.high %v7580_v1, %v7581_v33  ;;  %v7582_v10 = vadd.f32 %v7483_v48, %v5231_v46  ;;  %v5236_v47 = vpop.f32.mrf.mxu1  ;;  %v7489_v22 = vpop.f32.mrf.mxu0  ;;  %v8624_v16 = vrot.slane %v13206_v6, 7 }
 0x206   : > { %14912 = vst [vmem:[#allocation18_spill] sm:$0xff] %v13422_v24  ;;  %14913 = vst [vmem:[#allocation95_spill] sm:$0xff] %v13425_v17  ;;  %v8622_v43 = vsel %vm12857_vm1, %v8620_v20, %v8621_v37  ;;  %v5237_v26 = vadd.f32 %v5236_v47, %v14915_v12  ;;  %v8619_v3 = vsel %vm12857_vm1, %v8617_v38, %v8618_v30  ;;  %v8627_v44 = vrot.slane %v13199_v18, 7  ;;  %v14918_v30 = vld [vmem:[#allocation21_spill] sm:$0xff]  ;;  %v14954_v24 = vld [vmem:[#allocation31_spill] sm:$0xff] }
 0x207   : > { %v7583_v15 = vadd.f32 %v7485_v19, %v5233_v53  ;;  %8952 = vrot.lane.b32.xlu1 %v8610_v4, %s11306_s10  ;;  %v5238_v33 = vpop.f32.mrf.mxu1  ;;  %v7491_v48 = vpop.f32.mrf.mxu0  ;;  %v8626_v1 = vrot.slane %v8624_v16, 2  ;;  %v8623_v46 = vrot.slane %v8621_v37, 2  ;;  %v13439_v41 = vcombine.high %v13213_v39, %v13213_v39 }
 0x208   : > { %8950 = vrot.lane.b32.xlu0 %v8607_v59, %s11306_s10  ;;  %v8631_v20 = vrot.slane %v13213_v39, 7  ;;  %v13443_v19 = vrot.slane %v8140_v2, %v12824_v28  ;;  %v5239_v38 = vadd.f32 %v5238_v33, %v14918_v30  ;;  %v13447_v53 = vrot.slane %v8141_v57, %v12824_v28 }
 0x209   : > { %14916 = vst [vmem:[#allocation19_spill] sm:$0xff] %v13439_v41  ;;  %v8158_v4 = vcombine.low %v7582_v10, %v7583_v15  ;;  %v8159_v32 = vcombine.high %v7582_v10, %v7583_v15  ;;  %v7584_v59 = vadd.f32 %v7489_v22, %v5237_v26  ;;  %v5240_v47 = vpop.f32.mrf.mxu1  ;;  %v7493_v12 = vpop.f32.mrf.mxu0  ;;  %v8634_v6 = vrot.slane %v13439_v41, 7  ;;  %v14922_v22 = vld [vmem:[#allocation22_spill] sm:$0xff] }
 0x20a   : > { %14917 = vst [vmem:[#allocation20_spill] sm:$0xff] %v13443_v19  ;;  %14919 = vst [vmem:[#allocation21_spill] sm:$0xff] %v13447_v53  ;;  %v8633_v37 = vrot.slane %v8631_v20, 2  ;;  %v7585_v39 = vadd.f32 %v7491_v48, %v5239_v38  ;;  %v8628_v15 = vsel %vm12857_vm1, %v8626_v1, %v8627_v44  ;;  %v8625_v2 = vsel %vm12857_vm1, %v8623_v46, %v8624_v16  ;;  %v14925_v46 = vld [vmem:[#allocation38_spill] sm:$0xff]  ;;  %v14945_v53 = vld [vmem:[#allocation29_spill] sm:$0xff] }
 0x20b   : > { %v13451_v17 = vrot.slane %v8158_v4, %v12824_v28  ;;  %8956 = vrot.lane.b32.xlu1 %v8616_v62, %s11306_s10  ;;  %v13459_v57 = vrot.slane %v8159_v32, %v12824_v28  ;;  %v5241_v10 = vadd.f32 %v5240_v47, %v14922_v22  ;;  %v5242_v26 = vpop.f32.mrf.mxu1  ;;  %v7495_v33 = vpop.f32.mrf.mxu0  ;;  %v13465_v48 = vcombine.high %v13199_v18, %v13199_v18  ;;  %v14927_v32 = vld [vmem:[#allocation23_spill] sm:$0xff] }
 0x20c   : > { %8954 = vrot.lane.b32.xlu0 %v8613_v13, %s11306_s10  ;;  %v13469_v62 = vcombine.high %v13223_v42, %v13223_v42  ;;  %v8176_v44 = vcombine.low %v7584_v59, %v7585_v39  ;;  %v8177_v1 = vcombine.high %v7584_v59, %v7585_v39  ;;  %v8635_v16 = vsel %vm12857_vm1, %v8633_v37, %v8634_v6  ;;  %v14930_v59 = vld [vmem:[#allocation24_spill] sm:$0xff] }
 0x20d   : > { %14920 = vst [vmem:[#allocation96_spill] sm:$0xff] %v13451_v17  ;;  %14921 = vst [vmem:[#allocation97_spill] sm:$0xff] %v13459_v57  ;;  %v13476_v13 = vcombine.high %v13451_v17, %v13451_v17  ;;  %v5243_v30 = vadd.f32 %v5242_v26, %v14927_v32  ;;  %v5246_v38 = vpop.f32.mrf.mxu1  ;;  %v7499_v47 = vpop.f32.mrf.mxu0  ;;  %v11111_v22 = vrot.slane %v13465_v48, 9  ;;  %v8637_v41 = vrot.slane %v13223_v42, 7 }
 0x20e   : > { %14923 = vst [vmem:[#allocation22_spill] sm:$0xff] %v13465_v48  ;;  %14924 = vst [vmem:[#allocation98_spill] sm:$0xff] %v13469_v62  ;;  %v13482_v18 = vrot.slane %v8176_v44, %v12824_v28  ;;  %v13485_v39 = vrot.slane %v8177_v1, %v12824_v28  ;;  %v5247_v37 = vadd.f32 %v5246_v38, %v14930_v59  ;;  %v8640_v4 = vrot.slane %v13469_v62, 7  ;;  %v14933_v38 = vld [vmem:[#allocation25_spill] sm:$0xff]  ;;  %v14935_v62 = vld [vmem:[#allocation26_spill] sm:$0xff] }
 0x20f   : > { %14926 = vst [vmem:[#allocation38_spill] sm:$0xff] %v13476_v13  ;;  %8960 = vrot.lane.b32.xlu1 %v8622_v43, %s11306_s10  ;;  %v7586_v17 = vadd.f32 %v7493_v12, %v5241_v10  ;;  %v7587_v26 = vadd.f32 %v7495_v33, %v5243_v30  ;;  %v5248_v32 = vpop.f32.mrf.mxu1  ;;  %v7501_v48 = vpop.f32.mrf.mxu0  ;;  %v8639_v13 = vrot.slane %v8637_v41, 2  ;;  %v8636_v42 = vrot.slane %v8634_v6, 2 }
 0x210   : > { %14928 = vst [vmem:[#allocation23_spill] sm:$0xff] %v13482_v18  ;;  %14929 = vst [vmem:[#allocation99_spill] sm:$0xff] %v13485_v39  ;;  %8958 = vrot.lane.b32.xlu0 %v8619_v3, %s11306_s10  ;;  %v13493_v44 = vcombine.high %v13459_v57, %v13459_v57  ;;  %v13497_v1 = vcombine.high %v13482_v18, %v13482_v18  ;;  %v5249_v43 = vadd.f32 %v5248_v32, %v14933_v38 }
 0x211   : > { %v8632_v12 = vsel %vm12857_vm1, %v11111_v22, %v8631_v20  ;;  %v13504_v3 = vcombine.high %v13485_v39, %v13485_v39  ;;  %v8194_v10 = vcombine.low %v7586_v17, %v7587_v26  ;;  %v8195_v33 = vcombine.high %v7586_v17, %v7587_v26  ;;  %v5250_v30 = vpop.f32.mrf.mxu1  ;;  %v7503_v59 = vpop.f32.mrf.mxu0 }
 0x212   : > { %14931 = vst [vmem:[#allocation24_spill] sm:$0xff] %v13493_v44  ;;  %14932 = vst [vmem:[#allocation100_spill] sm:$0xff] %v13497_v1  ;;  %v7588_v6 = vadd.f32 %v7499_v47, %v5247_v37  ;;  %v5251_v44 = vadd.f32 %v5250_v30, %v14935_v62  ;;  %v7589_v57 = vadd.f32 %v7501_v48, %v5249_v43  ;;  %v14938_v62 = vld [vmem:[#allocation37_spill] sm:$0xff]  ;;  %v14939_v37 = vld [vmem:[#allocation40_spill] sm:$0xff] }
 0x213   : > { %14934 = vst [vmem:[#allocation25_spill] sm:$0xff] %v13504_v3  ;;  %8964 = vrot.lane.b32.xlu1 %v8628_v15, %s11306_s10  ;;  %v8641_v32 = vsel %vm12857_vm1, %v8639_v13, %v8640_v4  ;;  %v8638_v20 = vsel %vm12857_vm1, %v8636_v42, %v8637_v41  ;;  %v13513_v22 = vrot.slane %v8194_v10, %v12824_v28  ;;  %v5252_v17 = vpop.f32.mrf.mxu1  ;;  %v7505_v47 = vpop.f32.mrf.mxu0  ;;  %v14940_v43 = vld [vmem:[#allocation27_spill] sm:$0xff]  ;;  %v9369_v41 = vrot.slane %v12862_v0, 2 }
 0x214   : > { %v13516_v38 = vrot.slane %v8195_v33, %v12824_v28  ;;  %8962 = vrot.lane.b32.xlu0 %v8625_v2, %s11306_s10  ;;  %v13522_v15 = vcombine.high %v14939_v37, %v14939_v37  ;;  %v8212_v13 = vcombine.low %v7588_v6, %v7589_v57  ;;  %v8213_v26 = vcombine.high %v7588_v6, %v7589_v57 }
 0x215   : > { %14936 = vst [vmem:[#allocation26_spill] sm:$0xff] %v13513_v22  ;;  %v5253_v42 = vadd.f32 %v5252_v17, %v14940_v43  ;;  %v7590_v10 = vadd.f32 %v7503_v59, %v5251_v44  ;;  %v5256_v30 = vpop.f32.mrf.mxu1  ;;  %v7509_v33 = vpop.f32.mrf.mxu0  ;;  %v13528_v2 = vcombine.high %v12913_v7, %v12913_v7  ;;  %v13532_v48 = vcombine.high %v13233_v63, %v13233_v63  ;;  %v14943_v44 = vld [vmem:[#allocation28_spill] sm:$0xff] }
 0x216   : > { %14937 = vst [vmem:[#allocation101_spill] sm:$0xff] %v13516_v38  ;;  %v8643_v38 = vrot.slane %v13233_v63, 7  ;;  %v13537_v57 = vcombine.high %v13513_v22, %v13513_v22  ;;  %v13540_v6 = vrot.slane %v8212_v13, %v12824_v28  ;;  %v5257_v59 = vadd.f32 %v5256_v30, %v14943_v44 }
 0x217   : > { %v7591_v17 = vadd.f32 %v7505_v47, %v5253_v42  ;;  %8968 = vrot.lane.b32.xlu1 %v8635_v16, %s11306_s10  ;;  %v13545_v43 = vrot.slane %v8213_v26, %v12824_v28  ;;  %v5258_v3 = vpop.f32.mrf.mxu1  ;;  %v7511_v39 = vpop.f32.mrf.mxu0  ;;  %v14727_v1 = vrot.slane %v13532_v48, 7  ;;  %v8642_v22 = vrot.slane %v8640_v4, 2  ;;  %v14946_v26 = vld [vmem:[#allocation36_spill] sm:$0xff]  ;;  %v14952_v47 = vld [vmem:[#allocation30_spill] sm:$0xff] }
 0x218   : > { %14941 = vst [vmem:[#allocation37_spill] sm:$0xff] %v13537_v57  ;;  %14942 = vst [vmem:[#allocation40_spill] sm:$0xff] %v13540_v6  ;;  %8966 = vrot.lane.b32.xlu0 %v8632_v12, %s11306_s10  ;;  %v8645_v63 = vrot.slane %v8643_v38, 2  ;;  %v8859_v13 = vpop.permute.xlu1 %8858  ;;  %v8855_v6 = vpop.permute.xlu0 %8854  ;;  %v5259_v30 = vadd.f32 %v5258_v3, %v14945_v53  ;;  %v7592_v44 = vadd.f32 %v7509_v33, %v5257_v59  ;;  %v14949_v33 = vld [vmem:[#allocation39_spill] sm:$0xff] }
 0x219   : > { %14944 = vst [vmem:[#allocation27_spill] sm:$0xff] %v13545_v43  ;;  %v8230_v57 = vcombine.low %v7590_v10, %v7591_v17  ;;  %v8231_v18 = vcombine.high %v7590_v10, %v7591_v17  ;;  %v9240_v16 = vadd.f32 %v8859_v13, %v14938_v62  ;;  %v9238_v42 = vadd.f32 %v8855_v6, %v14946_v26  ;;  %v5260_v12 = vpop.f32.mrf.mxu1  ;;  %v7513_v43 = vpop.f32.mrf.mxu0 }
 0x21a   : > { %v8647_v4 = vsel %vm12857_vm1, %v8645_v63, %v14727_v1  ;;  %v7593_v53 = vadd.f32 %v7511_v39, %v5259_v30  ;;  %v8644_v3 = vsel %vm12857_vm1, %v8642_v22, %v8643_v38  ;;  %v14950_v6 = vrot.slane %v14949_v33, 2 }
 0x21b   : > { %v13558_v10 = vrot.slane %v8230_v57, %v12824_v28  ;;  %v13561_v17 = vrot.slane %v8231_v18, %v12824_v28  ;;  %8972 = vrot.lane.b32.xlu1 %v8641_v32, %s11306_s10  ;;  %v14951_v13 = vrot.slane %v14925_v46, 2  ;;  %v5261_v63 = vadd.f32 %v5260_v12, %v14952_v47  ;;  %v5262_v57 = vpop.f32.mrf.mxu1  ;;  %v7515_v1 = vpop.f32.mrf.mxu0  ;;  %v14953_v18 = vld [vmem:[#allocation41_spill] sm:$0xff] }
 0x21c   : > { %v9624_v59 = vadd.f32 %v14950_v6, %v9240_v16  ;;  %8970 = vrot.lane.b32.xlu0 %v8638_v20, %s11306_s10  ;;  %v8248_v39 = vcombine.low %v7592_v44, %v7593_v53  ;;  %v8249_v30 = vcombine.high %v7592_v44, %v7593_v53  ;;  %v8857_v32 = vpop.permute.xlu0 %8856  ;;  %v5263_v22 = vadd.f32 %v5262_v57, %v14954_v24 }
 0x21d   : > { %14947 = vst [vmem:[#allocation28_spill] sm:$0xff] %v13558_v10  ;;  %14948 = vst [vmem:[#allocation29_spill] sm:$0xff] %v13561_v17  ;;  %v9622_v26 = vadd.f32 %v14951_v13, %v9238_v42  ;;  %v9370_v10 = vrot.slane %v14953_v18, 2  ;;  %v8861_v19 = vpop.permute.xlu1 %8860  ;;  %v13576_v38 = vcombine.high %v13236_v36, %v13236_v36  ;;  %v13580_v16 = vcombine.high %v13561_v17, %v13561_v17  ;;  %v5266_v12 = vpop.f32.mrf.mxu1  ;;  %v14958_v13 = vld [vmem:[#allocation32_spill] sm:$0xff] }
 0x21e   : > { %v9779_v20 = vadd.f32 %v12913_v7, %v9624_v59  ;;  %v9239_v47 = vadd.f32 %v8857_v32, %v14925_v46  ;;  %v9241_v42 = vadd.f32 %v8861_v19, %v14949_v33  ;;  %v7519_v44 = vpop.f32.mrf.mxu0  ;;  %v13587_v24 = vrot.slane %v8248_v39, %v12824_v28 }
 0x21f   : > { %14955 = vst [vmem:[#allocation36_spill] sm:$0xff] %v13580_v16  ;;  %v9777_v53 = vadd.f32 %v14939_v37, %v9622_v26  ;;  %v13590_v6 = vrot.slane %v8249_v30, %v12824_v28  ;;  %v5267_v57 = vadd.f32 %v5266_v12, %v14958_v13  ;;  %8976 = vrot.lane.b32.xlu1 %v8647_v4, %s11306_s10  ;;  %v14959_v59 = vrot.slane %v14938_v62, 2  ;;  %v5268_v33 = vpop.f32.mrf.mxu1 }
 0x220   : > { %14956 = vst [vmem:[#allocation39_spill] sm:$0xff] %v13587_v24  ;;  %v9625_v46 = vadd.f32 %v9369_v41, %v9241_v42  ;;  %v7594_v32 = vadd.f32 %v7513_v43, %v5261_v63  ;;  %v7595_v19 = vadd.f32 %v7515_v1, %v5263_v22  ;;  %8974 = vrot.lane.b32.xlu0 %v8644_v3, %s11306_s10  ;;  %v7521_v26 = vpop.f32.mrf.mxu0  ;;  %v8863_v62 = vpop.permute.xlu0 %8862  ;;  %v8649_v1 = vrot.slane %v13236_v36, 7  ;;  %v14964_v36 = vld [vmem:[#allocation34_spill] sm:$0xff] }
 0x221   : > { %14957 = vst [vmem:[#allocation30_spill] sm:$0xff] %v13590_v6  ;;  %v9623_v17 = vadd.f32 %v14959_v59, %v9239_v47  ;;  %v13599_v39 = vcombine.high %v13587_v24, %v13587_v24  ;;  %v13603_v30 = vcombine.high %v13590_v6, %v13590_v6  ;;  %v8865_v4 = vpop.permute.xlu1 %8864  ;;  %v14962_v47 = vld [vmem:[#allocation33_spill] sm:$0xff]  ;;  %v5270_v42 = vpop.f32.mrf.mxu1  ;;  %v9242_v13 = vadd.f32 %v8863_v62, %v12862_v0 }
 0x222   : > { %v5269_v41 = vadd.f32 %v5268_v33, %v14962_v47  ;;  %v9780_v3 = vadd.f32 %v13528_v2, %v9625_v46  ;;  %v8266_v63 = vcombine.low %v7594_v32, %v7595_v19  ;;  %v8267_v22 = vcombine.high %v7594_v32, %v7595_v19  ;;  %v7523_v46 = vpop.f32.mrf.mxu0 }
 0x223   : > { %14960 = vst [vmem:[#allocation41_spill] sm:$0xff] %v13599_v39  ;;  %14961 = vst [vmem:[#allocation31_spill] sm:$0xff] %v13603_v30  ;;  %v9778_v43 = vadd.f32 %v13522_v15, %v9623_v17  ;;  %v9243_v12 = vadd.f32 %v8865_v4, %v14953_v18  ;;  %v7596_v59 = vadd.f32 %v7519_v44, %v5267_v57  ;;  %v14963_v32 = vrot.slane %v12867_v55, 2 }
 0x224   : > { %v7597_v30 = vadd.f32 %v7521_v26, %v5269_v41  ;;  %v10034_v39 = vcombine.low %v9779_v20, %v9780_v3  ;;  %v13613_v33 = vrot.slane %v8266_v63, %v12824_v28  ;;  %v13616_v17 = vrot.slane %v8267_v22, %v12824_v28  ;;  %v8867_v24 = vpop.permute.xlu0 %8866  ;;  %v5272_v26 = vpop.f32.mrf.mxu1  ;;  %v14966_v22 = vld [vmem:[#allocation44_spill] sm:$0xff] }
 0x225   : > { %v10033_v6 = vcombine.low %v9777_v53, %v9778_v43  ;;  %v9627_v19 = vadd.f32 %v14963_v32, %v9243_v12  ;;  %v9626_v47 = vadd.f32 %v9370_v10, %v9242_v13  ;;  %v5271_v18 = vadd.f32 %v5270_v42, %v14964_v36  ;;  %v8869_v0 = vpop.permute.xlu1 %8868  ;;  %v14967_v13 = vld [vmem:[#allocation35_spill] sm:$0xff]  ;;  %v7525_v32 = vpop.f32.mrf.mxu0 }
 0x226   : > { %v8284_v4 = vcombine.low %v7596_v59, %v7597_v30  ;;  %v10048_v20 = vrot.slane %v10034_v39, %v12824_v28  ;;  %v13627_v53 = vcombine.high %v13613_v33, %v13613_v33  ;;  %v8285_v57 = vcombine.high %v7596_v59, %v7597_v30 }
 0x227   : > { %v10041_v44 = vrot.slane %v10033_v6, %v12824_v28  ;;  %v13631_v10 = vcombine.high %v13616_v17, %v13616_v17  ;;  %v9782_v36 = vadd.f32 %v13522_v15, %v9627_v19  ;;  %v9781_v62 = vadd.f32 %v14939_v37, %v9626_v47 }
 0x228   : > { %v13636_v6 = vrot.slane %v8284_v4, %v12824_v28  ;;  %v8651_v43 = vrot.slane %v8649_v1, 2  ;;  %v8652_v39 = vrot.slane %v13576_v38, 7  ;;  %v14965_v3 = vrot.slane %v13532_v48, 7 }
 0x229   : > { %v10049_v41 = vcombine.low %v10041_v44, %v10048_v20  ;;  %v10050_v30 = vcombine.low %v9781_v62, %v9782_v36  ;;  %v9372_v42 = vrot.slane %v14966_v22, 2  ;;  %v9244_v12 = vadd.f32 %v8867_v24, %v12867_v55  ;;  %v8873_v19 = vpop.permute.xlu1 %8872 }
 0x22a   : > { %v8648_v63 = vrot.slane %v14965_v3, 2  ;;  %v5273_v59 = vadd.f32 %v5272_v26, %v14967_v13  ;;  %v13645_v4 = vrot.slane %v8285_v57, %v12824_v28  ;;  %v8653_v44 = vsel %vm12857_vm1, %v8651_v43, %v8652_v39  ;;  %v8871_v3 = vpop.permute.xlu0 %8870  ;;  %v14969_v26 = vld [vmem:[#allocation42_spill] sm:$0xff]  ;;  %v14971_v39 = vld [vmem:[#allocation47_spill] sm:$0xff] }
 0x22b   : > { %v11159_v47 = vpack.c.bf16 %v10049_v41, %v10049_v41  ;;  %8980 = vrot.lane.b32.xlu1 %v8653_v44, %s11306_s10  ;;  %v9628_v55 = vadd.f32 %v9372_v42, %v9244_v12  ;;  %v13653_v24 = vadd.f32 %v7523_v46, %v5271_v18  ;;  %v9373_v36 = vrot.slane %v14969_v26, 2  ;;  %v14972_v42 = vld [vmem:[#allocation43_spill] sm:$0xff] }
 0x22c   : > { %v8650_v20 = vsel %vm12857_vm1, %v8648_v63, %v8649_v1  ;;  %v9245_v62 = vadd.f32 %v8869_v0, %v14966_v22  ;;  %v10058_v57 = vrot.slane %v10050_v30, %v12824_v28  ;;  %v13662_v1 = vadd.f32 %v7525_v32, %v5273_v59 }
 0x22d   : > { %8978 = vrot.lane.b32.xlu0 %v8650_v20, %s11306_s10  ;;  %14968 = vst [vmem:[#allocation32_spill] sm:$0xff] %v13653_v24  ;;  %10738 = vst.msk [vmem:[%s13657_s19] sm:$0xf] %vm10737_vm2, %v11159_v47  ;;  %v8656_v41 = vrot.slane %v13263_v45, 7  ;;  %v11112_v43 = vrot.slane %v13244_v21, 9  ;;  %v9783_v46 = vadd.f32 %v12913_v7, %v9628_v55  ;;  %v9375_v63 = vrot.slane %v14971_v39, 2  ;;  %v8877_v22 = vpop.permute.xlu1 %8876 }
 0x22e   : > { %14970 = vst [vmem:[#allocation33_spill] sm:$0xff] %v13662_v1  ;;  %v9629_v18 = vadd.f32 %v9373_v36, %v9245_v62  ;;  %v9247_v0 = vadd.f32 %v8873_v19, %v14972_v42  ;;  %v8302_v12 = vcombine.low %v13653_v24, %v13662_v1  ;;  %v8659_v30 = vrot.slane %v13247_v58, 7  ;;  %v8875_v32 = vpop.permute.xlu0 %8874  ;;  %v14973_v55 = vld [vmem:[#allocation48_spill] sm:$0xff] }
 0x22f   : > { %v8658_v13 = vrot.slane %v8656_v41, 2  ;;  %v8657_v59 = vsel %vm12857_vm1, %v11112_v43, %v8656_v41  ;;  %v9374_v20 = vrot.slane %v14972_v42, 2  ;;  %v9246_v19 = vadd.f32 %v8871_v3, %v14973_v55  ;;  %v14975_v55 = vld [vmem:[#allocation49_spill] sm:$0xff] }
 0x230   : > { %v9784_v47 = vadd.f32 %v13528_v2, %v9629_v18  ;;  %v9631_v44 = vadd.f32 %v9375_v63, %v9247_v0  ;;  %v13681_v36 = vrot.slane %v8302_v12, %v12824_v28  ;;  %v8662_v41 = vrot.slane %v13267_v61, 7  ;;  %v14976_v12 = vld [vmem:[#allocation45_spill] sm:$0xff]  ;;  %v14977_v61 = vld [vmem:[#allocation55_spill] sm:$0xff] }
 0x231   : > { %8982 = vrot.lane.b32.xlu0 %v8657_v59, %s11306_s10  ;;  %v8660_v62 = vsel %vm12857_vm1, %v8658_v13, %v8659_v30  ;;  %v9630_v63 = vadd.f32 %v9374_v20, %v9246_v19  ;;  %v8665_v42 = vrot.slane %v13271_v14, 7  ;;  %v8881_v3 = vpop.permute.xlu1 %8880  ;;  %v8661_v59 = vrot.slane %v8659_v30, 2 }
 0x232   : > { %14974 = vst [vmem:[#allocation34_spill] sm:$0xff] %v13681_v36  ;;  %v10051_v43 = vcombine.low %v9783_v46, %v9784_v47  ;;  %8984 = vrot.lane.b32.xlu1 %v8660_v62, %s11306_s10  ;;  %v9786_v18 = vadd.f32 %v13522_v15, %v9631_v44  ;;  %v8664_v0 = vrot.slane %v8662_v41, 2  ;;  %v9377_v26 = vrot.slane %v14975_v55, 2  ;;  %v8879_v1 = vpop.permute.xlu0 %8878 }
 0x233   : > { %v9249_v36 = vadd.f32 %v8877_v22, %v14976_v12  ;;  %v9785_v24 = vadd.f32 %v14939_v37, %v9630_v63  ;;  %v9376_v46 = vrot.slane %v14976_v12, 2  ;;  %v9248_v47 = vadd.f32 %v8875_v32, %v14971_v39 }
 0x234   : > { %v10065_v13 = vrot.slane %v10051_v43, %v12824_v28  ;;  %v8666_v44 = vsel %vm12857_vm1, %v8664_v0, %v8665_v42  ;;  %v8663_v20 = vsel %vm12857_vm1, %v8661_v59, %v8662_v41  ;;  %v8668_v19 = vrot.slane %v13303_v35, 7 }
 0x235   : > { %v9633_v30 = vadd.f32 %v9377_v26, %v9249_v36  ;;  %v10067_v22 = vcombine.low %v9785_v24, %v9786_v18  ;;  %8986 = vrot.lane.b32.xlu0 %v8663_v20, %s11306_s10  ;;  %v9632_v43 = vadd.f32 %v9376_v46, %v9248_v47  ;;  %v8671_v63 = vrot.slane %v13280_v52, 7  ;;  %v8885_v39 = vpop.permute.xlu1 %8884  ;;  %v14978_v18 = vld [vmem:[#allocation46_spill] sm:$0xff] }
 0x236   : > { %v10066_v62 = vcombine.low %v10058_v57, %v10065_v13  ;;  %8988 = vrot.lane.b32.xlu1 %v8666_v44, %s11306_s10  ;;  %v8670_v0 = vrot.slane %v8668_v19, 2  ;;  %v8667_v12 = vrot.slane %v8665_v42, 2  ;;  %v9379_v41 = vrot.slane %v14977_v61, 2  ;;  %v8883_v26 = vpop.permute.xlu0 %8882 }
 0x237   : > { %v9788_v32 = vadd.f32 %v13528_v2, %v9633_v30  ;;  %v10075_v57 = vrot.slane %v10067_v22, %v12824_v28  ;;  %v9787_v24 = vadd.f32 %v12913_v7, %v9632_v43  ;;  %v9251_v59 = vadd.f32 %v8881_v3, %v14978_v18 }
 0x238   : > { %v11160_v36 = vpack.c.bf16 %v10066_v62, %v10066_v62  ;;  %v8672_v13 = vsel %vm12857_vm1, %v8670_v0, %v8671_v63  ;;  %v8669_v46 = vsel %vm12857_vm1, %v8667_v12, %v8668_v19  ;;  %v9378_v47 = vrot.slane %v14978_v18, 2  ;;  %v14979_v0 = vld [vmem:[#allocation50_spill] sm:$0xff] }
 0x239   : > { %v9250_v42 = vadd.f32 %v8879_v1, %v14975_v55  ;;  %v10068_v44 = vcombine.low %v9787_v24, %v9788_v32  ;;  %8990 = vrot.lane.b32.xlu0 %v8669_v46, %s11306_s10  ;;  %v9635_v20 = vadd.f32 %v9379_v41, %v9251_v59  ;;  %v8674_v3 = vrot.slane %v13307_v8, 7  ;;  %v8889_v62 = vpop.permute.xlu1 %8888 }
 0x23a   : > { %10739 = vst.msk [vmem:[%s13657_s19 + $0x4] sm:$0xf] %vm10737_vm2, %v11160_v36  ;;  %8992 = vrot.lane.b32.xlu1 %v8672_v13, %s11306_s10  ;;  %v8677_v30 = vrot.slane %v13310_v25, 7  ;;  %v8673_v43 = vrot.slane %v8671_v63, 2  ;;  %v9381_v19 = vrot.slane %v13013_v49, 2  ;;  %v9253_v12 = vadd.f32 %v8885_v39, %v14979_v0  ;;  %v8887_v1 = vpop.permute.xlu0 %8886 }
 0x23b   : > { %v9634_v22 = vadd.f32 %v9378_v47, %v9250_v42  ;;  %v10082_v55 = vrot.slane %v10068_v44, %v12824_v28  ;;  %v9790_v32 = vadd.f32 %v13522_v15, %v9635_v20  ;;  %v8676_v36 = vrot.slane %v8674_v3, 2 }
 0x23c   : > { %v9380_v24 = vrot.slane %v14979_v0, 2  ;;  %v8675_v18 = vsel %vm12857_vm1, %v8673_v43, %v8674_v3  ;;  %v9637_v59 = vadd.f32 %v9381_v19, %v9253_v12  ;;  %v9252_v63 = vadd.f32 %v8883_v26, %v14977_v61 }
 0x23d   : > { %v9789_v41 = vadd.f32 %v14939_v37, %v9634_v22  ;;  %v10083_v13 = vcombine.low %v10075_v57, %v10082_v55  ;;  %v8678_v49 = vsel %vm12857_vm1, %v8676_v36, %v8677_v30  ;;  %8994 = vrot.lane.b32.xlu0 %v8675_v18, %s11306_s10  ;;  %v13734_v39 = vcombine.high %v13315_v11, %v13315_v11  ;;  %v8893_v47 = vpop.permute.xlu1 %8892 }
 0x23e   : > { %v8681_v46 = vrot.slane %v13315_v11, 7  ;;  %8996 = vrot.lane.b32.xlu1 %v8678_v49, %s11306_s10  ;;  %v9792_v44 = vadd.f32 %v13528_v2, %v9637_v59  ;;  %v9636_v61 = vadd.f32 %v9380_v24, %v9252_v63  ;;  %v13741_v26 = vcombine.high %v13310_v25, %v13310_v25  ;;  %v8891_v57 = vpop.permute.xlu0 %8890  ;;  %v14980_v49 = vld [vmem:[#allocation51_spill] sm:$0xff] }
 0x23f   : > { %v10084_v42 = vcombine.low %v9789_v41, %v9790_v32  ;;  %v11161_v20 = vpack.c.bf16 %v10083_v13, %v10083_v13  ;;  %v8684_v30 = vrot.slane %v13734_v39, 7  ;;  %v9383_v22 = vrot.slane %v12962_v34, 2 }
 0x240   : > { %v8683_v3 = vrot.slane %v8681_v46, 2  ;;  %v9791_v19 = vadd.f32 %v12913_v7, %v9636_v61  ;;  %v11113_v0 = vrot.slane %v13741_v26, 9  ;;  %v9255_v12 = vadd.f32 %v8889_v62, %v12959_v54 }
 0x241   : > { %v10092_v43 = vrot.slane %v10084_v42, %v12824_v28  ;;  %10740 = vst.msk [vmem:[%s13657_s19 + $0x8] sm:$0xf] %vm10737_vm2, %v11161_v20  ;;  %v9382_v32 = vrot.slane %v12959_v54, 2  ;;  %v9254_v36 = vadd.f32 %v8887_v1, %v12931_v29  ;;  %v13757_v24 = vcombine.high %v13326_v23, %v13326_v23  ;;  %v8897_v41 = vpop.permute.xlu1 %8896 }
 0x242   : > { %v8685_v55 = vsel %vm12857_vm1, %v8683_v3, %v8684_v30  ;;  %v10085_v18 = vcombine.low %v9791_v19, %v9792_v44  ;;  %v8682_v62 = vsel %vm12857_vm1, %v11113_v0, %v8681_v46  ;;  %v9639_v59 = vadd.f32 %v9383_v22, %v9255_v12  ;;  %v8895_v13 = vpop.permute.xlu0 %8894  ;;  %v14981_v3 = vld [vmem:[#allocation52_spill] sm:$0xff] }
 0x243   : > { %9000 = vrot.lane.b32.xlu1 %v8685_v55, %s11306_s10  ;;  %v8687_v63 = vrot.slane %v13326_v23, 7  ;;  %8998 = vrot.lane.b32.xlu0 %v8682_v62, %s11306_s10  ;;  %v9638_v54 = vadd.f32 %v9382_v32, %v9254_v36  ;;  %v8690_v29 = vrot.slane %v13757_v24, 7  ;;  %v8686_v1 = vrot.slane %v8684_v30, 2 }
 0x244   : > { %v9385_v42 = vrot.slane %v14980_v49, 2  ;;  %v10099_v61 = vrot.slane %v10085_v18, %v12824_v28  ;;  %v9794_v44 = vadd.f32 %v13522_v15, %v9639_v59  ;;  %v9257_v19 = vadd.f32 %v8893_v47, %v14981_v3 }
 0x245   : > { %v8689_v20 = vrot.slane %v8687_v63, 2  ;;  %v9793_v46 = vadd.f32 %v14939_v37, %v9638_v54  ;;  %v8688_v22 = vsel %vm12857_vm1, %v8686_v1, %v8687_v63  ;;  %v9384_v0 = vrot.slane %v14981_v3, 2  ;;  %v8901_v55 = vpop.permute.xlu1 %8900  ;;  %v14983_v1 = vld [vmem:[#allocation53_spill] sm:$0xff] }
 0x246   : > { %v9256_v12 = vadd.f32 %v8891_v57, %v12962_v34  ;;  %v10100_v30 = vcombine.low %v10092_v43, %v10099_v61  ;;  %v9641_v36 = vadd.f32 %v9385_v42, %v9257_v19  ;;  %v13778_v18 = vcombine.high %v13329_v40, %v13329_v40  ;;  %v8899_v47 = vpop.permute.xlu0 %8898 }
 0x247   : > { %v8691_v32 = vsel %vm12857_vm1, %v8689_v20, %v8690_v29  ;;  %v10101_v62 = vcombine.low %v9793_v46, %v9794_v44  ;;  %9002 = vrot.lane.b32.xlu0 %v8688_v22, %s11306_s10  ;;  %v8693_v34 = vrot.slane %v13329_v40, 7  ;;  %v8692_v57 = vrot.slane %v8690_v29, 2  ;;  %v14984_v46 = vld [vmem:[#allocation54_spill] sm:$0xff] }
 0x248   : > { %14982 = vst [vmem:[#allocation44_spill] sm:$0xff] %v13778_v18  ;;  %9004 = vrot.lane.b32.xlu1 %v8691_v32, %s11306_s10  ;;  %v9640_v59 = vadd.f32 %v9384_v0, %v9256_v12  ;;  %v11162_v43 = vpack.c.bf16 %v10100_v30, %v10100_v30  ;;  %v9796_v63 = vadd.f32 %v13528_v2, %v9641_v36  ;;  %v8696_v54 = vrot.slane %v13778_v18, 7  ;;  %v14985_v12 = vld [vmem:[#allocation10_spill] sm:$0xff] }
 0x249   : > { %v9387_v42 = vrot.slane %v14983_v1, 2  ;;  %v10109_v61 = vrot.slane %v10101_v62, %v12824_v28  ;;  %v8695_v44 = vrot.slane %v8693_v34, 2  ;;  %v8694_v3 = vsel %vm12857_vm1, %v8692_v57, %v8693_v34  ;;  %v8905_v19 = vpop.permute.xlu1 %8904 }
 0x24a   : > { %v9795_v20 = vadd.f32 %v12913_v7, %v9640_v59  ;;  %10741 = vst.msk [vmem:[%s13657_s19 + $0xc] sm:$0xf] %vm10737_vm2, %v11162_v43  ;;  %v9259_v29 = vadd.f32 %v8897_v41, %v14984_v46  ;;  %v9386_v22 = vrot.slane %v14984_v46, 2  ;;  %v9258_v0 = vadd.f32 %v8895_v13, %v14980_v49  ;;  %v8903_v32 = vpop.permute.xlu0 %8902  ;;  %v14986_v49 = vld [vmem:[#allocation56_spill] sm:$0xff] }
 0x24b   : > { %v13797_v30 = vcombine.high %v14985_v12, %v14985_v12  ;;  %v8697_v62 = vsel %vm12857_vm1, %v8695_v44, %v8696_v54  ;;  %9006 = vrot.lane.b32.xlu0 %v8694_v3, %s11306_s10  ;;  %v8699_v59 = vrot.slane %v14985_v12, 7  ;;  %v8698_v34 = vrot.slane %v8696_v54, 2 }
 0x24c   : > { %v10102_v36 = vcombine.low %v9795_v20, %v9796_v63  ;;  %9008 = vrot.lane.b32.xlu1 %v8697_v62, %s11306_s10  ;;  %v9643_v41 = vadd.f32 %v9387_v42, %v9259_v29  ;;  %v9642_v57 = vadd.f32 %v9386_v22, %v9258_v0  ;;  %v9389_v43 = vrot.slane %v14986_v49, 2  ;;  %v14987_v20 = vld [vmem:[#allocation57_spill] sm:$0xff]  ;;  %v14988_v49 = vld [vmem:[#allocation72_spill] sm:$0xff] }
 0x24d   : > { %v8702_v13 = vrot.slane %v13797_v30, 7  ;;  %v8701_v18 = vrot.slane %v8699_v59, 2  ;;  %v8700_v63 = vsel %vm12857_vm1, %v8698_v34, %v8699_v59  ;;  %v9261_v44 = vadd.f32 %v8901_v55, %v14987_v20  ;;  %v8909_v3 = vpop.permute.xlu1 %8908 }
 0x24e   : > { %v10116_v46 = vrot.slane %v10102_v36, %v12824_v28  ;;  %v9798_v12 = vadd.f32 %v13522_v15, %v9643_v41  ;;  %v9797_v54 = vadd.f32 %v14939_v37, %v9642_v57  ;;  %v9388_v42 = vrot.slane %v14987_v20, 2  ;;  %v8907_v22 = vpop.permute.xlu0 %8906 }
 0x24f   : > { %v9260_v29 = vadd.f32 %v8899_v47, %v14983_v1  ;;  %v8703_v36 = vsel %vm12857_vm1, %v8701_v18, %v8702_v13  ;;  %9010 = vrot.lane.b32.xlu0 %v8700_v63, %s11306_s10  ;;  %v9645_v62 = vadd.f32 %v9389_v43, %v9261_v44  ;;  %v8706_v59 = vrot.slane %v13372_v50, 7  ;;  %v14989_v63 = vld [vmem:[#allocation58_spill] sm:$0xff] }
 0x250   : > { %v10117_v0 = vcombine.low %v10109_v61, %v10116_v46  ;;  %v10118_v55 = vcombine.low %v9797_v54, %v9798_v12  ;;  %9012 = vrot.lane.b32.xlu1 %v8703_v36, %s11306_s10  ;;  %v8709_v41 = vrot.slane %v13363_v9, 7  ;;  %v11114_v57 = vrot.slane %v13353_v51, 9 }
 0x251   : > { %v9644_v34 = vadd.f32 %v9388_v42, %v9260_v29  ;;  %v9800_v1 = vadd.f32 %v13528_v2, %v9645_v62  ;;  %v8708_v61 = vrot.slane %v8706_v59, 2  ;;  %v9391_v18 = vrot.slane %v14988_v49, 2  ;;  %v8913_v13 = vpop.permute.xlu1 %8912  ;;  %v14990_v29 = vld [vmem:[#allocation73_spill] sm:$0xff] }
 0x252   : > { %v11163_v47 = vpack.c.bf16 %v10117_v0, %v10117_v0  ;;  %v10126_v43 = vrot.slane %v10118_v55, %v12824_v28  ;;  %v8707_v12 = vsel %vm12857_vm1, %v11114_v57, %v8706_v59  ;;  %v9263_v20 = vadd.f32 %v8905_v19, %v14989_v63  ;;  %v8911_v44 = vpop.permute.xlu0 %8910 }
 0x253   : > { %v9799_v46 = vadd.f32 %v12913_v7, %v9644_v34  ;;  %v8710_v54 = vsel %vm12857_vm1, %v8708_v61, %v8709_v41  ;;  %9014 = vrot.lane.b32.xlu0 %v8707_v12, %s11306_s10  ;;  %v9390_v42 = vrot.slane %v14989_v63, 2  ;;  %v9262_v0 = vadd.f32 %v8903_v32, %v14990_v29  ;;  %v14992_v61 = vld [vmem:[#allocation59_spill] sm:$0xff] }
 0x254   : > { %10742 = vst.msk [vmem:[%s13657_s19 + $0x10] sm:$0xf] %vm10737_vm2, %v11163_v47  ;;  %v8712_v36 = vrot.slane %v13384_v27, 7  ;;  %9016 = vrot.lane.b32.xlu1 %v8710_v54, %s11306_s10  ;;  %v9647_v59 = vadd.f32 %v9391_v18, %v9263_v20  ;;  %v8715_v19 = vrot.slane %v13366_v31, 7  ;;  %v8711_v55 = vrot.slane %v8709_v41, 2  ;;  %v14991_v47 = vld [vmem:[#allocation74_spill] sm:$0xff] }
 0x255   : > { %v10119_v62 = vcombine.low %v9799_v46, %v9800_v1  ;;  %v9646_v34 = vadd.f32 %v9390_v42, %v9262_v0  ;;  %v9393_v9 = vrot.slane %v14991_v47, 2  ;;  %v9265_v51 = vadd.f32 %v8909_v3, %v14992_v61  ;;  %v8917_v12 = vpop.permute.xlu1 %8916 }
 0x256   : > { %v8714_v57 = vrot.slane %v8712_v36, 2  ;;  %v9802_v32 = vadd.f32 %v13522_v15, %v9647_v59  ;;  %v8713_v1 = vsel %vm12857_vm1, %v8711_v55, %v8712_v36  ;;  %v9392_v46 = vrot.slane %v14992_v61, 2  ;;  %v8915_v18 = vpop.permute.xlu0 %8914 }
 0x257   : > { %v10133_v63 = vrot.slane %v10119_v62, %v12824_v28  ;;  %v9801_v20 = vadd.f32 %v14939_v37, %v9646_v34  ;;  %9018 = vrot.lane.b32.xlu0 %v8713_v1, %s11306_s10  ;;  %v9649_v54 = vadd.f32 %v9393_v9, %v9265_v51  ;;  %v9264_v3 = vadd.f32 %v8907_v22, %v14988_v49  ;;  %v14993_v34 = vld [vmem:[#allocation79_spill] sm:$0xff]  ;;  %v14994_v22 = vld [vmem:[#allocation60_spill] sm:$0xff] }
 0x258   : > { %v8716_v41 = vsel %vm12857_vm1, %v8714_v57, %v8715_v19  ;;  %v8718_v29 = vrot.slane %v13388_v60, 7  ;;  %v8721_v0 = vrot.slane %v13392_v56, 7  ;;  %v8717_v36 = vrot.slane %v8715_v19, 2 }
 0x259   : > { %v10134_v42 = vcombine.low %v10126_v43, %v10133_v63  ;;  %9020 = vrot.lane.b32.xlu1 %v8716_v41, %s11306_s10  ;;  %v10135_v62 = vcombine.low %v9801_v20, %v9802_v32  ;;  %v9804_v59 = vadd.f32 %v13528_v2, %v9649_v54  ;;  %v9648_v55 = vadd.f32 %v9392_v46, %v9264_v3  ;;  %v8921_v61 = vpop.permute.xlu1 %8920  ;;  %v14995_v54 = vld [vmem:[#allocation17_spill] sm:$0xff] }
 0x25a   : > { %v9395_v57 = vrot.slane %v14993_v34, 2  ;;  %v8720_v9 = vrot.slane %v8718_v29, 2  ;;  %v8719_v51 = vsel %vm12857_vm1, %v8717_v36, %v8718_v29  ;;  %v9267_v49 = vadd.f32 %v8913_v13, %v14994_v22  ;;  %v8919_v43 = vpop.permute.xlu0 %8918  ;;  %v14996_v13 = vld [vmem:[#allocation16_spill] sm:$0xff] }
 0x25b   : > { %v11164_v1 = vpack.c.bf16 %v10134_v42, %v10134_v42  ;;  %v10143_v63 = vrot.slane %v10135_v62, %v12824_v28  ;;  %v9803_v19 = vadd.f32 %v12913_v7, %v9648_v55  ;;  %9022 = vrot.lane.b32.xlu0 %v8719_v51, %s11306_s10  ;;  %v9394_v32 = vrot.slane %v14994_v22, 2  ;;  %v14997_v55 = vld [vmem:[#allocation83_spill] sm:$0xff] }
 0x25c   : > { %v9266_v46 = vadd.f32 %v8911_v44, %v14991_v47  ;;  %v8722_v20 = vsel %vm12857_vm1, %v8720_v9, %v8721_v0  ;;  %v9651_v41 = vadd.f32 %v9395_v57, %v9267_v49  ;;  %v8724_v3 = vrot.slane %v14995_v54, 7 }
 0x25d   : > { %10743 = vst.msk [vmem:[%s13657_s19 + $0x14] sm:$0xf] %vm10737_vm2, %v11164_v1  ;;  %v8727_v42 = vrot.slane %v14996_v13, 7  ;;  %v10136_v29 = vcombine.low %v9803_v19, %v9804_v59  ;;  %9024 = vrot.lane.b32.xlu1 %v8722_v20, %s11306_s10  ;;  %v8723_v62 = vrot.slane %v8721_v0, 2  ;;  %v9397_v51 = vrot.slane %v14997_v55, 2  ;;  %v8925_v22 = vpop.permute.xlu1 %8924  ;;  %v14998_v1 = vld [vmem:[#allocation63_spill] sm:$0xff] }
 0x25e   : > { %v9650_v36 = vadd.f32 %v9394_v32, %v9266_v46  ;;  %v9806_v44 = vadd.f32 %v13522_v15, %v9651_v41  ;;  %v8726_v47 = vrot.slane %v8724_v3, 2  ;;  %v9269_v56 = vadd.f32 %v8917_v12, %v14998_v1  ;;  %v8923_v57 = vpop.permute.xlu0 %8922  ;;  %v14999_v46 = vld [vmem:[#allocation18_spill] sm:$0xff] }
 0x25f   : > { %v9396_v9 = vrot.slane %v14998_v1, 2  ;;  %v10150_v49 = vrot.slane %v10136_v29, %v12824_v28  ;;  %v8725_v59 = vsel %vm12857_vm1, %v8723_v62, %v8724_v3  ;;  %v9268_v0 = vadd.f32 %v8915_v18, %v14993_v34  ;;  %v15002_v62 = vld [vmem:[#allocation62_spill] sm:$0xff] }
 0x260   : > { %v9805_v54 = vadd.f32 %v14939_v37, %v9650_v36  ;;  %v8728_v19 = vsel %vm12857_vm1, %v8726_v47, %v8727_v42  ;;  %9026 = vrot.lane.b32.xlu0 %v8725_v59, %s11306_s10  ;;  %v9653_v32 = vadd.f32 %v9397_v51, %v9269_v56  ;;  %v13884_v12 = vcombine.high %v14999_v46, %v14999_v46 }
 0x261   : > { %v8731_v20 = vrot.slane %v14999_v46, 7  ;;  %v10151_v41 = vcombine.low %v10143_v63, %v10150_v49  ;;  %9028 = vrot.lane.b32.xlu1 %v8728_v19, %s11306_s10  ;;  %v9652_v36 = vadd.f32 %v9396_v9, %v9268_v0  ;;  %v13890_v18 = vcombine.high %v14996_v13, %v14996_v13  ;;  %v8929_v34 = vpop.permute.xlu1 %8928  ;;  %v15003_v9 = vld [vmem:[#allocation64_spill] sm:$0xff]  ;;  %v15004_v0 = vld [vmem:[#allocation61_spill] sm:$0xff] }
 0x262   : > { %15000 = vst [vmem:[#allocation35_spill] sm:$0xff] %v13884_v12  ;;  %v10152_v29 = vcombine.low %v9805_v54, %v9806_v44  ;;  %v9808_v3 = vadd.f32 %v13528_v2, %v9653_v32  ;;  %v8734_v42 = vrot.slane %v13884_v12, 7  ;;  %v9399_v55 = vrot.slane %v15002_v62, 2  ;;  %v8927_v51 = vpop.permute.xlu0 %8926 }
 0x263   : > { %15001 = vst [vmem:[#allocation42_spill] sm:$0xff] %v13890_v18  ;;  %v8733_v56 = vrot.slane %v8731_v20, 2  ;;  %v11165_v47 = vpack.c.bf16 %v10151_v41, %v10151_v41  ;;  %v9807_v54 = vadd.f32 %v12913_v7, %v9652_v36  ;;  %v11115_v44 = vrot.slane %v13890_v18, 9 }
 0x264   : > { %v10160_v63 = vrot.slane %v10152_v29, %v12824_v28  ;;  %v9271_v49 = vadd.f32 %v8921_v61, %v15003_v9  ;;  %v9398_v59 = vrot.slane %v15003_v9, 2  ;;  %v9270_v19 = vadd.f32 %v8919_v43, %v15004_v0  ;;  %v15005_v29 = vld [vmem:[#allocation95_spill] sm:$0xff]  ;;  %v15007_v0 = vld [vmem:[#allocation66_spill] sm:$0xff] }
 0x265   : > { %v8735_v1 = vsel %vm12857_vm1, %v8733_v56, %v8734_v42  ;;  %10744 = vst.msk [vmem:[%s13657_s19 + $0x18] sm:$0xf] %vm10737_vm2, %v11165_v47  ;;  %v10153_v32 = vcombine.low %v9807_v54, %v9808_v3  ;;  %v8732_v41 = vsel %vm12857_vm1, %v11115_v44, %v8731_v20  ;;  %v13910_v36 = vcombine.high %v15005_v29, %v15005_v29  ;;  %v8933_v18 = vpop.permute.xlu1 %8932  ;;  %v15008_v44 = vld [vmem:[#allocation65_spill] sm:$0xff] }
 0x266   : > { %9032 = vrot.lane.b32.xlu1 %v8735_v1, %s11306_s10  ;;  %v8737_v56 = vrot.slane %v15005_v29, 7  ;;  %9030 = vrot.lane.b32.xlu0 %v8732_v41, %s11306_s10  ;;  %v9655_v61 = vadd.f32 %v9399_v55, %v9271_v49  ;;  %v9654_v9 = vadd.f32 %v9398_v59, %v9270_v19  ;;  %v8736_v43 = vrot.slane %v8734_v42, 2  ;;  %v8931_v3 = vpop.permute.xlu0 %8930 }
 0x267   : > { %15006 = vst [vmem:[#allocation47_spill] sm:$0xff] %v13910_v36  ;;  %v9401_v47 = vrot.slane %v15007_v0, 2  ;;  %v10167_v54 = vrot.slane %v10153_v32, %v12824_v28  ;;  %v8740_v20 = vrot.slane %v13910_v36, 7  ;;  %v9273_v46 = vadd.f32 %v8925_v22, %v15008_v44  ;;  %v15009_v22 = vld [vmem:[#allocation20_spill] sm:$0xff] }
 0x268   : > { %v8739_v1 = vrot.slane %v8737_v56, 2  ;;  %v9810_v12 = vadd.f32 %v13522_v15, %v9655_v61  ;;  %v9809_v29 = vadd.f32 %v14939_v37, %v9654_v9  ;;  %v8738_v41 = vsel %vm12857_vm1, %v8736_v43, %v8737_v56 }
 0x269   : > { %v9400_v55 = vrot.slane %v15008_v44, 2  ;;  %v10168_v42 = vcombine.low %v10160_v63, %v10167_v54  ;;  %v9657_v59 = vadd.f32 %v9401_v47, %v9273_v46  ;;  %v9272_v19 = vadd.f32 %v8923_v57, %v15002_v62  ;;  %v8937_v32 = vpop.permute.xlu1 %8936  ;;  %v15011_v57 = vld [vmem:[#allocation67_spill] sm:$0xff] }
 0x26a   : > { %v8741_v49 = vsel %vm12857_vm1, %v8739_v1, %v8740_v20  ;;  %v10169_v36 = vcombine.low %v9809_v29, %v9810_v12  ;;  %9034 = vrot.lane.b32.xlu0 %v8738_v41, %s11306_s10  ;;  %v13930_v61 = vcombine.high %v15009_v22, %v15009_v22  ;;  %v8743_v56 = vrot.slane %v15009_v22, 7  ;;  %v8935_v9 = vpop.permute.xlu0 %8934  ;;  %v15016_v22 = vld [vmem:[#allocation69_spill] sm:$0xff] }
 0x26b   : > { %9036 = vrot.lane.b32.xlu1 %v8741_v49, %s11306_s10  ;;  %v8742_v63 = vrot.slane %v8740_v20, 2  ;;  %v11166_v43 = vpack.c.bf16 %v10168_v42, %v10168_v42  ;;  %v9812_v46 = vadd.f32 %v13528_v2, %v9657_v59  ;;  %v9656_v47 = vadd.f32 %v9400_v55, %v9272_v19  ;;  %v15012_v20 = vld [vmem:[#allocation68_spill] sm:$0xff]  ;;  %v15013_v59 = vld [vmem:[#allocation21_spill] sm:$0xff] }
 0x26c   : > { %15010 = vst [vmem:[#allocation43_spill] sm:$0xff] %v13930_v61  ;;  %v9403_v62 = vrot.slane %v15011_v57, 2  ;;  %v10177_v12 = vrot.slane %v10169_v36, %v12824_v28  ;;  %v8745_v29 = vrot.slane %v8743_v56, 2  ;;  %v8746_v54 = vrot.slane %v13930_v61, 7 }
 0x26d   : > { %v8744_v1 = vsel %vm12857_vm1, %v8742_v63, %v8743_v56  ;;  %10745 = vst.msk [vmem:[%s13657_s19 + $0x1c] sm:$0xf] %vm10737_vm2, %v11166_v43  ;;  %v9811_v44 = vadd.f32 %v12913_v7, %v9656_v47  ;;  %v9275_v41 = vadd.f32 %v8929_v34, %v15012_v20  ;;  %v9402_v42 = vrot.slane %v15012_v20, 2  ;;  %v8941_v49 = vpop.permute.xlu1 %8940 }
 0x26e   : > { %v9274_v55 = vadd.f32 %v8927_v51, %v15007_v0  ;;  %v8747_v36 = vsel %vm12857_vm1, %v8745_v29, %v8746_v54  ;;  %9038 = vrot.lane.b32.xlu0 %v8744_v1, %s11306_s10  ;;  %v13950_v19 = vcombine.high %v15013_v59, %v15013_v59  ;;  %v8749_v56 = vrot.slane %v15013_v59, 7  ;;  %v8939_v43 = vpop.permute.xlu0 %8938  ;;  %v15015_v51 = vld [vmem:[#allocation70_spill] sm:$0xff] }
 0x26f   : > { %v8748_v63 = vrot.slane %v8746_v54, 2  ;;  %v10170_v47 = vcombine.low %v9811_v44, %v9812_v46  ;;  %9040 = vrot.lane.b32.xlu1 %v8747_v36, %s11306_s10  ;;  %v9659_v34 = vadd.f32 %v9403_v62, %v9275_v41  ;;  %v9405_v0 = vrot.slane %v15015_v51, 2  ;;  %v15017_v36 = vld [vmem:[#allocation38_spill] sm:$0xff] }
 0x270   : > { %15014 = vst [vmem:[#allocation48_spill] sm:$0xff] %v13950_v19  ;;  %v9658_v20 = vadd.f32 %v9402_v42, %v9274_v55  ;;  %v8751_v61 = vrot.slane %v8749_v56, 2  ;;  %v8752_v29 = vrot.slane %v13950_v19, 7  ;;  %v9277_v13 = vadd.f32 %v8933_v18, %v15016_v22 }
 0x271   : > { %v8750_v1 = vsel %vm12857_vm1, %v8748_v63, %v8749_v56  ;;  %v10184_v60 = vrot.slane %v10170_v47, %v12824_v28  ;;  %v9814_v54 = vadd.f32 %v13522_v15, %v9659_v34  ;;  %v9404_v44 = vrot.slane %v15016_v22, 2  ;;  %v8945_v62 = vpop.permute.xlu1 %8944  ;;  %v15018_v34 = vld [vmem:[#allocation97_spill] sm:$0xff]  ;;  %v15019_v22 = vld [vmem:[#allocation96_spill] sm:$0xff] }
 0x272   : > { %v9813_v46 = vadd.f32 %v14939_v37, %v9658_v20  ;;  %v8753_v41 = vsel %vm12857_vm1, %v8751_v61, %v8752_v29  ;;  %9042 = vrot.lane.b32.xlu0 %v8750_v1, %s11306_s10  ;;  %v9661_v42 = vadd.f32 %v9405_v0, %v9277_v13  ;;  %v9276_v55 = vadd.f32 %v8931_v3, %v15011_v57  ;;  %v13968_v18 = vpop.permute.xlu0 %8942  ;;  %v15020_v13 = vld [vmem:[#allocation6_spill] sm:$0xff] }
 0x273   : > { %v8756_v56 = vrot.slane %v15017_v36, 7  ;;  %v10185_v63 = vcombine.low %v10177_v12, %v10184_v60  ;;  %9044 = vrot.lane.b32.xlu1 %v8753_v41, %s11306_s10  ;;  %v8759_v20 = vrot.slane %v15018_v34, 7  ;;  %v11116_v51 = vrot.slane %v15019_v22, 9  ;;  %v15021_v12 = vld [vmem:[#allocation71_spill] sm:$0xff] }
 0x274   : > { %v10186_v47 = vcombine.low %v9813_v46, %v9814_v54  ;;  %v9816_v61 = vadd.f32 %v13528_v2, %v9661_v42  ;;  %v9660_v29 = vadd.f32 %v9404_v44, %v9276_v55  ;;  %v9407_v0 = vrot.slane %v15020_v13, 2  ;;  %v15022_v42 = vld [vmem:[#allocation94_spill] sm:$0xff] }
 0x275   : > { %v8758_v1 = vrot.slane %v8756_v56, 2  ;;  %v11167_v3 = vpack.c.bf16 %v10185_v63, %v10185_v63  ;;  %v8757_v60 = vsel %vm12857_vm1, %v11116_v51, %v8756_v56  ;;  %v9279_v54 = vadd.f32 %v8937_v32, %v15021_v12  ;;  %v8949_v46 = vpop.permute.xlu1 %8948  ;;  %v15024_v51 = vld [vmem:[#allocation23_spill] sm:$0xff] }
 0x276   : > { %v10194_v57 = vrot.slane %v10186_v47, %v12824_v28  ;;  %v9815_v41 = vadd.f32 %v12913_v7, %v9660_v29  ;;  %9046 = vrot.lane.b32.xlu0 %v8757_v60, %s11306_s10  ;;  %v9406_v44 = vrot.slane %v15021_v12, 2  ;;  %v9278_v55 = vadd.f32 %v8935_v9, %v15022_v42  ;;  %v8947_v63 = vpop.permute.xlu0 %8946  ;;  %v15023_v47 = vld [vmem:[#allocation24_spill] sm:$0xff]  ;;  %v15026_v60 = vld [vmem:[#allocation75_spill] sm:$0xff] }
 0x277   : > { %v8760_v34 = vsel %vm12857_vm1, %v8758_v1, %v8759_v20  ;;  %10746 = vst.msk [vmem:[%s13657_s19 + $0x20] sm:$0xf] %vm10737_vm2, %v11167_v3  ;;  %v9663_v56 = vadd.f32 %v9407_v0, %v9279_v54  ;;  %v8762_v32 = vrot.slane %v15023_v47, 7  ;;  %v8765_v22 = vrot.slane %v15024_v51, 7  ;;  %v15025_v1 = vld [vmem:[#allocation7_spill] sm:$0xff]  ;;  %v15027_v42 = vld [vmem:[#allocation100_spill] sm:$0xff] }
 0x278   : > { %9048 = vrot.lane.b32.xlu1 %v8760_v34, %s11306_s10  ;;  %v8761_v29 = vrot.slane %v8759_v20, 2  ;;  %v10187_v36 = vcombine.low %v9815_v41, %v9816_v61  ;;  %v9662_v19 = vadd.f32 %v9406_v44, %v9278_v55  ;;  %v9409_v59 = vrot.slane %v15025_v1, 2 }
 0x279   : > { %v9281_v27 = vadd.f32 %v8941_v49, %v15026_v60  ;;  %v9818_v12 = vadd.f32 %v13522_v15, %v9663_v56  ;;  %v8764_v9 = vrot.slane %v8762_v32, 2  ;;  %v9408_v34 = vrot.slane %v15026_v60, 2  ;;  %v13996_v0 = vpop.permute.xlu1 %8952  ;;  %v15028_v56 = vld [vmem:[#allocation99_spill] sm:$0xff] }
 0x27a   : > { %v8763_v3 = vsel %vm12857_vm1, %v8761_v29, %v8762_v32  ;;  %v10201_v54 = vrot.slane %v10187_v36, %v12824_v28  ;;  %v9817_v20 = vadd.f32 %v14939_v37, %v9662_v19  ;;  %v9280_v41 = vadd.f32 %v8939_v43, %v15020_v13  ;;  %v14002_v49 = vpop.permute.xlu0 %8950  ;;  %v15029_v43 = vld [vmem:[#allocation8_spill] sm:$0xff] }
 0x27b   : > { %9050 = vrot.lane.b32.xlu0 %v8763_v3, %s11306_s10  ;;  %v9665_v61 = vadd.f32 %v9409_v59, %v9281_v27  ;;  %v8766_v44 = vsel %vm12857_vm1, %v8764_v9, %v8765_v22  ;;  %v8768_v55 = vrot.slane %v15027_v42, 7  ;;  %v8771_v32 = vrot.slane %v15028_v56, 7  ;;  %v15030_v9 = vld [vmem:[#allocation76_spill] sm:$0xff] }
 0x27c   : > { %v8767_v29 = vrot.slane %v8765_v22, 2  ;;  %v10202_v60 = vcombine.low %v10194_v57, %v10201_v54  ;;  %v10203_v51 = vcombine.low %v9817_v20, %v9818_v12  ;;  %9052 = vrot.lane.b32.xlu1 %v8766_v44, %s11306_s10  ;;  %v9664_v36 = vadd.f32 %v9408_v34, %v9280_v41  ;;  %v15032_v44 = vld [vmem:[#allocation26_spill] sm:$0xff] }
 0x27d   : > { %v9820_v19 = vadd.f32 %v13528_v2, %v9665_v61  ;;  %v8770_v27 = vrot.slane %v8768_v55, 2  ;;  %v9411_v13 = vrot.slane %v15029_v43, 2  ;;  %v9283_v3 = vadd.f32 %v8945_v62, %v15030_v9  ;;  %v14014_v42 = vpop.permute.xlu1 %8956  ;;  %v15031_v61 = vld [vmem:[#allocation25_spill] sm:$0xff] }
 0x27e   : > { %v8769_v59 = vsel %vm12857_vm1, %v8767_v29, %v8768_v55  ;;  %v11168_v56 = vpack.c.bf16 %v10202_v60, %v10202_v60  ;;  %v10211_v22 = vrot.slane %v10203_v51, %v12824_v28  ;;  %v9819_v57 = vadd.f32 %v12913_v7, %v9664_v36  ;;  %v14020_v34 = vpop.permute.xlu0 %8954  ;;  %v15033_v60 = vld [vmem:[#allocation9_spill] sm:$0xff] }
 0x27f   : > { %9054 = vrot.lane.b32.xlu0 %v8769_v59, %s11306_s10  ;;  %v9410_v12 = vrot.slane %v15030_v9, 2  ;;  %v8772_v54 = vsel %vm12857_vm1, %v8770_v27, %v8771_v32  ;;  %v9667_v20 = vadd.f32 %v9411_v13, %v9283_v3  ;;  %v9282_v62 = vadd.f32 %v13968_v18, %v15025_v1  ;;  %v15034_v13 = vld [vmem:[#allocation78_spill] sm:$0xff] }
 0x280   : > { %v8774_v41 = vrot.slane %v15031_v61, 7  ;;  %10747 = vst.msk [vmem:[%s13657_s19 + $0x24] sm:$0xf] %vm10737_vm2, %v11168_v56  ;;  %v10204_v51 = vcombine.low %v9819_v57, %v9820_v19  ;;  %9056 = vrot.lane.b32.xlu1 %v8772_v54, %s11306_s10  ;;  %v8777_v55 = vrot.slane %v15032_v44, 7  ;;  %v8773_v29 = vrot.slane %v8771_v32, 2  ;;  %v15035_v54 = vld [vmem:[#allocation101_spill] sm:$0xff] }
 0x281   : > { %v9413_v36 = vrot.slane %v15033_v60, 2  ;;  %v9822_v59 = vadd.f32 %v13522_v15, %v9667_v20  ;;  %v9666_v9 = vadd.f32 %v9410_v12, %v9282_v62  ;;  %v9285_v3 = vadd.f32 %v8949_v46, %v15034_v13  ;;  %v14034_v47 = vpop.permute.xlu1 %8960 }
 0x282   : > { %v8776_v27 = vrot.slane %v8774_v41, 2  ;;  %v10218_v18 = vrot.slane %v10204_v51, %v12824_v28  ;;  %v8775_v1 = vsel %vm12857_vm1, %v8773_v29, %v8774_v41  ;;  %v9412_v56 = vrot.slane %v15034_v13, 2  ;;  %v14041_v32 = vpop.permute.xlu0 %8958 }
 0x283   : > { %v9284_v19 = vadd.f32 %v8947_v63, %v15029_v43  ;;  %v9821_v57 = vadd.f32 %v14939_v37, %v9666_v9  ;;  %9058 = vrot.lane.b32.xlu0 %v8775_v1, %s11306_s10  ;;  %v9669_v46 = vadd.f32 %v9413_v36, %v9285_v3  ;;  %v14049_v20 = vcombine.high %v15035_v54, %v15035_v54  ;;  %v15037_v43 = vld [vmem:[#allocation37_spill] sm:$0xff] }
 0x284   : > { %v8778_v12 = vsel %vm12857_vm1, %v8776_v27, %v8777_v55  ;;  %v10219_v62 = vcombine.low %v10211_v22, %v10218_v18  ;;  %v8781_v63 = vrot.slane %v15035_v54, 7  ;;  %v11117_v51 = vrot.slane %v15037_v43, 9  ;;  %v15038_v9 = vld [vmem:[#allocation81_spill] sm:$0xff] }
 0x285   : > { %15036 = vst [vmem:[#allocation49_spill] sm:$0xff] %v14049_v20  ;;  %9060 = vrot.lane.b32.xlu1 %v8778_v12, %s11306_s10  ;;  %v9668_v41 = vadd.f32 %v9412_v56, %v9284_v19  ;;  %v10220_v29 = vcombine.low %v9821_v57, %v9822_v59  ;;  %v9824_v60 = vadd.f32 %v13528_v2, %v9669_v46  ;;  %v8784_v55 = vrot.slane %v14049_v20, 7  ;;  %v14057_v27 = vpop.permute.xlu1 %8964  ;;  %v15039_v59 = vld [vmem:[#allocation80_spill] sm:$0xff]  ;;  %v15040_v12 = vld [vmem:[#allocation77_spill] sm:$0xff]  ;;  %v15043_v20 = vld [vmem:[#allocation82_spill] sm:$0xff] }
 0x286   : > { %v9415_v36 = vrot.slane %v15038_v9, 2  ;;  %v11169_v13 = vpack.c.bf16 %v10219_v62, %v10219_v62  ;;  %v8783_v3 = vrot.slane %v8781_v63, 2  ;;  %v8782_v18 = vsel %vm12857_vm1, %v11117_v51, %v8781_v63  ;;  %v14062_v1 = vpop.permute.xlu0 %8962  ;;  %v15041_v63 = vld [vmem:[#allocation40_spill] sm:$0xff] }
 0x287   : > { %v9823_v22 = vadd.f32 %v12913_v7, %v9668_v41  ;;  %v10228_v56 = vrot.slane %v10220_v29, %v12824_v28  ;;  %9062 = vrot.lane.b32.xlu0 %v8782_v18, %s11306_s10  ;;  %v9287_v19 = vadd.f32 %v13996_v0, %v15039_v59  ;;  %v9414_v57 = vrot.slane %v15039_v59, 2 }
 0x288   : > { %v9286_v46 = vadd.f32 %v14002_v49, %v15040_v12  ;;  %10748 = vst.msk [vmem:[%s13657_s19 + $0x28] sm:$0xf] %vm10737_vm2, %v11169_v13  ;;  %v8785_v41 = vsel %vm12857_vm1, %v8783_v3, %v8784_v55  ;;  %v14077_v51 = vcombine.high %v15041_v63, %v15041_v63  ;;  %v8787_v29 = vrot.slane %v15041_v63, 7 }
 0x289   : > { %v10221_v62 = vcombine.low %v9823_v22, %v9824_v60  ;;  %9064 = vrot.lane.b32.xlu1 %v8785_v41, %s11306_s10  ;;  %v9671_v0 = vadd.f32 %v9415_v36, %v9287_v19  ;;  %v8786_v59 = vrot.slane %v8784_v55, 2  ;;  %v9417_v43 = vrot.slane %v15043_v20, 2  ;;  %v15044_v22 = vld [vmem:[#allocation84_spill] sm:$0xff]  ;;  %v14091_v55 = vpop.permute.xlu1 %8968 }
 0x28a   : > { %15042 = vst [vmem:[#allocation45_spill] sm:$0xff] %v14077_v51  ;;  %v9670_v18 = vadd.f32 %v9414_v57, %v9286_v46  ;;  %v8789_v13 = vrot.slane %v8787_v29, 2  ;;  %v8790_v60 = vrot.slane %v14077_v51, 7  ;;  %v9289_v3 = vadd.f32 %v14014_v42, %v15044_v22  ;;  %v14093_v19 = vpop.permute.xlu0 %8966 }
 0x28b   : > { %v10235_v49 = vrot.slane %v10221_v62, %v12824_v28  ;;  %v9826_v12 = vadd.f32 %v13522_v15, %v9671_v0  ;;  %v8788_v41 = vsel %vm12857_vm1, %v8786_v59, %v8787_v29  ;;  %v9416_v36 = vrot.slane %v15044_v22, 2  ;;  %v15045_v29 = vld [vmem:[#allocation27_spill] sm:$0xff] }
 0x28c   : > { %v9825_v54 = vadd.f32 %v14939_v37, %v9670_v18  ;;  %v8791_v46 = vsel %vm12857_vm1, %v8789_v13, %v8790_v60  ;;  %9066 = vrot.lane.b32.xlu0 %v8788_v41, %s11306_s10  ;;  %v9673_v42 = vadd.f32 %v9417_v43, %v9289_v3  ;;  %v9288_v62 = vadd.f32 %v14020_v34, %v15038_v9  ;;  %v15047_v41 = vld [vmem:[#allocation86_spill] sm:$0xff] }
 0x28d   : > { %v10236_v57 = vcombine.low %v10228_v56, %v10235_v49  ;;  %9068 = vrot.lane.b32.xlu1 %v8791_v46, %s11306_s10  ;;  %v14103_v18 = vcombine.high %v15045_v29, %v15045_v29  ;;  %v8793_v59 = vrot.slane %v15045_v29, 7  ;;  %v8792_v56 = vrot.slane %v8790_v60, 2  ;;  %v15048_v60 = vld [vmem:[#allocation85_spill] sm:$0xff]  ;;  %v15052_v29 = vld [vmem:[#allocation88_spill] sm:$0xff] }
 0x28e   : > { %v10237_v0 = vcombine.low %v9825_v54, %v9826_v12  ;;  %v9828_v13 = vadd.f32 %v13528_v2, %v9673_v42  ;;  %v9672_v22 = vadd.f32 %v9416_v36, %v9288_v62  ;;  %v9419_v51 = vrot.slane %v15047_v41, 2  ;;  %v15049_v42 = vld [vmem:[#allocation28_spill] sm:$0xff] }
 0x28f   : > { %15046 = vst [vmem:[#allocation55_spill] sm:$0xff] %v14103_v18  ;;  %v11170_v49 = vpack.c.bf16 %v10236_v57, %v10236_v57  ;;  %v8795_v3 = vrot.slane %v8793_v59, 2  ;;  %v8796_v34 = vrot.slane %v14103_v18, 7  ;;  %v8794_v54 = vsel %vm12857_vm1, %v8792_v56, %v8793_v59  ;;  %v8973_v56 = vpop.permute.xlu1 %8972 }
 0x290   : > { %v10245_v43 = vrot.slane %v10237_v0, %v12824_v28  ;;  %v9827_v9 = vadd.f32 %v12913_v7, %v9672_v22  ;;  %9070 = vrot.lane.b32.xlu0 %v8794_v54, %s11306_s10  ;;  %v9291_v12 = vadd.f32 %v14034_v47, %v15048_v60  ;;  %v9418_v36 = vrot.slane %v15048_v60, 2  ;;  %v15051_v60 = vld [vmem:[#allocation87_spill] sm:$0xff] }
 0x291   : > { %10749 = vst.msk [vmem:[%s13657_s19 + $0x2c] sm:$0xf] %vm10737_vm2, %v11170_v49  ;;  %v9290_v57 = vadd.f32 %v14041_v32, %v15043_v20  ;;  %v8797_v46 = vsel %vm12857_vm1, %v8795_v3, %v8796_v34  ;;  %v14125_v62 = vcombine.high %v15049_v42, %v15049_v42  ;;  %v8799_v0 = vrot.slane %v15049_v42, 7  ;;  %v8971_v49 = vpop.permute.xlu0 %8970 }
 0x292   : > { %v8798_v59 = vrot.slane %v8796_v34, 2  ;;  %v10238_v22 = vcombine.low %v9827_v9, %v9828_v13  ;;  %9072 = vrot.lane.b32.xlu1 %v8797_v46, %s11306_s10  ;;  %v9675_v47 = vadd.f32 %v9419_v51, %v9291_v12  ;;  %v9421_v18 = vrot.slane %v15051_v60, 2 }
 0x293   : > { %15050 = vst [vmem:[#allocation46_spill] sm:$0xff] %v14125_v62  ;;  %v9674_v54 = vadd.f32 %v9418_v36, %v9290_v57  ;;  %v8801_v32 = vrot.slane %v8799_v0, 2  ;;  %v8802_v20 = vrot.slane %v14125_v62, 7  ;;  %v9293_v63 = vadd.f32 %v14057_v27, %v15052_v29 }
 0x294   : > { %v8800_v3 = vsel %vm12857_vm1, %v8798_v59, %v8799_v0  ;;  %v10252_v34 = vrot.slane %v10238_v22, %v12824_v28  ;;  %v9830_v42 = vadd.f32 %v13522_v15, %v9675_v47  ;;  %v9420_v51 = vrot.slane %v15052_v29, 2  ;;  %v15053_v0 = vld [vmem:[#allocation39_spill] sm:$0xff]  ;;  %v15054_v22 = vld [vmem:[#allocation29_spill] sm:$0xff] }
 0x295   : > { %v9829_v13 = vadd.f32 %v14939_v37, %v9674_v54  ;;  %9074 = vrot.lane.b32.xlu0 %v8800_v3, %s11306_s10  ;;  %v8803_v9 = vsel %vm12857_vm1, %v8801_v32, %v8802_v20  ;;  %v9677_v12 = vadd.f32 %v9421_v18, %v9293_v63  ;;  %v9292_v36 = vadd.f32 %v14062_v1, %v15047_v41  ;;  %v15055_v32 = vld [vmem:[#allocation19_spill] sm:$0xff]  ;;  %v8977_v18 = vpop.permute.xlu1 %8976  ;;  %v8975_v20 = vpop.permute.xlu0 %8974 }
 0x296   : > { %v8806_v57 = vrot.slane %v13580_v16, 7  ;;  %v10253_v27 = vcombine.low %v10245_v43, %v10252_v34  ;;  %9076 = vrot.lane.b32.xlu1 %v8803_v9, %s11306_s10  ;;  %v8809_v59 = vrot.slane %v15053_v0, 7  ;;  %v11118_v47 = vrot.slane %v15054_v22, 9  ;;  %v15057_v9 = vld [vmem:[#allocation22_spill] sm:$0xff] }
 0x297   : > { %v10254_v46 = vcombine.low %v9829_v13, %v9830_v42  ;;  %v9832_v29 = vadd.f32 %v13528_v2, %v9677_v12  ;;  %v9676_v54 = vadd.f32 %v9420_v51, %v9292_v36  ;;  %v9423_v63 = vrot.slane %v15055_v32, 2  ;;  %v15056_v42 = vld [vmem:[#allocation89_spill] sm:$0xff] }
 0x298   : > { %v8808_v60 = vrot.slane %v8806_v57, 2  ;;  %v11171_v1 = vpack.c.bf16 %v10253_v27, %v10253_v27  ;;  %v8807_v43 = vsel %vm12857_vm1, %v11118_v47, %v8806_v57  ;;  %v9295_v3 = vadd.f32 %v14091_v55, %v15056_v42  ;;  %v15058_v57 = vld [vmem:[#allocation41_spill] sm:$0xff]  ;;  %v15059_v55 = vld [vmem:[#allocation30_spill] sm:$0xff] }
 0x299   : > { %v10262_v41 = vrot.slane %v10254_v46, %v12824_v28  ;;  %v9831_v34 = vadd.f32 %v12913_v7, %v9676_v54  ;;  %9078 = vrot.lane.b32.xlu0 %v8807_v43, %s11306_s10  ;;  %v9422_v51 = vrot.slane %v15056_v42, 2  ;;  %v9294_v12 = vadd.f32 %v14093_v19, %v15057_v9  ;;  %v15061_v43 = vld [vmem:[#allocation90_spill] sm:$0xff] }
 0x29a   : > { %v8810_v13 = vsel %vm12857_vm1, %v8808_v60, %v8809_v59  ;;  %10750 = vst.msk [vmem:[%s13657_s19 + $0x30] sm:$0xf] %vm10737_vm2, %v11171_v1  ;;  %v9679_v36 = vadd.f32 %v9423_v63, %v9295_v3  ;;  %v8812_v27 = vrot.slane %v15058_v57, 7  ;;  %v8815_v46 = vrot.slane %v15059_v55, 7  ;;  %v15060_v60 = vld [vmem:[#allocation98_spill] sm:$0xff] }
 0x29b   : > { %9080 = vrot.lane.b32.xlu1 %v8810_v13, %s11306_s10  ;;  %v8811_v47 = vrot.slane %v8809_v59, 2  ;;  %v10255_v54 = vcombine.low %v9831_v34, %v9832_v29  ;;  %v9678_v0 = vadd.f32 %v9422_v51, %v9294_v12  ;;  %v9425_v22 = vrot.slane %v15060_v60, 2  ;;  %v15062_v51 = vld [vmem:[#allocation31_spill] sm:$0xff] }
 0x29c   : > { %v9297_v16 = vadd.f32 %v8973_v56, %v15061_v43  ;;  %v9834_v42 = vadd.f32 %v13522_v15, %v9679_v36  ;;  %v8814_v62 = vrot.slane %v8812_v27, 2  ;;  %v9424_v1 = vrot.slane %v15061_v43, 2 }
 0x29d   : > { %v8813_v19 = vsel %vm12857_vm1, %v8811_v47, %v8812_v27  ;;  %v10269_v63 = vrot.slane %v10255_v54, %v12824_v28  ;;  %v9833_v3 = vadd.f32 %v14939_v37, %v9678_v0  ;;  %v9296_v29 = vadd.f32 %v8971_v49, %v15055_v32  ;;  %v8981_v34 = vpop.permute.xlu1 %8980 }
 0x29e   : > { %9082 = vrot.lane.b32.xlu0 %v8813_v19, %s11306_s10  ;;  %v9681_v59 = vadd.f32 %v9425_v22, %v9297_v16  ;;  %v8816_v56 = vsel %vm12857_vm1, %v8814_v62, %v8815_v46  ;;  %v8818_v9 = vrot.slane %v15062_v51, 7  ;;  %v8821_v12 = vrot.slane %v13613_v33, 7  ;;  %v15063_v62 = vld [vmem:[#allocation91_spill] sm:$0xff] }
 0x29f   : > { %v8979_v13 = vpop.permute.xlu0 %8978  ;;  %v8817_v36 = vrot.slane %v8815_v46, 2  ;;  %v10270_v27 = vcombine.low %v10262_v41, %v10269_v63  ;;  %v10271_v47 = vcombine.low %v9833_v3, %v9834_v42  ;;  %9084 = vrot.lane.b32.xlu1 %v8816_v56, %s11306_s10  ;;  %v9680_v16 = vadd.f32 %v9424_v1, %v9296_v29 }
 0x2a0   : > { %v9836_v0 = vadd.f32 %v13528_v2, %v9681_v59  ;;  %v8820_v22 = vrot.slane %v8818_v9, 2  ;;  %v9427_v32 = vrot.slane %v13532_v48, 2  ;;  %v9299_v54 = vadd.f32 %v8977_v18, %v15063_v62 }
 0x2a1   : > { %v8819_v49 = vsel %vm12857_vm1, %v8817_v36, %v8818_v9  ;;  %v11172_v43 = vpack.c.bf16 %v10270_v27, %v10270_v27  ;;  %v10279_v19 = vrot.slane %v10271_v47, %v12824_v28  ;;  %v9835_v41 = vadd.f32 %v12913_v7, %v9680_v16 }
 0x2a2   : > { %9086 = vrot.lane.b32.xlu0 %v8819_v49, %s11306_s10  ;;  %v9426_v46 = vrot.slane %v15063_v62, 2  ;;  %v8822_v1 = vsel %vm12857_vm1, %v8820_v22, %v8821_v12  ;;  %v9683_v63 = vadd.f32 %v9427_v32, %v9299_v54  ;;  %v9298_v3 = vadd.f32 %v8975_v20, %v15060_v60  ;;  %v15064_v22 = vld [vmem:[#allocation92_spill] sm:$0xff] }
 0x2a3   : > { %v8983_v42 = vpop.permute.xlu0 %8982  ;;  %v8824_v59 = vrot.slane %v13627_v53, 7  ;;  %10751 = vst.msk [vmem:[%s13657_s19 + $0x34] sm:$0xf] %vm10737_vm2, %v11172_v43  ;;  %v10272_v18 = vcombine.low %v9835_v41, %v9836_v0  ;;  %9088 = vrot.lane.b32.xlu1 %v8822_v1, %s11306_s10  ;;  %v8827_v29 = vrot.slane %v13616_v17, 7  ;;  %v8823_v56 = vrot.slane %v8821_v12, 2 }
 0x2a4   : > { %v9429_v9 = vrot.slane %v13576_v38, 2  ;;  %v8985_v36 = vpop.permute.xlu1 %8984  ;;  %v9838_v27 = vadd.f32 %v13522_v15, %v9683_v63  ;;  %v9682_v47 = vadd.f32 %v9426_v46, %v9298_v3  ;;  %v9301_v49 = vadd.f32 %v8981_v34, %v15064_v22 }
 0x2a5   : > { %v8826_v16 = vrot.slane %v8824_v59, 2  ;;  %v10286_v20 = vrot.slane %v10272_v18, %v12824_v28  ;;  %v8825_v60 = vsel %vm12857_vm1, %v8823_v56, %v8824_v59  ;;  %v9428_v0 = vrot.slane %v15064_v22, 2 }
 0x2a6   : > { %v9300_v32 = vadd.f32 %v8979_v13, %v13532_v48  ;;  %v9837_v12 = vadd.f32 %v14939_v37, %v9682_v47  ;;  %9090 = vrot.lane.b32.xlu0 %v8825_v60, %s11306_s10  ;;  %v9685_v62 = vadd.f32 %v9429_v9, %v9301_v49  ;;  %v14213_v34 = vcombine.high %v13636_v6, %v13636_v6 }
 0x2a7   : > { %v8828_v38 = vsel %vm12857_vm1, %v8826_v16, %v8827_v29  ;;  %v10287_v54 = vcombine.low %v10279_v19, %v10286_v20  ;;  %v8831_v41 = vrot.slane %v13636_v6, 7  ;;  %v11119_v48 = vrot.slane %v13631_v10, 9  ;;  %v8987_v46 = vpop.permute.xlu0 %8986 }
 0x2a8   : > { %9092 = vrot.lane.b32.xlu1 %v8828_v38, %s11306_s10  ;;  %v9684_v43 = vadd.f32 %v9428_v0, %v9300_v32  ;;  %v8989_v13 = vpop.permute.xlu1 %8988  ;;  %v10288_v1 = vcombine.low %v9837_v12, %v9838_v27  ;;  %v9840_v63 = vadd.f32 %v13528_v2, %v9685_v62  ;;  %v8834_v3 = vrot.slane %v14213_v34, 7 }
 0x2a9   : > { %v9431_v59 = vrot.slane %v13247_v58, 2  ;;  %v11173_v18 = vpack.c.bf16 %v10287_v54, %v10287_v54  ;;  %v8833_v29 = vrot.slane %v8831_v41, 2  ;;  %v8832_v56 = vsel %vm12857_vm1, %v11119_v48, %v8831_v41  ;;  %v15065_v54 = vld [vmem:[#allocation93_spill] sm:$0xff] }
 0x2aa   : > { %v9839_v19 = vadd.f32 %v12913_v7, %v9684_v43  ;;  %v10296_v9 = vrot.slane %v10288_v1, %v12824_v28  ;;  %9094 = vrot.lane.b32.xlu0 %v8832_v56, %s11306_s10  ;;  %v9303_v47 = vadd.f32 %v8985_v36, %v13263_v45  ;;  %v9430_v27 = vrot.slane %v13263_v45, 2  ;;  %v15067_v56 = vld [vmem:[#allocation33_spill] sm:$0xff] }
 0x2ab   : > { %v9302_v16 = vadd.f32 %v8983_v42, %v13244_v21  ;;  %10752 = vst.msk [vmem:[%s13657_s19 + $0x38] sm:$0xf] %vm10737_vm2, %v11173_v18  ;;  %v8835_v49 = vsel %vm12857_vm1, %v8833_v29, %v8834_v3  ;;  %v14235_v20 = vcombine.high %v13645_v4, %v13645_v4  ;;  %v8837_v60 = vrot.slane %v13645_v4, 7  ;;  %v8991_v32 = vpop.permute.xlu0 %8990  ;;  %v15066_v29 = vld [vmem:[#allocation32_spill] sm:$0xff] }
 0x2ac   : > { %v10289_v22 = vcombine.low %v9839_v19, %v9840_v63  ;;  %v8993_v0 = vpop.permute.xlu1 %8992  ;;  %9096 = vrot.lane.b32.xlu1 %v8835_v49, %s11306_s10  ;;  %v9687_v36 = vadd.f32 %v9431_v59, %v9303_v47  ;;  %v8836_v12 = vrot.slane %v8834_v3, 2  ;;  %v9433_v21 = vrot.slane %v13271_v14, 2 }
 0x2ad   : > { %v9686_v45 = vadd.f32 %v9430_v27, %v9302_v16  ;;  %v8839_v38 = vrot.slane %v8837_v60, 2  ;;  %v8840_v62 = vrot.slane %v14235_v20, 7  ;;  %v9305_v43 = vadd.f32 %v8989_v13, %v15065_v54  ;;  %v15069_v16 = vld [vmem:[#allocation34_spill] sm:$0xff] }
 0x2ae   : > { %v10303_v42 = vrot.slane %v10289_v22, %v12824_v28  ;;  %v9842_v41 = vadd.f32 %v13522_v15, %v9687_v36  ;;  %v8838_v1 = vsel %vm12857_vm1, %v8836_v12, %v8837_v60  ;;  %v9432_v63 = vrot.slane %v15065_v54, 2 }
 0x2af   : > { %v9841_v48 = vadd.f32 %v14939_v37, %v9686_v45  ;;  %v8841_v3 = vsel %vm12857_vm1, %v8839_v38, %v8840_v62  ;;  %9098 = vrot.lane.b32.xlu0 %v8838_v1, %s11306_s10  ;;  %v9689_v18 = vadd.f32 %v9433_v21, %v9305_v43  ;;  %v9304_v19 = vadd.f32 %v8987_v46, %v13247_v58  ;;  %v8995_v13 = vpop.permute.xlu0 %8994 }
 0x2b0   : > { %v10304_v59 = vcombine.low %v10296_v9, %v10303_v42  ;;  %v15068_v47 = vcombine.high %v15066_v29, %v15067_v56  ;;  %9100 = vrot.lane.b32.xlu1 %v8841_v3, %s11306_s10  ;;  %v14261_v9 = vcombine.high %v15069_v16, %v15069_v16  ;;  %v8843_v22 = vrot.slane %v15069_v16, 7  ;;  %v8997_v60 = vpop.permute.xlu1 %8996 }
 0x2b1   : > { %v8842_v49 = vrot.slane %v8840_v62, 2  ;;  %v10305_v58 = vcombine.low %v9841_v48, %v9842_v41  ;;  %v9844_v46 = vadd.f32 %v13528_v2, %v9689_v18  ;;  %v9688_v45 = vadd.f32 %v9432_v63, %v9304_v19 }
 0x2b2   : > { %v14256_v27 = vrot.slane %v15068_v47, %v12824_v28  ;;  %v11174_v36 = vpack.c.bf16 %v10304_v59, %v10304_v59  ;;  %v8845_v12 = vrot.slane %v8843_v22, 2  ;;  %v8846_v21 = vrot.slane %v14261_v9, 7 }
 0x2b3   : > { %v8844_v42 = vsel %vm12857_vm1, %v8842_v49, %v8843_v22  ;;  %v9435_v38 = vrot.slane %v13280_v52, 2  ;;  %v9843_v54 = vadd.f32 %v12913_v7, %v9688_v45  ;;  %v9307_v62 = vadd.f32 %v8993_v0, %v13303_v35 }
 0x2b4   : > { %10753 = vst.msk [vmem:[%s13657_s19 + $0x3c] sm:$0xf] %vm10737_vm2, %v11174_v36  ;;  %9102 = vrot.lane.b32.xlu0 %v8844_v42, %s11306_s10  ;;  %v9434_v43 = vrot.slane %v13303_v35, 2  ;;  %v9306_v41 = vadd.f32 %v8991_v32, %v13271_v14  ;;  %v8847_v48 = vsel %vm12857_vm1, %v8845_v12, %v8846_v21  ;;  %v14280_v1 = vcombine.high %v14256_v27, %v14256_v27 }
 0x2b5   : > { %v8849_v63 = vrot.slane %v14256_v27, 7  ;;  %v8848_v59 = vrot.slane %v8846_v21, 2  ;;  %v9001_v3 = vpop.permute.xlu1 %9000  ;;  %v10306_v18 = vcombine.low %v9843_v54, %v9844_v46  ;;  %9104 = vrot.lane.b32.xlu1 %v8847_v48, %s11306_s10  ;;  %v9691_v19 = vadd.f32 %v9435_v38, %v9307_v62  ;;  %v8999_v29 = vpop.permute.xlu0 %8998 }
 0x2b6   : > { %v9690_v0 = vadd.f32 %v9434_v43, %v9306_v41  ;;  %v9437_v35 = vrot.slane %v13310_v25, 2  ;;  %v8852_v32 = vrot.slane %v14280_v1, 7  ;;  %v9309_v47 = vadd.f32 %v8997_v60, %v13307_v8 }
 0x2b7   : > { %v8851_v14 = vrot.slane %v8849_v63, 2  ;;  %v8850_v56 = vsel %vm12857_vm1, %v8848_v59, %v8849_v63  ;;  %v10313_v22 = vrot.slane %v10305_v58, %v12824_v28  ;;  %v10320_v49 = vrot.slane %v10306_v18, %v12824_v28 }
 0x2b8   : > { %v9846_v36 = vadd.f32 %v13522_v15, %v9691_v19  ;;  %v9845_v46 = vadd.f32 %v14939_v37, %v9690_v0  ;;  %9106 = vrot.lane.b32.xlu0 %v8850_v56, %s11306_s10  ;;  %v9693_v45 = vadd.f32 %v9437_v35, %v9309_v47  ;;  %v9436_v12 = vrot.slane %v13307_v8, 2 }
 0x2b9   : > { %v8853_v25 = vsel %vm12857_vm1, %v8851_v14, %v8852_v32  ;;  %v9308_v21 = vadd.f32 %v8995_v13, %v13280_v52  ;;  %v10321_v42 = vcombine.low %v10313_v22, %v10320_v49  ;;  %v9439_v58 = vrot.slane %v13734_v39, 2  ;;  %v9003_v62 = vpop.permute.xlu0 %9002 }
 0x2ba   : > { %v10322_v60 = vcombine.low %v9845_v46, %v9846_v36  ;;  %9108 = vrot.lane.b32.xlu1 %v8853_v25, %s11306_s10  ;;  %v9311_v38 = vadd.f32 %v9001_v3, %v13315_v11  ;;  %v9005_v54 = vpop.permute.xlu1 %9004  ;;  %v9848_v43 = vadd.f32 %v13528_v2, %v9693_v45  ;;  %v9438_v41 = vrot.slane %v13315_v11, 2 }
 0x2bb   : > { %v9692_v5 = vadd.f32 %v9436_v12, %v9308_v21  ;;  %v9310_v8 = vadd.f32 %v8999_v29, %v13741_v26  ;;  %v11175_v48 = vpack.c.bf16 %v10321_v42, %v10321_v42  ;;  %v9441_v13 = vrot.slane %v13757_v24, 2 }
 0x2bc   : > { %v9695_v52 = vadd.f32 %v9439_v58, %v9311_v38  ;;  %v9313_v63 = vadd.f32 %v9005_v54, %v13326_v23  ;;  %v9440_v3 = vrot.slane %v13326_v23, 2  ;;  %v9312_v19 = vadd.f32 %v9003_v62, %v13734_v39  ;;  %v15070_v39 = vld [vmem:[#allocation44_spill] sm:$0xff] }
 0x2bd   : > { %v9847_v59 = vadd.f32 %v12913_v7, %v9692_v5  ;;  %v9694_v18 = vadd.f32 %v9438_v41, %v9310_v8  ;;  %10754 = vst.msk [vmem:[%s13657_s19 + $0x40] sm:$0xf] %vm10737_vm2, %v11175_v48  ;;  %v9442_v26 = vrot.slane %v13329_v40, 2  ;;  %v9007_v35 = vpop.permute.xlu0 %9006  ;;  %v10330_v22 = vrot.slane %v10322_v60, %v12824_v28 }
 0x2be   : > { %v9850_v0 = vadd.f32 %v13522_v15, %v9695_v52  ;;  %v9697_v11 = vadd.f32 %v9441_v13, %v9313_v63  ;;  %v9696_v32 = vadd.f32 %v9440_v3, %v9312_v19  ;;  %v9009_v56 = vpop.permute.xlu1 %9008  ;;  %v9314_v47 = vadd.f32 %v9007_v35, %v13757_v24 }
 0x2bf   : > { %v10323_v29 = vcombine.low %v9847_v59, %v9848_v43  ;;  %v9849_v14 = vadd.f32 %v14939_v37, %v9694_v18  ;;  %v9443_v49 = vrot.slane %v15070_v39, 2  ;;  %v9315_v36 = vadd.f32 %v9009_v56, %v13329_v40  ;;  %v15071_v43 = vld [vmem:[#allocation10_spill] sm:$0xff] }
 0x2c0   : > { %v9852_v23 = vadd.f32 %v13528_v2, %v9697_v11  ;;  %v9851_v45 = vadd.f32 %v12913_v7, %v9696_v32  ;;  %v9698_v12 = vadd.f32 %v9442_v26, %v9314_v47  ;;  %v9445_v60 = vrot.slane %v13797_v30, 2 }
 0x2c1   : > { %v10337_v46 = vrot.slane %v10323_v29, %v12824_v28  ;;  %v10339_v25 = vcombine.low %v9849_v14, %v9850_v0  ;;  %v9699_v21 = vadd.f32 %v9443_v49, %v9315_v36  ;;  %v9011_v42 = vpop.permute.xlu0 %9010  ;;  %v9444_v5 = vrot.slane %v15071_v43, 2  ;;  %v15072_v0 = vld [vmem:[#allocation11_spill] sm:$0xff]  ;;  %v15073_v29 = vld [vmem:[#allocation12_spill] sm:$0xff] }
 0x2c2   : > { %v10340_v38 = vcombine.low %v9851_v45, %v9852_v23  ;;  %v9853_v24 = vadd.f32 %v14939_v37, %v9698_v12  ;;  %v9013_v54 = vpop.permute.xlu1 %9012  ;;  %v9316_v41 = vadd.f32 %v9011_v42, %v15070_v39  ;;  %v9446_v19 = vrot.slane %v13372_v50, 2 }
 0x2c3   : > { %v10338_v58 = vcombine.low %v10330_v22, %v10337_v46  ;;  %v9854_v62 = vadd.f32 %v13522_v15, %v9699_v21  ;;  %v9317_v40 = vadd.f32 %v9013_v54, %v15071_v43  ;;  %v10347_v48 = vrot.slane %v10339_v25, %v12824_v28  ;;  %v15074_v25 = vld [vmem:[#allocation13_spill] sm:$0xff]  ;;  %v15075_v43 = vld [vmem:[#allocation14_spill] sm:$0xff] }
 0x2c4   : > { %v10354_v52 = vrot.slane %v10340_v38, %v12824_v28  ;;  %v9700_v63 = vadd.f32 %v9444_v5, %v9316_v41  ;;  %v9447_v14 = vrot.slane %v15073_v29, 2  ;;  %v9449_v36 = vrot.slane %v13366_v31, 2 }
 0x2c5   : > { %v11176_v8 = vpack.c.bf16 %v10338_v58, %v10338_v58  ;;  %v9701_v13 = vadd.f32 %v9445_v60, %v9317_v40  ;;  %v9015_v59 = vpop.permute.xlu0 %9014  ;;  %v10356_v18 = vcombine.low %v9853_v24, %v9854_v62  ;;  %v9448_v45 = vrot.slane %v15074_v25, 2 }
 0x2c6   : > { %v10355_v30 = vcombine.low %v10347_v48, %v10354_v52  ;;  %v9017_v3 = vpop.permute.xlu1 %9016  ;;  %v9318_v11 = vadd.f32 %v9015_v59, %v15072_v0  ;;  %v9855_v35 = vadd.f32 %v12913_v7, %v9700_v63  ;;  %v9450_v40 = vrot.slane %v15075_v43, 2 }
 0x2c7   : > { %10755 = vst.msk [vmem:[%s13657_s19 + $0x44] sm:$0xf] %vm10737_vm2, %v11176_v8  ;;  %v9856_v26 = vadd.f32 %v13528_v2, %v9701_v13  ;;  %v9319_v32 = vadd.f32 %v9017_v3, %v13372_v50  ;;  %v10364_v49 = vrot.slane %v10356_v18, %v12824_v28  ;;  %v15076_v13 = vld [vmem:[#allocation15_spill] sm:$0xff] }
 0x2c8   : > { %v11177_v56 = vpack.c.bf16 %v10355_v30, %v10355_v30  ;;  %v9702_v47 = vadd.f32 %v9446_v19, %v9318_v11  ;;  %v9451_v63 = vrot.slane %v15076_v13, 2 }
 0x2c9   : > { %v10357_v22 = vcombine.low %v9855_v35, %v9856_v26  ;;  %v9703_v23 = vadd.f32 %v9447_v14, %v9319_v32  ;;  %v9019_v39 = vpop.permute.xlu0 %9018  ;;  %v15077_v26 = vld [vmem:[#allocation17_spill] sm:$0xff] }
 0x2ca   : > { %10756 = vst.msk [vmem:[%s13657_s19 + $0x48] sm:$0xf] %vm10737_vm2, %v11177_v56  ;;  %v9320_v12 = vadd.f32 %v9019_v39, %v15073_v29  ;;  %v9857_v42 = vadd.f32 %v14939_v37, %v9702_v47  ;;  %v9452_v35 = vrot.slane %v15077_v26, 2  ;;  %v15078_v56 = vld [vmem:[#allocation16_spill] sm:$0xff] }
 0x2cb   : > { %v9021_v46 = vpop.permute.xlu1 %9020  ;;  %v10371_v21 = vrot.slane %v10357_v22, %v12824_v28  ;;  %v9858_v50 = vadd.f32 %v13522_v15, %v9703_v23  ;;  %v9453_v47 = vrot.slane %v15078_v56, 2 }
 0x2cc   : > { %v9321_v58 = vadd.f32 %v9021_v46, %v15074_v25  ;;  %v9704_v38 = vadd.f32 %v9448_v45, %v9320_v12 }
 0x2cd   : > { %v10372_v24 = vcombine.low %v10364_v49, %v10371_v21  ;;  %v9023_v54 = vpop.permute.xlu0 %9022  ;;  %v10373_v8 = vcombine.low %v9857_v42, %v9858_v50  ;;  %v15079_v21 = vld [vmem:[#allocation35_spill] sm:$0xff]  ;;  %v15080_v42 = vld [vmem:[#allocation18_spill] sm:$0xff] }
 0x2ce   : > { %v9705_v60 = vadd.f32 %v9449_v36, %v9321_v58  ;;  %v9859_v62 = vadd.f32 %v12913_v7, %v9704_v38  ;;  %v9322_v5 = vadd.f32 %v9023_v54, %v13366_v31  ;;  %v9455_v50 = vrot.slane %v15079_v21, 2 }
 0x2cf   : > { %v11178_v41 = vpack.c.bf16 %v10372_v24, %v10372_v24  ;;  %v9025_v52 = vpop.permute.xlu1 %9024  ;;  %v10381_v0 = vrot.slane %v10373_v8, %v12824_v28  ;;  %v9454_v24 = vrot.slane %v15080_v42, 2  ;;  %v15082_v8 = vld [vmem:[#allocation47_spill] sm:$0xff] }
 0x2d0   : > { %v9860_v48 = vadd.f32 %v13528_v2, %v9705_v60  ;;  %v9323_v59 = vadd.f32 %v9025_v52, %v15075_v43  ;;  %v9706_v30 = vadd.f32 %v9450_v40, %v9322_v5  ;;  %v15081_v60 = vld [vmem:[#allocation42_spill] sm:$0xff] }
 0x2d1   : > { %10757 = vst.msk [vmem:[%s13657_s19 + $0x4c] sm:$0xf] %vm10737_vm2, %v11178_v41 }
 0x2d2   : > { %v10374_v18 = vcombine.low %v9859_v62, %v9860_v48  ;;  %v9707_v3 = vadd.f32 %v9451_v63, %v9323_v59  ;;  %v9027_v19 = vpop.permute.xlu0 %9026  ;;  %v9861_v32 = vadd.f32 %v14939_v37, %v9706_v30  ;;  %v9457_v48 = vrot.slane %v15082_v8, 2 }
 0x2d3   : > { %v9029_v31 = vpop.permute.xlu1 %9028  ;;  %v9324_v29 = vadd.f32 %v9027_v19, %v15076_v13  ;;  %v15083_v13 = vld [vmem:[#allocation95_spill] sm:$0xff] }
 0x2d4   : > { %v10388_v11 = vrot.slane %v10374_v18, %v12824_v28  ;;  %v9862_v14 = vadd.f32 %v13522_v15, %v9707_v3  ;;  %v9325_v22 = vadd.f32 %v9029_v31, %v15077_v26  ;;  %v9456_v63 = vrot.slane %v15083_v13, 2 }
 0x2d5   : > { %v9708_v39 = vadd.f32 %v9452_v35, %v9324_v29  ;;  %v15084_v35 = vld [vmem:[#allocation20_spill] sm:$0xff] }
 0x2d6   : > { %v10389_v23 = vcombine.low %v10381_v0, %v10388_v11  ;;  %v9709_v49 = vadd.f32 %v9453_v47, %v9325_v22  ;;  %v10390_v45 = vcombine.low %v9861_v32, %v9862_v14  ;;  %v9458_v29 = vrot.slane %v15084_v35, 2 }
 0x2d7   : > { %v9863_v46 = vadd.f32 %v12913_v7, %v9708_v39  ;;  %v15085_v39 = vld [vmem:[#allocation43_spill] sm:$0xff] }
 0x2d8   : > { %v11179_v36 = vpack.c.bf16 %v10389_v23, %v10389_v23  ;;  %v9033_v25 = vpop.permute.xlu1 %9032  ;;  %v9864_v12 = vadd.f32 %v13528_v2, %v9709_v49  ;;  %v9031_v38 = vpop.permute.xlu0 %9030  ;;  %v10398_v5 = vrot.slane %v10390_v45, %v12824_v28  ;;  %v9459_v49 = vrot.slane %v15085_v39, 2 }
 0x2d9   : > { %v9327_v58 = vadd.f32 %v9033_v25, %v15080_v42  ;;  %v9326_v54 = vadd.f32 %v9031_v38, %v15081_v60 }
 0x2da   : > { %10758 = vst.msk [vmem:[%s13657_s19 + $0x50] sm:$0xf] %vm10737_vm2, %v11179_v36  ;;  %v10391_v62 = vcombine.low %v9863_v46, %v9864_v12 }
 0x2db   : > { %v9711_v43 = vadd.f32 %v9455_v50, %v9327_v58  ;;  %v9710_v40 = vadd.f32 %v9454_v24, %v9326_v54  ;;  %v15086_v58 = vld [vmem:[#allocation21_spill] sm:$0xff] }
 0x2dc   : > { %v10405_v41 = vrot.slane %v10391_v62, %v12824_v28  ;;  %v9035_v59 = vpop.permute.xlu0 %9034  ;;  %v9460_v38 = vrot.slane %v15086_v58, 2  ;;  %v15087_v62 = vld [vmem:[#allocation48_spill] sm:$0xff] }
 0x2dd   : > { %v9037_v52 = vpop.permute.xlu1 %9036  ;;  %v9866_v30 = vadd.f32 %v13522_v15, %v9711_v43  ;;  %v9865_v18 = vadd.f32 %v14939_v37, %v9710_v40  ;;  %v9328_v19 = vadd.f32 %v9035_v59, %v15079_v21  ;;  %v9461_v43 = vrot.slane %v15087_v62, 2  ;;  %v15088_v59 = vld [vmem:[#allocation38_spill] sm:$0xff] }
 0x2de   : > { %v9329_v3 = vadd.f32 %v9037_v52, %v15083_v13  ;;  %v10406_v0 = vcombine.low %v10398_v5, %v10405_v41 }
 0x2df   : > { %v9712_v31 = vadd.f32 %v9456_v63, %v9328_v19  ;;  %v10407_v32 = vcombine.low %v9865_v18, %v9866_v30  ;;  %v9462_v30 = vrot.slane %v15088_v59, 2  ;;  %v15089_v18 = vld [vmem:[#allocation96_spill] sm:$0xff] }
 0x2e0   : > { %v9713_v11 = vadd.f32 %v9457_v48, %v9329_v3  ;;  %v11180_v26 = vpack.c.bf16 %v10406_v0, %v10406_v0  ;;  %v9039_v14 = vpop.permute.xlu0 %9038 }
 0x2e1   : > { %v9867_v47 = vadd.f32 %v12913_v7, %v9712_v31  ;;  %v9041_v22 = vpop.permute.xlu1 %9040  ;;  %v9330_v23 = vadd.f32 %v9039_v14, %v15082_v8  ;;  %v10415_v21 = vrot.slane %v10407_v32, %v12824_v28 }
 0x2e2   : > { %v9868_v56 = vadd.f32 %v13528_v2, %v9713_v11  ;;  %10759 = vst.msk [vmem:[%s13657_s19 + $0x54] sm:$0xf] %vm10737_vm2, %v11180_v26  ;;  %v9331_v36 = vadd.f32 %v9041_v22, %v15084_v35  ;;  %v15090_v11 = vld [vmem:[#allocation97_spill] sm:$0xff] }
 0x2e3   : > { %v9714_v25 = vadd.f32 %v9458_v29, %v9330_v23  ;;  %v9463_v31 = vrot.slane %v15090_v11, 2 }
 0x2e4   : > { %v10408_v46 = vcombine.low %v9867_v47, %v9868_v56  ;;  %v9715_v45 = vadd.f32 %v9459_v49, %v9331_v36  ;;  %v9043_v12 = vpop.permute.xlu0 %9042  ;;  %v15091_v56 = vld [vmem:[#allocation24_spill] sm:$0xff] }
 0x2e5   : > { %v9045_v42 = vpop.permute.xlu1 %9044  ;;  %v9332_v24 = vadd.f32 %v9043_v12, %v15085_v39  ;;  %v9869_v54 = vadd.f32 %v14939_v37, %v9714_v25  ;;  %v9464_v47 = vrot.slane %v15091_v56, 2  ;;  %v15092_v25 = vld [vmem:[#allocation23_spill] sm:$0xff] }
 0x2e6   : > { %v10422_v50 = vrot.slane %v10408_v46, %v12824_v28  ;;  %v9870_v60 = vadd.f32 %v13522_v15, %v9715_v45  ;;  %v9333_v40 = vadd.f32 %v9045_v42, %v15086_v58  ;;  %v9465_v45 = vrot.slane %v15092_v25, 2 }
 0x2e7   : > { %v9716_v41 = vadd.f32 %v9460_v38, %v9332_v24  ;;  %v15093_v24 = vld [vmem:[#allocation100_spill] sm:$0xff] }
 0x2e8   : > { %v10423_v5 = vcombine.low %v10415_v21, %v10422_v50  ;;  %v9717_v8 = vadd.f32 %v9461_v43, %v9333_v40  ;;  %v9047_v48 = vpop.permute.xlu0 %9046  ;;  %v10424_v19 = vcombine.low %v9869_v54, %v9870_v60  ;;  %v9466_v60 = vrot.slane %v15093_v24, 2 }
 0x2e9   : > { %v9871_v13 = vadd.f32 %v12913_v7, %v9716_v41  ;;  %v9334_v3 = vadd.f32 %v9047_v48, %v15089_v18  ;;  %v15094_v41 = vld [vmem:[#allocation99_spill] sm:$0xff]  ;;  %v9469_v18 = vrot.slane %v15032_v44, 2 }
 0x2ea   : > { %v11181_v52 = vpack.c.bf16 %v10423_v5, %v10423_v5  ;;  %v9049_v63 = vpop.permute.xlu1 %9048  ;;  %v9872_v0 = vadd.f32 %v13528_v2, %v9717_v8  ;;  %v10432_v23 = vrot.slane %v10424_v19, %v12824_v28  ;;  %v9467_v8 = vrot.slane %v15094_v41, 2 }
 0x2eb   : > { %v9335_v26 = vadd.f32 %v9049_v63, %v15088_v59  ;;  %v9718_v35 = vadd.f32 %v9462_v30, %v9334_v3  ;;  %v9468_v19 = vrot.slane %v15031_v61, 2 }
 0x2ec   : > { %10760 = vst.msk [vmem:[%s13657_s19 + $0x58] sm:$0xf] %vm10737_vm2, %v11181_v52  ;;  %v10425_v29 = vcombine.low %v9871_v13, %v9872_v0 }
 0x2ed   : > { %v9719_v14 = vadd.f32 %v9463_v31, %v9335_v26  ;;  %v9051_v32 = vpop.permute.xlu0 %9050  ;;  %v9873_v36 = vadd.f32 %v14939_v37, %v9718_v35 }
 0x2ee   : > { %v9336_v22 = vadd.f32 %v9051_v32, %v15090_v11  ;;  %v10439_v39 = vrot.slane %v10425_v29, %v12824_v28  ;;  %v9053_v46 = vpop.permute.xlu1 %9052 }
 0x2ef   : > { %v9874_v49 = vadd.f32 %v13522_v15, %v9719_v14  ;;  %v9337_v12 = vadd.f32 %v9053_v46, %v15091_v56 }
 0x2f0   : > { %v9720_v21 = vadd.f32 %v9464_v47, %v9336_v22  ;;  %v10440_v50 = vcombine.low %v10432_v23, %v10439_v39  ;;  %v15095_v47 = vld [vmem:[#allocation101_spill] sm:$0xff] }
 0x2f1   : > { %v9055_v42 = vpop.permute.xlu0 %9054  ;;  %v9721_v58 = vadd.f32 %v9465_v45, %v9337_v12  ;;  %v10441_v43 = vcombine.low %v9873_v36, %v9874_v49  ;;  %v9470_v22 = vrot.slane %v15095_v47, 2  ;;  %v15096_v23 = vld [vmem:[#allocation37_spill] sm:$0xff] }
 0x2f2   : > { %v9875_v38 = vadd.f32 %v12913_v7, %v9720_v21  ;;  %v9338_v54 = vadd.f32 %v9055_v42, %v15092_v25  ;;  %v11182_v62 = vpack.c.bf16 %v10440_v50, %v10440_v50  ;;  %v9057_v40 = vpop.permute.xlu1 %9056  ;;  %v15097_v45 = vld [vmem:[#allocation49_spill] sm:$0xff] }
 0x2f3   : > { %v9876_v5 = vadd.f32 %v13528_v2, %v9721_v58  ;;  %v9339_v48 = vadd.f32 %v9057_v40, %v15093_v24  ;;  %v10449_v30 = vrot.slane %v10441_v43, %v12824_v28  ;;  %v9471_v12 = vrot.slane %v15097_v45, 2 }
 0x2f4   : > { %v9722_v52 = vadd.f32 %v9466_v60, %v9338_v54  ;;  %10761 = vst.msk [vmem:[%s13657_s19 + $0x5c] sm:$0xf] %vm10737_vm2, %v11182_v62  ;;  %v15098_v54 = vld [vmem:[#allocation40_spill] sm:$0xff] }
 0x2f5   : > { %v10442_v13 = vcombine.low %v9875_v38, %v9876_v5  ;;  %v9723_v63 = vadd.f32 %v9467_v8, %v9339_v48  ;;  %v9059_v59 = vpop.permute.xlu0 %9058  ;;  %v9472_v62 = vrot.slane %v15098_v54, 2 }
 0x2f6   : > { %v9340_v0 = vadd.f32 %v9059_v59, %v15094_v41  ;;  %v9877_v26 = vadd.f32 %v14939_v37, %v9722_v52  ;;  %v15099_v41 = vld [vmem:[#allocation45_spill] sm:$0xff] }
 0x2f7   : > { %v9061_v3 = vpop.permute.xlu1 %9060  ;;  %v10456_v11 = vrot.slane %v10442_v13, %v12824_v28  ;;  %v9878_v31 = vadd.f32 %v13522_v15, %v9723_v63  ;;  %v9473_v8 = vrot.slane %v15099_v41, 2 }
 0x2f8   : > { %v9341_v35 = vadd.f32 %v9061_v3, %v15031_v61  ;;  %v9724_v29 = vadd.f32 %v9468_v19, %v9340_v0  ;;  %v15100_v3 = vld [vmem:[#allocation27_spill] sm:$0xff] }
 0x2f9   : > { %v10457_v14 = vcombine.low %v10449_v30, %v10456_v11  ;;  %v9063_v56 = vpop.permute.xlu0 %9062  ;;  %v10458_v36 = vcombine.low %v9877_v26, %v9878_v31  ;;  %v9474_v19 = vrot.slane %v15100_v3, 2 }
 0x2fa   : > { %v9725_v32 = vadd.f32 %v9469_v18, %v9341_v35  ;;  %v9879_v44 = vadd.f32 %v12913_v7, %v9724_v29  ;;  %v9342_v39 = vadd.f32 %v9063_v56, %v15096_v23  ;;  %v15101_v35 = vld [vmem:[#allocation55_spill] sm:$0xff] }
 0x2fb   : > { %v11183_v49 = vpack.c.bf16 %v10457_v14, %v10457_v14  ;;  %v9065_v25 = vpop.permute.xlu1 %9064  ;;  %v10466_v38 = vrot.slane %v10458_v36, %v12824_v28  ;;  %v9475_v29 = vrot.slane %v15101_v35, 2 }
 0x2fc   : > { %v9880_v46 = vadd.f32 %v13528_v2, %v9725_v32  ;;  %v9343_v21 = vadd.f32 %v9065_v25, %v15095_v47  ;;  %v9726_v61 = vadd.f32 %v9470_v22, %v9342_v39  ;;  %v15102_v22 = vld [vmem:[#allocation28_spill] sm:$0xff] }
 0x2fd   : > { %10762 = vst.msk [vmem:[%s13657_s19 + $0x60] sm:$0xf] %vm10737_vm2, %v11183_v49  ;;  %v9476_v23 = vrot.slane %v15102_v22, 2 }
 0x2fe   : > { %v10459_v50 = vcombine.low %v9879_v44, %v9880_v46  ;;  %v9727_v42 = vadd.f32 %v9471_v12, %v9343_v21  ;;  %v9067_v58 = vpop.permute.xlu0 %9066  ;;  %v9881_v5 = vadd.f32 %v14939_v37, %v9726_v61  ;;  %v15103_v46 = vld [vmem:[#allocation46_spill] sm:$0xff] }
 0x2ff   : > { %v9069_v60 = vpop.permute.xlu1 %9068  ;;  %v9344_v43 = vadd.f32 %v9067_v58, %v15097_v45  ;;  %v9477_v25 = vrot.slane %v15103_v46, 2 }
 0x300   : > { %v10473_v24 = vrot.slane %v10459_v50, %v12824_v28  ;;  %v9882_v40 = vadd.f32 %v13522_v15, %v9727_v42  ;;  %v9345_v48 = vadd.f32 %v9069_v60, %v15098_v54 }
 0x301   : > { %v9728_v13 = vadd.f32 %v9472_v62, %v9344_v43  ;;  %v15104_v62 = vld [vmem:[#allocation36_spill] sm:$0xff] }
 0x302   : > { %v10474_v52 = vcombine.low %v10466_v38, %v10473_v24  ;;  %v9729_v63 = vadd.f32 %v9473_v8, %v9345_v48  ;;  %v9071_v59 = vpop.permute.xlu0 %9070  ;;  %v10475_v11 = vcombine.low %v9881_v5, %v9882_v40  ;;  %v9478_v43 = vrot.slane %v15104_v62, 2  ;;  %v15105_v40 = vld [vmem:[#allocation29_spill] sm:$0xff]  ;;  %v15106_v48 = vld [vmem:[#allocation39_spill] sm:$0xff] }
 0x303   : > { %v9883_v18 = vadd.f32 %v12913_v7, %v9728_v13  ;;  %v9346_v0 = vadd.f32 %v9071_v59, %v15099_v41 }
 0x304   : > { %v11184_v30 = vpack.c.bf16 %v10474_v52, %v10474_v52  ;;  %v9884_v31 = vadd.f32 %v13528_v2, %v9729_v63  ;;  %v9073_v26 = vpop.permute.xlu1 %9072  ;;  %v10483_v49 = vrot.slane %v10475_v11, %v12824_v28  ;;  %v9479_v52 = vrot.slane %v15106_v48, 2 }
 0x305   : > { %v9347_v14 = vadd.f32 %v9073_v26, %v15100_v3  ;;  %v9730_v32 = vadd.f32 %v9474_v19, %v9346_v0  ;;  %v9480_v3 = vrot.slane %v15058_v57, 2 }
 0x306   : > { %10763 = vst.msk [vmem:[%s13657_s19 + $0x64] sm:$0xf] %vm10737_vm2, %v11184_v30  ;;  %v10476_v56 = vcombine.low %v9883_v18, %v9884_v31 }
 0x307   : > { %v9075_v44 = vpop.permute.xlu0 %9074  ;;  %v9731_v47 = vadd.f32 %v9475_v29, %v9347_v14  ;;  %v9885_v21 = vadd.f32 %v14939_v37, %v9730_v32  ;;  %v9481_v29 = vrot.slane %v15059_v55, 2 }
 0x308   : > { %v9348_v39 = vadd.f32 %v9075_v44, %v15101_v35  ;;  %v10490_v36 = vrot.slane %v10476_v56, %v12824_v28  ;;  %v9077_v45 = vpop.permute.xlu1 %9076 }
 0x309   : > { %v9886_v12 = vadd.f32 %v13522_v15, %v9731_v47  ;;  %v9349_v61 = vadd.f32 %v9077_v45, %v15102_v22  ;;  %v9483_v45 = vrot.slane %v13613_v33, 2 }
 0x30a   : > { %v9732_v50 = vadd.f32 %v9476_v23, %v9348_v39  ;;  %v10491_v42 = vcombine.low %v10483_v49, %v10490_v36  ;;  %v9482_v23 = vrot.slane %v15062_v51, 2 }
 0x30b   : > { %v9733_v58 = vadd.f32 %v9477_v25, %v9349_v61  ;;  %v9079_v24 = vpop.permute.xlu0 %9078  ;;  %v10492_v41 = vcombine.low %v9885_v21, %v9886_v12 }
 0x30c   : > { %v9887_v38 = vadd.f32 %v12913_v7, %v9732_v50  ;;  %v11185_v60 = vpack.c.bf16 %v10491_v42, %v10491_v42  ;;  %v9350_v5 = vadd.f32 %v9079_v24, %v15105_v40 }
 0x30d   : > { %v9081_v54 = vpop.permute.xlu1 %9080  ;;  %v9888_v8 = vadd.f32 %v13528_v2, %v9733_v58  ;;  %v10500_v0 = vrot.slane %v10492_v41, %v12824_v28  ;;  %v9485_v58 = vrot.slane %v13616_v17, 2 }
 0x30e   : > { %v9351_v13 = vadd.f32 %v9081_v54, %v15104_v62  ;;  %10764 = vst.msk [vmem:[%s13657_s19 + $0x68] sm:$0xf] %vm10737_vm2, %v11185_v60  ;;  %v9734_v63 = vadd.f32 %v9478_v43, %v9350_v5 }
 0x30f   : > { %v10493_v59 = vcombine.low %v9887_v38, %v9888_v8  ;;  %v9484_v38 = vrot.slane %v13627_v53, 2  ;;  %v9486_v8 = vrot.slane %v13636_v6, 2 }
 0x310   : > { %v9735_v30 = vadd.f32 %v9479_v52, %v9351_v13  ;;  %v9083_v18 = vpop.permute.xlu0 %9082  ;;  %v9889_v26 = vadd.f32 %v14939_v37, %v9734_v63 }
 0x311   : > { %v9352_v19 = vadd.f32 %v9083_v18, %v15106_v48  ;;  %v10507_v11 = vrot.slane %v10493_v59, %v12824_v28  ;;  %v9085_v35 = vpop.permute.xlu1 %9084  ;;  %v9487_v59 = vrot.slane %v14213_v34, 2 }
 0x312   : > { %v9890_v31 = vadd.f32 %v13522_v15, %v9735_v30  ;;  %v9353_v14 = vadd.f32 %v9085_v35, %v15058_v57 }
 0x313   : > { %v9736_v32 = vadd.f32 %v9480_v3, %v9352_v19  ;;  %v10508_v56 = vcombine.low %v10500_v0, %v10507_v11 }
 0x314   : > { %v9087_v44 = vpop.permute.xlu0 %9086  ;;  %v9737_v47 = vadd.f32 %v9481_v29, %v9353_v14  ;;  %v10509_v36 = vcombine.low %v9889_v26, %v9890_v31  ;;  %v9488_v31 = vrot.slane %v13645_v4, 2  ;;  %v9489_v29 = vrot.slane %v14235_v20, 2 }
 0x315   : > { %v9891_v22 = vadd.f32 %v12913_v7, %v9736_v32  ;;  %v9354_v39 = vadd.f32 %v9087_v44, %v15059_v55  ;;  %v11186_v49 = vpack.c.bf16 %v10508_v56, %v10508_v56  ;;  %v9089_v46 = vpop.permute.xlu1 %9088 }
 0x316   : > { %v9892_v25 = vadd.f32 %v13528_v2, %v9737_v47  ;;  %v9355_v12 = vadd.f32 %v9089_v46, %v15062_v51  ;;  %v10517_v42 = vrot.slane %v10509_v36, %v12824_v28 }
 0x317   : > { %v9738_v57 = vadd.f32 %v9482_v23, %v9354_v39  ;;  %10765 = vst.msk [vmem:[%s13657_s19 + $0x6c] sm:$0xf] %vm10737_vm2, %v11186_v49  ;;  %v9490_v39 = vrot.slane %v15069_v16, 2 }
 0x318   : > { %v10510_v21 = vcombine.low %v9891_v22, %v9892_v25  ;;  %v9739_v61 = vadd.f32 %v9483_v45, %v9355_v12  ;;  %v9091_v50 = vpop.permute.xlu0 %9090  ;;  %v9491_v25 = vrot.slane %v14261_v9, 2 }
 0x319   : > { %v9356_v24 = vadd.f32 %v9091_v50, %v13613_v33  ;;  %v9893_v51 = vadd.f32 %v14939_v37, %v9738_v57 }
 0x31a   : > { %v9093_v55 = vpop.permute.xlu1 %9092  ;;  %v10524_v60 = vrot.slane %v10510_v21, %v12824_v28  ;;  %v9894_v54 = vadd.f32 %v13522_v15, %v9739_v61  ;;  %v9492_v61 = vrot.slane %v14256_v27, 2 }
 0x31b   : > { %v9357_v62 = vadd.f32 %v9093_v55, %v13627_v53  ;;  %v9740_v43 = vadd.f32 %v9484_v38, %v9356_v24 }
 0x31c   : > { %v10525_v40 = vcombine.low %v10517_v42, %v10524_v60  ;;  %v9095_v41 = vpop.permute.xlu0 %9094  ;;  %v10526_v52 = vcombine.low %v9893_v51, %v9894_v54 }
 0x31d   : > { %v9741_v5 = vadd.f32 %v9485_v58, %v9357_v62  ;;  %v9895_v17 = vadd.f32 %v12913_v7, %v9740_v43  ;;  %v9358_v48 = vadd.f32 %v9095_v41, %v13631_v10  ;;  %v9493_v58 = vrot.slane %v14280_v1, 2 }
 0x31e   : > { %v11187_v33 = vpack.c.bf16 %v10525_v40, %v10525_v40  ;;  %v9097_v63 = vpop.permute.xlu1 %9096  ;;  %v10534_v0 = vrot.slane %v10526_v52, %v12824_v28 }
 0x31f   : > { %v9896_v13 = vadd.f32 %v13528_v2, %v9741_v5  ;;  %v9359_v30 = vadd.f32 %v9097_v63, %v13636_v6  ;;  %v9742_v53 = vadd.f32 %v9486_v8, %v9358_v48 }
 0x320   : > { %10766 = vst.msk [vmem:[%s13657_s19 + $0x70] sm:$0xf] %vm10737_vm2, %v11187_v33 }
 0x321   : > { %v10527_v18 = vcombine.low %v9895_v17, %v9896_v13  ;;  %v9743_v3 = vadd.f32 %v9487_v59, %v9359_v30  ;;  %v9099_v19 = vpop.permute.xlu0 %9098  ;;  %v9897_v6 = vadd.f32 %v14939_v37, %v9742_v53 }
 0x322   : > { %v9101_v10 = vpop.permute.xlu1 %9100  ;;  %v9360_v26 = vadd.f32 %v9099_v19, %v14213_v34 }
 0x323   : > { %v10541_v11 = vrot.slane %v10527_v18, %v12824_v28  ;;  %v9898_v35 = vadd.f32 %v13522_v15, %v9743_v3  ;;  %v9361_v14 = vadd.f32 %v9101_v10, %v13645_v4 }
 0x324   : > { %v9744_v56 = vadd.f32 %v9488_v31, %v9360_v26 }
 0x325   : > { %v10542_v32 = vcombine.low %v10534_v0, %v10541_v11  ;;  %v9745_v44 = vadd.f32 %v9489_v29, %v9361_v14  ;;  %v10543_v49 = vcombine.low %v9897_v6, %v9898_v35 }
 0x326   : > { %v9103_v47 = vpop.permute.xlu0 %9102  ;;  %v9899_v23 = vadd.f32 %v12913_v7, %v9744_v56 }
 0x327   : > { %v11188_v22 = vpack.c.bf16 %v10542_v32, %v10542_v32  ;;  %v9362_v34 = vadd.f32 %v9103_v47, %v14235_v20  ;;  %v9900_v36 = vadd.f32 %v13528_v2, %v9745_v44  ;;  %v9105_v46 = vpop.permute.xlu1 %9104  ;;  %v10551_v20 = vrot.slane %v10543_v49, %v12824_v28 }
 0x328   : > { %v9363_v4 = vadd.f32 %v9105_v46, %v15069_v16 }
 0x329   : > { %10767 = vst.msk [vmem:[%s13657_s19 + $0x74] sm:$0xf] %vm10737_vm2, %v11188_v22  ;;  %v9746_v45 = vadd.f32 %v9490_v39, %v9362_v34  ;;  %v10544_v12 = vcombine.low %v9899_v23, %v9900_v36 }
 0x32a   : > { %v9107_v57 = vpop.permute.xlu0 %9106  ;;  %v9747_v21 = vadd.f32 %v9491_v25, %v9363_v4 }
 0x32b   : > { %v9364_v50 = vadd.f32 %v9107_v57, %v14261_v9  ;;  %v10558_v42 = vrot.slane %v10544_v12, %v12824_v28  ;;  %v9901_v38 = vadd.f32 %v14939_v37, %v9746_v45 }
 0x32c   : > { %v9109_v55 = vpop.permute.xlu1 %9108  ;;  %v9902_v16 = vadd.f32 %v13522_v15, %v9747_v21 }
 0x32d   : > { %v9365_v24 = vadd.f32 %v9109_v55, %v14256_v27  ;;  %v9748_v60 = vadd.f32 %v9492_v61, %v9364_v50  ;;  %v10559_v54 = vcombine.low %v10551_v20, %v10558_v42 }
 0x32e   : > { %v10560_v43 = vcombine.low %v9901_v38, %v9902_v16 }
 0x32f   : > { %v9749_v51 = vadd.f32 %v9493_v58, %v9365_v24  ;;  %v9903_v9 = vadd.f32 %v12913_v7, %v9748_v60  ;;  %v11189_v62 = vpack.c.bf16 %v10559_v54, %v10559_v54 }
 0x330   : > { %v10568_v15 = vrot.slane %v10560_v43, %v12824_v28 }
 0x331   : > { %v9904_v1 = vadd.f32 %v13528_v2, %v9749_v51  ;;  %10768 = vst.msk [vmem:[%s13657_s19 + $0x78] sm:$0xf] %vm10737_vm2, %v11189_v62 }
 0x333   : > { %v10561_v40 = vcombine.low %v9903_v9, %v9904_v1 }
 0x335   : > { %v10575_v37 = vrot.slane %v10561_v40, %v12824_v28 }
 0x337   : > { %v10576_v27 = vcombine.low %v10568_v15, %v10575_v37 }
 0x339   : > { %v11190_v7 = vpack.c.bf16 %v10576_v27, %v10576_v27 }
 0x33b   : > { %10769 = vst.msk [vmem:[%s13657_s19 + $0x7c] sm:$0xf] %vm10737_vm2, %v11190_v7 }
 0x33c   : > { %11253 = shalt.err (!%p11250_p3)
}
 0x33d   : > { %s11254_s5 = scalar_lea.hbm %s14534_s27, 2048  ;;  %s11258_s8 = scalar_lea.hbm %s14587_s3, 4096 }
 0x33e   : > { %p11255_p4 = scmp.ne.s32.totalorder %s14534_s27, %s11254_s5  ;;  %p11259_p9 = scmp.lt.s32.totalorder %s14534_s27, %s14587_s3 }
 0x33f   : > { %p11260_p10 = scmp.lt.s32.totalorder %s11258_s8, %s11254_s5 }
 0x340   : > { %p11256_p7 = pnand %p11255_p4, %p11367_p5 }
 0x341   : > { %p11261_p11 = por %p11260_p10, %p11259_p9 }
 0x342   : > { %p11257_p8 = pneg %p11256_p7 }
 0x344   : > { %p11262_p12 = pnand %p11261_p11, %p11257_p8 }
 0x346   : > { %11265 = shalt.err (!%p11262_p12)
}
 0x347   : > { %s11308_s17 = smov 4  }
 0x348   : > { %11194 = dma.vmem_to_hbm [thread:$0]  (%p11367_p5), %s14536_s24, 2048, %s14534_s27, %s14542_s28, %s11306_s10, %s11306_s10, %s11308_s17  }
 0x349 PF: > { %p11200_p13 = scmp.ge.s32.totalorder %s11300_s15, 2  ;;  %s10799_s19 = sand.u32 1, %s11288_s12  }
 0x34a   : > { %s10800_s20 = scalar_lea.sflag [#allocation4], %s10799_s19 }
 0x34b   : > { %p11197_p0 = pnand %p11200_p13, %p11371_p6 }
 0x34d   : > { %p11198_p1 = pneg %p11197_p0 }
 0x34f   : > { %11283 = dma.done.wait (%p11198_p1), %s10800_s20, 2048  }
 0x350   : > { %11285 = vsyncadd (%p11198_p1), %s10800_s20, 4294965248  ;;  %p13_p2 = scmp.ge.s32.totalorder %s11354_s18, 4   ;;  %s15107_s12 = smov %s11292_s13 }
 0x351   : > { %s15108_s13 = smov %s11296_s14  ;;  %s15109_s14 = smov %s11365_s21 }
 0x352   : > { %s15110_s15 = smov %s11354_s18  ;;  %15 = sbr.rel (!%p13_p2) target bundleno = 3 (0x3), region = 72 }
 0x357   :  { %10805 = vsyncpa [#allocation4], 1 }
 0x358   :  { %10807 = vsyncpa [#allocation4 + $0x1], 1 }

</bundles_post_ra>
